<compile_context>
chip_gen: v7x
topology: tpu7x:2x2x1
jax: 0.10.0
libtpu: 0.0.40
codegen_flags: <defaults>
</compile_context>

<pallas_src>
import functools

import jax
import jax.numpy as jnp
import numpy as np
from jax.experimental import pallas as pl
from jax.experimental.pallas import tpu as pltpu


# -----------------------------------------------------------------------------
# Static geometry & host-side constants (compile-time constants under jit)
# -----------------------------------------------------------------------------
def _geom(H, W):
    """Padded-flat geometry of an HxW map with a 1-pixel zero halo."""
    Wp = W + 2                      # padded row stride
    R = (H + 2) * Wp                # total flat length
    s0 = Wp + 1                     # flat index of interior pixel (0, 0)
    L = (H - 1) * Wp + W            # interior span (includes embedded halo cols)
    Lb = L - Wp - 1                 # valid 2x2 pooling-window anchors
    return Wp, R, s0, L, Lb


@functools.lru_cache(maxsize=None)
def _col_mask_np(H, W):
    """(1, L) 0/1 mask of interior (non-halo) columns within the conv span."""
    Wp, _, _, L, _ = _geom(H, W)
    q = np.arange(L)
    return ((q % Wp) < W).astype(np.float32).reshape(1, L)


@functools.lru_cache(maxsize=None)
def _pool_selT_np(H, W):
    """(Lb, R_half) one-hot: picks 2x2-max anchors into the padded half-res map."""
    Wp, _, _, _, Lb = _geom(H, W)
    H2, W2 = H // 2, W // 2
    Wp2, R2, _, _, _ = _geom(H2, W2)
    S = np.zeros((Lb, R2), np.float32)
    for i in range(H2):
        for j in range(W2):
            S[2 * i * Wp + 2 * j, (i + 1) * Wp2 + (j + 1)] = 1.0
    return S


@functools.lru_cache(maxsize=None)
def _up_scatT_np(h_lo, w_lo):
    """(4*R_lo, R_hi) one-hot scatter of ConvTranspose2d(k=2,s=2) phase outputs
    into the zero-padded hi-res layout.  Row block k = 2*kh + kw."""
    H, W = 2 * h_lo, 2 * w_lo
    Wp, R_hi, _, _, _ = _geom(H, W)
    Wp_lo, R_lo, _, _, _ = _geom(h_lo, w_lo)
    S = np.zeros((4 * R_lo, R_hi), np.float32)
    for kh in range(2):
        for kw in range(2):
            k = 2 * kh + kw
            for i in range(h_lo):
                for j in range(w_lo):
                    S[k * R_lo + (i + 1) * Wp_lo + (j + 1),
                      (2 * i + kh + 1) * Wp + (2 * j + kw + 1)] = 1.0
    return S


@functools.lru_cache(maxsize=None)
def _interior_mask_np(H, W):
    """(1, R) 0/1 mask of interior positions of a padded-flat map."""
    Wp, R, _, _, _ = _geom(H, W)
    m = np.zeros((1, R), np.float32)
    for i in range(H):
        m[0, (i + 1) * Wp + 1:(i + 1) * Wp + 1 + W] = 1.0
    return m


# -----------------------------------------------------------------------------
# In-kernel building blocks (pure jnp dataflow on VMEM-resident values)
# -----------------------------------------------------------------------------
def _conv3x3_relu(srcs, w_ref, b_ref, H, W):
    """3x3 'same' conv + (folded-BN) bias + ReLU over padded-flat (C, R) sources.

    K-stacked single GEMM: shifted views are concatenated along the
    contraction dim -> (Cout, 9*sum(Cin)) x (9*sum(Cin), L), f32 accumulate.
    Weight column layout: source-major, then tap k = 3*(dh+1)+(dw+1), then cin,
    i.e. w[co, src_off + k*Cin + ci] == torch_w[co, ci_in_cat, dh+1, dw+1].
    """
    Wp, _, s0, L, _ = _geom(H, W)
    offs = [dh * Wp + dw for dh in (-1, 0, 1) for dw in (-1, 0, 1)]
    patches = jnp.concatenate(
        [src[:, s0 + d:s0 + d + L] for src in srcs for d in offs], axis=0)
    y = jnp.dot(w_ref[...], patches, preferred_element_type=jnp.float32)
    return jnp.maximum(y + b_ref[...], 0.0)            # (Cout, L) f32


def _pad_halo(y_bf16, H, W):
    """Re-embed a masked (C, L) interior span into the zero-padded (C, R) layout."""
    _, _, s0, _, _ = _geom(H, W)
    z = jnp.zeros((y_bf16.shape[0], s0), y_bf16.dtype)
    return jnp.concatenate([z, y_bf16, z], axis=1)      # (C, R)


def _double_conv(srcs, p, cmask_ref, H, W):
    """Conv3x3+BN(folded)+ReLU -> Conv3x3+BN(folded)+ReLU.  Returns ((C,L) f32, cmask)."""
    cmask = cmask_ref[...]
    y1 = _conv3x3_relu(srcs, p["w1"], p["b1"], H, W) * cmask
    h1 = _pad_halo(y1.astype(jnp.bfloat16), H, W)       # intermediate stays in VMEM
    y2 = _conv3x3_relu([h1], p["w2"], p["b2"], H, W)
    return y2, cmask


def _encoder_block(srcs, p, cmask_ref, selT_ref, H, W):
    """DoubleConv with fused 2x2 max-pool epilogue (pool from in-register f32)."""
    Wp, _, _, _, Lb = _geom(H, W)
    y2, cmask = _double_conv(srcs, p, cmask_ref, H, W)
    skip = _pad_halo((y2 * cmask).astype(jnp.bfloat16), H, W)
    m4 = jnp.maximum(jnp.maximum(y2[:, 0:Lb], y2[:, 1:1 + Lb]),
                     jnp.maximum(y2[:, Wp:Wp + Lb], y2[:, Wp + 1:Wp + 1 + Lb]))
    pooled = jnp.dot(m4.astype(jnp.bfloat16), selT_ref[...],
                     preferred_element_type=jnp.float32)        # (C, R_half)
    return skip, pooled.astype(jnp.bfloat16)            # pooled has exact-zero halos


def _decoder_block(x_lo, skip, up_p, dec_p, cmask_ref, scatT_ref, H, W):
    """Fused ConvTranspose2d(k2,s2) + skip-'concat' + DoubleConv at hi-res (H, W)."""
    # ConvTranspose: one phase-stacked GEMM + one one-hot scatter GEMM.
    t = jnp.dot(up_p["wt"][...], x_lo, preferred_element_type=jnp.float32)
    c_up = t.shape[0] // 4
    t2 = jnp.concatenate([t[k * c_up:(k + 1) * c_up, :] for k in range(4)],
                         axis=1).astype(jnp.bfloat16)    # (C_up, 4*R_lo)
    up = jnp.dot(t2, scatT_ref[...], preferred_element_type=jnp.float32)
    up = (up + up_p["bmap"][...]).astype(jnp.bfloat16)   # bias only on interior; halos stay 0
    # DoubleConv over the implicit concat([up, skip]) as one split-K GEMM.
    y2, cmask = _double_conv([up, skip], dec_p, cmask_ref, H, W)
    return _pad_halo((y2 * cmask).astype(jnp.bfloat16), H, W)


# -----------------------------------------------------------------------------
# Fully fused forward pass: ONE pallas_call, grid over batch ("parallel")
# -----------------------------------------------------------------------------
def _full_spec(arr):
    nd = arr.ndim
    return pl.BlockSpec(arr.shape, lambda b: (0,) * nd)


def unet_apply(params, x_nchw):
    N, Cin, H, W = x_nchw.shape
    depth = len(params["enc"])
    assert H % (1 << depth) == 0 and W % (1 << depth) == 0
    sizes = [(H >> i, W >> i) for i in range(depth + 1)]
    _, R0, _, _, _ = _geom(H, W)
    out_ch = params["final"]["w"].shape[0]

    # --- operand pytree: parameters + geometry-dependent constants ----------
    up_ops = []
    for i in range(depth):
        h_hi, w_hi = sizes[depth - 1 - i]
        bmap = params["up"][i]["bt"].reshape(-1, 1) * jnp.asarray(
            _interior_mask_np(h_hi, w_hi))               # precomputed bias map
        up_ops.append({"wt": params["up"][i]["wt"], "bmap": bmap})

    operands = {
        "enc": params["enc"],
        "bottom": params["bottom"],
        "up": up_ops,
        "dec": params["dec"],
        "final": params["final"],
        "cmask": [jnp.asarray(_col_mask_np(h, w)) for h, w in sizes],
        "selT": [jnp.asarray(_pool_selT_np(h, w), jnp.bfloat16)
                 for h, w in sizes[:depth]],
        "scatT": [jnp.asarray(_up_scatT_np(*sizes[depth - i]), jnp.bfloat16)
                  for i in range(depth)],
    }
    leaves, treedef = jax.tree_util.tree_flatten(operands)

    # --- input in padded-flat lane-dense layout: (N, Cin, (H+2)*(W+2)) bf16 --
    xp = jnp.pad(x_nchw, ((0, 0), (0, 0), (1, 1), (1, 1)))
    xp = xp.reshape(N, Cin, R0).astype(jnp.bfloat16)

    def kernel(x_ref, *refs):
        out_ref = refs[-1]
        op = jax.tree_util.tree_unflatten(treedef, refs[:-1])

        srcs = [x_ref[...]]                               # (Cin, R0) bf16, zero halos
        skips = []
        for i in range(depth):
            h, w = sizes[i]
            skip, pooled = _encoder_block(srcs, op["enc"][i], op["cmask"][i],
                                          op["selT"][i], h, w)
            skips.append(skip)
            srcs = [pooled]

        h, w = sizes[depth]
        y2, cmask = _double_conv(srcs, op["bottom"], op["cmask"][depth], h, w)
        xcur = _pad_halo((y2 * cmask).astype(jnp.bfloat16), h, w)

        for i in range(depth):
            h, w = sizes[depth - 1 - i]
            xcur = _decoder_block(xcur, skips[depth - 1 - i], op["up"][i],
                                  op["dec"][i], op["cmask"][depth - 1 - i],
                                  op["scatT"][i], h, w)

        # final 1x1 conv fused as a lane-dense epilogue: (out_ch, R0) f32
        y = jnp.dot(op["final"]["w"][...], xcur,
                    preferred_element_type=jnp.float32) + op["final"]["b"][...]
        out_ref[...] = y

    out = pl.pallas_call(
        kernel,
        out_shape=jax.ShapeDtypeStruct((N, out_ch, R0), jnp.float32),
        grid_spec=pltpu.PrefetchScalarGridSpec(
            num_scalar_prefetch=0,
            grid=(N,),
            in_specs=[pl.BlockSpec((None, Cin, R0), lambda b: (b, 0, 0))]
                     + [_full_spec(a) for a in leaves],
            out_specs=pl.BlockSpec((None, out_ch, R0), lambda b: (b, 0, 0)),
        ),
        compiler_params=pltpu.CompilerParams(dimension_semantics=("parallel",)),
    )(xp, *leaves)

    y = out.reshape(N, out_ch, H + 2, W + 2)[:, :, 1:H + 1, 1:W + 1]
    return y                                              # NCHW, f32


# -----------------------------------------------------------------------------
# Parameter init (deterministic, synthetic; BN eval-mode folded into weights)
# Conv weight layout: (Cout, 9*Cin), columns = tap-major then cin
#   (== torch (Cout,Cin,3,3)[co, ci, kh, kw] at column (3*kh+kw)*Cin + ci).
# ConvTranspose weight: (4*Cout, Cin), rows = phase-major (k = 2*kh + kw)
#   (== torch (Cin,Cout,2,2)[ci, co, kh, kw] at row k*Cout + co).
# -----------------------------------------------------------------------------
def _init_double_conv(key, cin, cout, eps=1e-5):
    k1, k2, k3, k4 = jax.random.split(key, 4)
    s = 1.0 / np.sqrt(1.0 + eps)          # gamma=1, var=1, mean=0, beta=0
    w1 = jax.random.normal(k1, (cout, 9 * cin), jnp.float32) / np.sqrt(9 * cin)
    b1 = 0.1 * jax.random.normal(k2, (cout, 1), jnp.float32)
    w2 = jax.random.normal(k3, (cout, 9 * cout), jnp.float32) / np.sqrt(9 * cout)
    b2 = 0.1 * jax.random.normal(k4, (cout, 1), jnp.float32)
    return {"w1": (w1 * s).astype(jnp.bfloat16), "b1": b1 * s,
            "w2": (w2 * s).astype(jnp.bfloat16), "b2": b2 * s}


def _init_upconv(key, cin, cout):
    k1, k2 = jax.random.split(key)
    wt = jax.random.normal(k1, (4 * cout, cin), jnp.float32) / np.sqrt(4 * cin)
    bt = 0.1 * jax.random.normal(k2, (cout,), jnp.float32)
    return {"wt": wt.astype(jnp.bfloat16), "bt": bt}


def _init_final(key, cin, cout):
    k1, k2 = jax.random.split(key)
    w = jax.random.normal(k1, (cout, cin), jnp.float32) / np.sqrt(cin)
    b = 0.1 * jax.random.normal(k2, (cout, 1), jnp.float32)
    return {"w": w.astype(jnp.bfloat16), "b": b}


def init_unet(key, in_channels=1, base_out_channels=8, depth=3):
    params = {"enc": [], "up": [], "dec": []}
    ch = in_channels
    for i in range(depth):
        key, sub = jax.random.split(key)
        cout = base_out_channels * 2 ** i
        params["enc"].append(_init_double_conv(sub, ch, cout))
        ch = cout
    key, sub = jax.random.split(key)
    params["bottom"] = _init_double_conv(sub, ch, 2 * ch)
    ch = 2 * ch
    for i in reversed(range(depth)):
        key, k1, k2 = jax.random.split(key, 3)
        cout = base_out_channels * 2 ** i
        params["up"].append(_init_upconv(k1, ch, cout))
        # decoder DoubleConv input = concat([up, skip]) -> 2*cout channels
        params["dec"].append(_init_double_conv(k2, 2 * cout, cout))
        ch = cout
    key, sub = jax.random.split(key)
    params["final"] = _init_final(sub, ch, in_channels)
    return params


# -----------------------------------------------------------------------------
if __name__ == "__main__":
    key = jax.random.PRNGKey(0)
    pkey, xkey = jax.random.split(key)

    IN_CH, BASE, DEPTH = 1, 8, 3  # small config consistent with the module
    params = init_unet(pkey, in_channels=IN_CH, base_out_channels=BASE, depth=DEPTH)

    x = jax.random.normal(xkey, (2, IN_CH, 16, 16), jnp.float32)  # NCHW like PyTorch

    fwd = jax.jit(unet_apply)
    out = fwd(params, x)
    jax.block_until_ready(out)

    assert out.shape == (2, IN_CH, 16, 16), out.shape
    assert bool(jnp.all(jnp.isfinite(out)))
    print("KERNEL_OK")
</pallas_src>

<mosaic_0001>
module attributes {stable_mosaic.version = 11 : i64} {
  func.func @kernel(%arg0: i32, %arg1: memref<1x1x324xbf16, #tpu.memory_space<vmem>>, %arg2: memref<64x1xf32, #tpu.memory_space<vmem>>, %arg3: memref<64x1xf32, #tpu.memory_space<vmem>>, %arg4: memref<64x288xbf16, #tpu.memory_space<vmem>>, %arg5: memref<64x576xbf16, #tpu.memory_space<vmem>>, %arg6: memref<1x286xf32, #tpu.memory_space<vmem>>, %arg7: memref<1x78xf32, #tpu.memory_space<vmem>>, %arg8: memref<1x22xf32, #tpu.memory_space<vmem>>, %arg9: memref<1x6xf32, #tpu.memory_space<vmem>>, %arg10: memref<32x1xf32, #tpu.memory_space<vmem>>, %arg11: memref<32x1xf32, #tpu.memory_space<vmem>>, %arg12: memref<32x576xbf16, #tpu.memory_space<vmem>>, %arg13: memref<32x288xbf16, #tpu.memory_space<vmem>>, %arg14: memref<16x1xf32, #tpu.memory_space<vmem>>, %arg15: memref<16x1xf32, #tpu.memory_space<vmem>>, %arg16: memref<16x288xbf16, #tpu.memory_space<vmem>>, %arg17: memref<16x144xbf16, #tpu.memory_space<vmem>>, %arg18: memref<8x1xf32, #tpu.memory_space<vmem>>, %arg19: memref<8x1xf32, #tpu.memory_space<vmem>>, %arg20: memref<8x144xbf16, #tpu.memory_space<vmem>>, %arg21: memref<8x72xbf16, #tpu.memory_space<vmem>>, %arg22: memref<8x1xf32, #tpu.memory_space<vmem>>, %arg23: memref<8x1xf32, #tpu.memory_space<vmem>>, %arg24: memref<8x9xbf16, #tpu.memory_space<vmem>>, %arg25: memref<8x72xbf16, #tpu.memory_space<vmem>>, %arg26: memref<16x1xf32, #tpu.memory_space<vmem>>, %arg27: memref<16x1xf32, #tpu.memory_space<vmem>>, %arg28: memref<16x72xbf16, #tpu.memory_space<vmem>>, %arg29: memref<16x144xbf16, #tpu.memory_space<vmem>>, %arg30: memref<32x1xf32, #tpu.memory_space<vmem>>, %arg31: memref<32x1xf32, #tpu.memory_space<vmem>>, %arg32: memref<32x144xbf16, #tpu.memory_space<vmem>>, %arg33: memref<32x288xbf16, #tpu.memory_space<vmem>>, %arg34: memref<1x1xf32, #tpu.memory_space<vmem>>, %arg35: memref<1x8xbf16, #tpu.memory_space<vmem>>, %arg36: memref<64x36xbf16, #tpu.memory_space<vmem>>, %arg37: memref<144x100xbf16, #tpu.memory_space<vmem>>, %arg38: memref<400x324xbf16, #tpu.memory_space<vmem>>, %arg39: memref<267x100xbf16, #tpu.memory_space<vmem>>, %arg40: memref<67x36xbf16, #tpu.memory_space<vmem>>, %arg41: memref<15x16xbf16, #tpu.memory_space<vmem>>, %arg42: memref<32x36xf32, #tpu.memory_space<vmem>>, %arg43: memref<128x64xbf16, #tpu.memory_space<vmem>>, %arg44: memref<16x100xf32, #tpu.memory_space<vmem>>, %arg45: memref<64x32xbf16, #tpu.memory_space<vmem>>, %arg46: memref<8x324xf32, #tpu.memory_space<vmem>>, %arg47: memref<32x16xbf16, #tpu.memory_space<vmem>>, %arg48: memref<1x1x324xf32, #tpu.memory_space<vmem>>) attributes {dimension_semantics = [#tpu.dimension_semantics<parallel>], iteration_bounds = array<i64: 2>, scalar_prefetch = 0 : i64, scratch_operands = 0 : i64, tpu.core_type = #tpu.core_type<tc>, window_params = [{transform_indices = @transform_0, window_bounds = array<i64: 1, 1, 324>}, {pipeline_mode = #tpu.pipeline_mode<synchronous>, transform_indices = @transform_1, window_bounds = array<i64: 64, 1>}, {pipeline_mode = #tpu.pipeline_mode<synchronous>, transform_indices = @transform_2, window_bounds = array<i64: 64, 1>}, {pipeline_mode = #tpu.pipeline_mode<synchronous>, transform_indices = @transform_3, window_bounds = array<i64: 64, 288>}, {pipeline_mode = #tpu.pipeline_mode<synchronous>, transform_indices = @transform_4, window_bounds = array<i64: 64, 576>}, {pipeline_mode = #tpu.pipeline_mode<synchronous>, transform_indices = @transform_5, window_bounds = array<i64: 1, 286>}, {pipeline_mode = #tpu.pipeline_mode<synchronous>, transform_indices = @transform_6, window_bounds = array<i64: 1, 78>}, {pipeline_mode = #tpu.pipeline_mode<synchronous>, transform_indices = @transform_7, window_bounds = array<i64: 1, 22>}, {pipeline_mode = #tpu.pipeline_mode<synchronous>, transform_indices = @transform_8, window_bounds = array<i64: 1, 6>}, {pipeline_mode = #tpu.pipeline_mode<synchronous>, transform_indices = @transform_9, window_bounds = array<i64: 32, 1>}, {pipeline_mode = #tpu.pipeline_mode<synchronous>, transform_indices = @transform_10, window_bounds = array<i64: 32, 1>}, {pipeline_mode = #tpu.pipeline_mode<synchronous>, transform_indices = @transform_11, window_bounds = array<i64: 32, 576>}, {pipeline_mode = #tpu.pipeline_mode<synchronous>, transform_indices = @transform_12, window_bounds = array<i64: 32, 288>}, {pipeline_mode = #tpu.pipeline_mode<synchronous>, transform_indices = @transform_13, window_bounds = array<i64: 16, 1>}, {pipeline_mode = #tpu.pipeline_mode<synchronous>, transform_indices = @transform_14, window_bounds = array<i64: 16, 1>}, {pipeline_mode = #tpu.pipeline_mode<synchronous>, transform_indices = @transform_15, window_bounds = array<i64: 16, 288>}, {pipeline_mode = #tpu.pipeline_mode<synchronous>, transform_indices = @transform_16, window_bounds = array<i64: 16, 144>}, {pipeline_mode = #tpu.pipeline_mode<synchronous>, transform_indices = @transform_17, window_bounds = array<i64: 8, 1>}, {pipeline_mode = #tpu.pipeline_mode<synchronous>, transform_indices = @transform_18, window_bounds = array<i64: 8, 1>}, {pipeline_mode = #tpu.pipeline_mode<synchronous>, transform_indices = @transform_19, window_bounds = array<i64: 8, 144>}, {pipeline_mode = #tpu.pipeline_mode<synchronous>, transform_indices = @transform_20, window_bounds = array<i64: 8, 72>}, {pipeline_mode = #tpu.pipeline_mode<synchronous>, transform_indices = @transform_21, window_bounds = array<i64: 8, 1>}, {pipeline_mode = #tpu.pipeline_mode<synchronous>, transform_indices = @transform_22, window_bounds = array<i64: 8, 1>}, {pipeline_mode = #tpu.pipeline_mode<synchronous>, transform_indices = @transform_23, window_bounds = array<i64: 8, 9>}, {pipeline_mode = #tpu.pipeline_mode<synchronous>, transform_indices = @transform_24, window_bounds = array<i64: 8, 72>}, {pipeline_mode = #tpu.pipeline_mode<synchronous>, transform_indices = @transform_25, window_bounds = array<i64: 16, 1>}, {pipeline_mode = #tpu.pipeline_mode<synchronous>, transform_indices = @transform_26, window_bounds = array<i64: 16, 1>}, {pipeline_mode = #tpu.pipeline_mode<synchronous>, transform_indices = @transform_27, window_bounds = array<i64: 16, 72>}, {pipeline_mode = #tpu.pipeline_mode<synchronous>, transform_indices = @transform_28, window_bounds = array<i64: 16, 144>}, {pipeline_mode = #tpu.pipeline_mode<synchronous>, transform_indices = @transform_29, window_bounds = array<i64: 32, 1>}, {pipeline_mode = #tpu.pipeline_mode<synchronous>, transform_indices = @transform_30, window_bounds = array<i64: 32, 1>}, {pipeline_mode = #tpu.pipeline_mode<synchronous>, transform_indices = @transform_31, window_bounds = array<i64: 32, 144>}, {pipeline_mode = #tpu.pipeline_mode<synchronous>, transform_indices = @transform_32, window_bounds = array<i64: 32, 288>}, {pipeline_mode = #tpu.pipeline_mode<synchronous>, transform_indices = @transform_33, window_bounds = array<i64: 1, 1>}, {pipeline_mode = #tpu.pipeline_mode<synchronous>, transform_indices = @transform_34, window_bounds = array<i64: 1, 8>}, {pipeline_mode = #tpu.pipeline_mode<synchronous>, transform_indices = @transform_35, window_bounds = array<i64: 64, 36>}, {pipeline_mode = #tpu.pipeline_mode<synchronous>, transform_indices = @transform_36, window_bounds = array<i64: 144, 100>}, {pipeline_mode = #tpu.pipeline_mode<synchronous>, transform_indices = @transform_37, window_bounds = array<i64: 400, 324>}, {pipeline_mode = #tpu.pipeline_mode<synchronous>, transform_indices = @transform_38, window_bounds = array<i64: 267, 100>}, {pipeline_mode = #tpu.pipeline_mode<synchronous>, transform_indices = @transform_39, window_bounds = array<i64: 67, 36>}, {pipeline_mode = #tpu.pipeline_mode<synchronous>, transform_indices = @transform_40, window_bounds = array<i64: 15, 16>}, {pipeline_mode = #tpu.pipeline_mode<synchronous>, transform_indices = @transform_41, window_bounds = array<i64: 32, 36>}, {pipeline_mode = #tpu.pipeline_mode<synchronous>, transform_indices = @transform_42, window_bounds = array<i64: 128, 64>}, {pipeline_mode = #tpu.pipeline_mode<synchronous>, transform_indices = @transform_43, window_bounds = array<i64: 16, 100>}, {pipeline_mode = #tpu.pipeline_mode<synchronous>, transform_indices = @transform_44, window_bounds = array<i64: 64, 32>}, {pipeline_mode = #tpu.pipeline_mode<synchronous>, transform_indices = @transform_45, window_bounds = array<i64: 8, 324>}, {pipeline_mode = #tpu.pipeline_mode<synchronous>, transform_indices = @transform_46, window_bounds = array<i64: 32, 16>}, {transform_indices = @transform_47, window_bounds = array<i64: 1, 1, 324>}]} {
    %c0 = arith.constant 0 : index
    %c0_0 = arith.constant 0 : index
    %c0_1 = arith.constant 0 : index
    %0 = vector.load %arg1[%c0, %c0_0, %c0_1] : memref<1x1x324xbf16, #tpu.memory_space<vmem>>, vector<1x1x324xbf16>
    %1 = vector.shape_cast %0 : vector<1x1x324xbf16> to vector<1x324xbf16>
    %c0_2 = arith.constant 0 : index
    %c0_3 = arith.constant 0 : index
    %2 = vector.load %arg6[%c0_2, %c0_3] : memref<1x286xf32, #tpu.memory_space<vmem>>, vector<1x286xf32>
    %3 = vector.extract_strided_slice %1 {offsets = [0, 0], sizes = [1, 286], strides = [1, 1]} : vector<1x324xbf16> to vector<1x286xbf16>
    %4 = vector.extract_strided_slice %1 {offsets = [0, 1], sizes = [1, 286], strides = [1, 1]} : vector<1x324xbf16> to vector<1x286xbf16>
    %5 = vector.extract_strided_slice %1 {offsets = [0, 2], sizes = [1, 286], strides = [1, 1]} : vector<1x324xbf16> to vector<1x286xbf16>
    %6 = vector.extract_strided_slice %1 {offsets = [0, 18], sizes = [1, 286], strides = [1, 1]} : vector<1x324xbf16> to vector<1x286xbf16>
    %7 = vector.extract_strided_slice %1 {offsets = [0, 19], sizes = [1, 286], strides = [1, 1]} : vector<1x324xbf16> to vector<1x286xbf16>
    %8 = vector.extract_strided_slice %1 {offsets = [0, 20], sizes = [1, 286], strides = [1, 1]} : vector<1x324xbf16> to vector<1x286xbf16>
    %9 = vector.extract_strided_slice %1 {offsets = [0, 36], sizes = [1, 286], strides = [1, 1]} : vector<1x324xbf16> to vector<1x286xbf16>
    %10 = vector.extract_strided_slice %1 {offsets = [0, 37], sizes = [1, 286], strides = [1, 1]} : vector<1x324xbf16> to vector<1x286xbf16>
    %11 = vector.extract_strided_slice %1 {offsets = [0, 38], sizes = [1, 286], strides = [1, 1]} : vector<1x324xbf16> to vector<1x286xbf16>
    %12 = tpu.concatenate %3, %4, %5, %6, %7, %8, %9, %10, %11 in 0 : vector<1x286xbf16>, vector<1x286xbf16>, vector<1x286xbf16>, vector<1x286xbf16>, vector<1x286xbf16>, vector<1x286xbf16>, vector<1x286xbf16>, vector<1x286xbf16>, vector<1x286xbf16> -> vector<9x286xbf16>
    %c0_4 = arith.constant 0 : index
    %c0_5 = arith.constant 0 : index
    %13 = vector.load %arg24[%c0_4, %c0_5] : memref<8x9xbf16, #tpu.memory_space<vmem>>, vector<8x9xbf16>
    %cst = arith.constant dense<0.000000e+00> : vector<8x286xf32>
    %14 = tpu.matmul %13, %12, %cst {dimension_numbers = #tpu.dot_dimension_numbers<[1], [0], [0], [1], [0, 0, 1, 1], [], []>} : vector<8x9xbf16>, vector<9x286xbf16>, vector<8x286xf32> -> vector<8x286xf32>
    %c0_6 = arith.constant 0 : index
    %c0_7 = arith.constant 0 : index
    %15 = vector.load %arg22[%c0_6, %c0_7] : memref<8x1xf32, #tpu.memory_space<vmem>>, vector<8x1xf32>
    %16 = vector.broadcast %15 : vector<8x1xf32> to vector<8x286xf32>
    %17 = arith.addf %14, %16 : vector<8x286xf32>
    %cst_8 = arith.constant 0.000000e+00 : f32
    %18 = vector.broadcast %cst_8 : f32 to vector<8x286xf32>
    %19 = arith.maximumf %17, %18 : vector<8x286xf32>
    %20 = vector.broadcast %2 : vector<1x286xf32> to vector<8x286xf32>
    %21 = arith.mulf %19, %20 : vector<8x286xf32>
    %22 = arith.truncf %21 : vector<8x286xf32> to vector<8x286xbf16>
    %cst_9 = arith.constant 0.000000e+00 : bf16
    %23 = vector.broadcast %cst_9 : bf16 to vector<8x19xbf16>
    %24 = tpu.concatenate %23, %22, %23 in 1 : vector<8x19xbf16>, vector<8x286xbf16>, vector<8x19xbf16> -> vector<8x324xbf16>
    %25 = vector.extract_strided_slice %24 {offsets = [0, 0], sizes = [8, 286], strides = [1, 1]} : vector<8x324xbf16> to vector<8x286xbf16>
    %26 = vector.extract_strided_slice %24 {offsets = [0, 1], sizes = [8, 286], strides = [1, 1]} : vector<8x324xbf16> to vector<8x286xbf16>
    %27 = vector.extract_strided_slice %24 {offsets = [0, 2], sizes = [8, 286], strides = [1, 1]} : vector<8x324xbf16> to vector<8x286xbf16>
    %28 = vector.extract_strided_slice %24 {offsets = [0, 18], sizes = [8, 286], strides = [1, 1]} : vector<8x324xbf16> to vector<8x286xbf16>
    %29 = vector.extract_strided_slice %24 {offsets = [0, 19], sizes = [8, 286], strides = [1, 1]} : vector<8x324xbf16> to vector<8x286xbf16>
    %30 = vector.extract_strided_slice %24 {offsets = [0, 20], sizes = [8, 286], strides = [1, 1]} : vector<8x324xbf16> to vector<8x286xbf16>
    %31 = vector.extract_strided_slice %24 {offsets = [0, 36], sizes = [8, 286], strides = [1, 1]} : vector<8x324xbf16> to vector<8x286xbf16>
    %32 = vector.extract_strided_slice %24 {offsets = [0, 37], sizes = [8, 286], strides = [1, 1]} : vector<8x324xbf16> to vector<8x286xbf16>
    %33 = vector.extract_strided_slice %24 {offsets = [0, 38], sizes = [8, 286], strides = [1, 1]} : vector<8x324xbf16> to vector<8x286xbf16>
    %34 = tpu.concatenate %25, %26, %27, %28, %29, %30, %31, %32, %33 in 0 : vector<8x286xbf16>, vector<8x286xbf16>, vector<8x286xbf16>, vector<8x286xbf16>, vector<8x286xbf16>, vector<8x286xbf16>, vector<8x286xbf16>, vector<8x286xbf16>, vector<8x286xbf16> -> vector<72x286xbf16>
    %c0_10 = arith.constant 0 : index
    %c0_11 = arith.constant 0 : index
    %35 = vector.load %arg25[%c0_10, %c0_11] : memref<8x72xbf16, #tpu.memory_space<vmem>>, vector<8x72xbf16>
    %cst_12 = arith.constant dense<0.000000e+00> : vector<8x286xf32>
    %36 = tpu.matmul %35, %34, %cst_12 {dimension_numbers = #tpu.dot_dimension_numbers<[1], [0], [0], [1], [0, 0, 1, 1], [], []>} : vector<8x72xbf16>, vector<72x286xbf16>, vector<8x286xf32> -> vector<8x286xf32>
    %c0_13 = arith.constant 0 : index
    %c0_14 = arith.constant 0 : index
    %37 = vector.load %arg23[%c0_13, %c0_14] : memref<8x1xf32, #tpu.memory_space<vmem>>, vector<8x1xf32>
    %38 = vector.broadcast %37 : vector<8x1xf32> to vector<8x286xf32>
    %39 = arith.addf %36, %38 : vector<8x286xf32>
    %cst_15 = arith.constant 0.000000e+00 : f32
    %40 = vector.broadcast %cst_15 : f32 to vector<8x286xf32>
    %41 = arith.maximumf %39, %40 : vector<8x286xf32>
    %42 = vector.broadcast %2 : vector<1x286xf32> to vector<8x286xf32>
    %43 = arith.mulf %41, %42 : vector<8x286xf32>
    %44 = arith.truncf %43 : vector<8x286xf32> to vector<8x286xbf16>
    %cst_16 = arith.constant 0.000000e+00 : bf16
    %45 = vector.broadcast %cst_16 : bf16 to vector<8x19xbf16>
    %46 = tpu.concatenate %45, %44, %45 in 1 : vector<8x19xbf16>, vector<8x286xbf16>, vector<8x19xbf16> -> vector<8x324xbf16>
    %47 = vector.extract_strided_slice %41 {offsets = [0, 0], sizes = [8, 267], strides = [1, 1]} : vector<8x286xf32> to vector<8x267xf32>
    %48 = vector.extract_strided_slice %41 {offsets = [0, 1], sizes = [8, 267], strides = [1, 1]} : vector<8x286xf32> to vector<8x267xf32>
    %49 = arith.maximumf %47, %48 : vector<8x267xf32>
    %50 = vector.extract_strided_slice %41 {offsets = [0, 18], sizes = [8, 267], strides = [1, 1]} : vector<8x286xf32> to vector<8x267xf32>
    %51 = vector.extract_strided_slice %41 {offsets = [0, 19], sizes = [8, 267], strides = [1, 1]} : vector<8x286xf32> to vector<8x267xf32>
    %52 = arith.maximumf %50, %51 : vector<8x267xf32>
    %53 = arith.maximumf %49, %52 : vector<8x267xf32>
    %54 = arith.truncf %53 : vector<8x267xf32> to vector<8x267xbf16>
    %c0_17 = arith.constant 0 : index
    %c0_18 = arith.constant 0 : index
    %55 = vector.load %arg39[%c0_17, %c0_18] : memref<267x100xbf16, #tpu.memory_space<vmem>>, vector<267x100xbf16>
    %cst_19 = arith.constant dense<0.000000e+00> : vector<8x100xf32>
    %56 = tpu.matmul %54, %55, %cst_19 {dimension_numbers = #tpu.dot_dimension_numbers<[1], [0], [0], [1], [0, 0, 1, 1], [], []>} : vector<8x267xbf16>, vector<267x100xbf16>, vector<8x100xf32> -> vector<8x100xf32>
    %57 = arith.truncf %56 : vector<8x100xf32> to vector<8x100xbf16>
    %c0_20 = arith.constant 0 : index
    %c0_21 = arith.constant 0 : index
    %58 = vector.load %arg7[%c0_20, %c0_21] : memref<1x78xf32, #tpu.memory_space<vmem>>, vector<1x78xf32>
    %59 = vector.extract_strided_slice %57 {offsets = [0, 0], sizes = [8, 78], strides = [1, 1]} : vector<8x100xbf16> to vector<8x78xbf16>
    %60 = vector.extract_strided_slice %57 {offsets = [0, 1], sizes = [8, 78], strides = [1, 1]} : vector<8x100xbf16> to vector<8x78xbf16>
    %61 = vector.extract_strided_slice %57 {offsets = [0, 2], sizes = [8, 78], strides = [1, 1]} : vector<8x100xbf16> to vector<8x78xbf16>
    %62 = vector.extract_strided_slice %57 {offsets = [0, 10], sizes = [8, 78], strides = [1, 1]} : vector<8x100xbf16> to vector<8x78xbf16>
    %63 = vector.extract_strided_slice %57 {offsets = [0, 11], sizes = [8, 78], strides = [1, 1]} : vector<8x100xbf16> to vector<8x78xbf16>
    %64 = vector.extract_strided_slice %57 {offsets = [0, 12], sizes = [8, 78], strides = [1, 1]} : vector<8x100xbf16> to vector<8x78xbf16>
    %65 = vector.extract_strided_slice %57 {offsets = [0, 20], sizes = [8, 78], strides = [1, 1]} : vector<8x100xbf16> to vector<8x78xbf16>
    %66 = vector.extract_strided_slice %57 {offsets = [0, 21], sizes = [8, 78], strides = [1, 1]} : vector<8x100xbf16> to vector<8x78xbf16>
    %67 = vector.extract_strided_slice %57 {offsets = [0, 22], sizes = [8, 78], strides = [1, 1]} : vector<8x100xbf16> to vector<8x78xbf16>
    %68 = tpu.concatenate %59, %60, %61, %62, %63, %64, %65, %66, %67 in 0 : vector<8x78xbf16>, vector<8x78xbf16>, vector<8x78xbf16>, vector<8x78xbf16>, vector<8x78xbf16>, vector<8x78xbf16>, vector<8x78xbf16>, vector<8x78xbf16>, vector<8x78xbf16> -> vector<72x78xbf16>
    %c0_22 = arith.constant 0 : index
    %c0_23 = arith.constant 0 : index
    %69 = vector.load %arg28[%c0_22, %c0_23] : memref<16x72xbf16, #tpu.memory_space<vmem>>, vector<16x72xbf16>
    %cst_24 = arith.constant dense<0.000000e+00> : vector<16x78xf32>
    %70 = tpu.matmul %69, %68, %cst_24 {dimension_numbers = #tpu.dot_dimension_numbers<[1], [0], [0], [1], [0, 0, 1, 1], [], []>} : vector<16x72xbf16>, vector<72x78xbf16>, vector<16x78xf32> -> vector<16x78xf32>
    %c0_25 = arith.constant 0 : index
    %c0_26 = arith.constant 0 : index
    %71 = vector.load %arg26[%c0_25, %c0_26] : memref<16x1xf32, #tpu.memory_space<vmem>>, vector<16x1xf32>
    %72 = vector.broadcast %71 : vector<16x1xf32> to vector<16x78xf32>
    %73 = arith.addf %70, %72 : vector<16x78xf32>
    %cst_27 = arith.constant 0.000000e+00 : f32
    %74 = vector.broadcast %cst_27 : f32 to vector<16x78xf32>
    %75 = arith.maximumf %73, %74 : vector<16x78xf32>
    %76 = vector.broadcast %58 : vector<1x78xf32> to vector<16x78xf32>
    %77 = arith.mulf %75, %76 : vector<16x78xf32>
    %78 = arith.truncf %77 : vector<16x78xf32> to vector<16x78xbf16>
    %cst_28 = arith.constant 0.000000e+00 : bf16
    %79 = vector.broadcast %cst_28 : bf16 to vector<16x11xbf16>
    %80 = tpu.concatenate %79, %78, %79 in 1 : vector<16x11xbf16>, vector<16x78xbf16>, vector<16x11xbf16> -> vector<16x100xbf16>
    %81 = vector.extract_strided_slice %80 {offsets = [0, 0], sizes = [16, 78], strides = [1, 1]} : vector<16x100xbf16> to vector<16x78xbf16>
    %82 = vector.extract_strided_slice %80 {offsets = [0, 1], sizes = [16, 78], strides = [1, 1]} : vector<16x100xbf16> to vector<16x78xbf16>
    %83 = vector.extract_strided_slice %80 {offsets = [0, 2], sizes = [16, 78], strides = [1, 1]} : vector<16x100xbf16> to vector<16x78xbf16>
    %84 = vector.extract_strided_slice %80 {offsets = [0, 10], sizes = [16, 78], strides = [1, 1]} : vector<16x100xbf16> to vector<16x78xbf16>
    %85 = vector.extract_strided_slice %80 {offsets = [0, 11], sizes = [16, 78], strides = [1, 1]} : vector<16x100xbf16> to vector<16x78xbf16>
    %86 = vector.extract_strided_slice %80 {offsets = [0, 12], sizes = [16, 78], strides = [1, 1]} : vector<16x100xbf16> to vector<16x78xbf16>
    %87 = vector.extract_strided_slice %80 {offsets = [0, 20], sizes = [16, 78], strides = [1, 1]} : vector<16x100xbf16> to vector<16x78xbf16>
    %88 = vector.extract_strided_slice %80 {offsets = [0, 21], sizes = [16, 78], strides = [1, 1]} : vector<16x100xbf16> to vector<16x78xbf16>
    %89 = vector.extract_strided_slice %80 {offsets = [0, 22], sizes = [16, 78], strides = [1, 1]} : vector<16x100xbf16> to vector<16x78xbf16>
    %90 = tpu.concatenate %81, %82, %83, %84, %85, %86, %87, %88, %89 in 0 : vector<16x78xbf16>, vector<16x78xbf16>, vector<16x78xbf16>, vector<16x78xbf16>, vector<16x78xbf16>, vector<16x78xbf16>, vector<16x78xbf16>, vector<16x78xbf16>, vector<16x78xbf16> -> vector<144x78xbf16>
    %c0_29 = arith.constant 0 : index
    %c0_30 = arith.constant 0 : index
    %91 = vector.load %arg29[%c0_29, %c0_30] : memref<16x144xbf16, #tpu.memory_space<vmem>>, vector<16x144xbf16>
    %cst_31 = arith.constant dense<0.000000e+00> : vector<16x78xf32>
    %92 = tpu.matmul %91, %90, %cst_31 {dimension_numbers = #tpu.dot_dimension_numbers<[1], [0], [0], [1], [0, 0, 1, 1], [], []>} : vector<16x144xbf16>, vector<144x78xbf16>, vector<16x78xf32> -> vector<16x78xf32>
    %c0_32 = arith.constant 0 : index
    %c0_33 = arith.constant 0 : index
    %93 = vector.load %arg27[%c0_32, %c0_33] : memref<16x1xf32, #tpu.memory_space<vmem>>, vector<16x1xf32>
    %94 = vector.broadcast %93 : vector<16x1xf32> to vector<16x78xf32>
    %95 = arith.addf %92, %94 : vector<16x78xf32>
    %cst_34 = arith.constant 0.000000e+00 : f32
    %96 = vector.broadcast %cst_34 : f32 to vector<16x78xf32>
    %97 = arith.maximumf %95, %96 : vector<16x78xf32>
    %98 = vector.broadcast %58 : vector<1x78xf32> to vector<16x78xf32>
    %99 = arith.mulf %97, %98 : vector<16x78xf32>
    %100 = arith.truncf %99 : vector<16x78xf32> to vector<16x78xbf16>
    %cst_35 = arith.constant 0.000000e+00 : bf16
    %101 = vector.broadcast %cst_35 : bf16 to vector<16x11xbf16>
    %102 = tpu.concatenate %101, %100, %101 in 1 : vector<16x11xbf16>, vector<16x78xbf16>, vector<16x11xbf16> -> vector<16x100xbf16>
    %103 = vector.extract_strided_slice %97 {offsets = [0, 0], sizes = [16, 67], strides = [1, 1]} : vector<16x78xf32> to vector<16x67xf32>
    %104 = vector.extract_strided_slice %97 {offsets = [0, 1], sizes = [16, 67], strides = [1, 1]} : vector<16x78xf32> to vector<16x67xf32>
    %105 = arith.maximumf %103, %104 : vector<16x67xf32>
    %106 = vector.extract_strided_slice %97 {offsets = [0, 10], sizes = [16, 67], strides = [1, 1]} : vector<16x78xf32> to vector<16x67xf32>
    %107 = vector.extract_strided_slice %97 {offsets = [0, 11], sizes = [16, 67], strides = [1, 1]} : vector<16x78xf32> to vector<16x67xf32>
    %108 = arith.maximumf %106, %107 : vector<16x67xf32>
    %109 = arith.maximumf %105, %108 : vector<16x67xf32>
    %110 = arith.truncf %109 : vector<16x67xf32> to vector<16x67xbf16>
    %c0_36 = arith.constant 0 : index
    %c0_37 = arith.constant 0 : index
    %111 = vector.load %arg40[%c0_36, %c0_37] : memref<67x36xbf16, #tpu.memory_space<vmem>>, vector<67x36xbf16>
    %cst_38 = arith.constant dense<0.000000e+00> : vector<16x36xf32>
    %112 = tpu.matmul %110, %111, %cst_38 {dimension_numbers = #tpu.dot_dimension_numbers<[1], [0], [0], [1], [0, 0, 1, 1], [], []>} : vector<16x67xbf16>, vector<67x36xbf16>, vector<16x36xf32> -> vector<16x36xf32>
    %113 = arith.truncf %112 : vector<16x36xf32> to vector<16x36xbf16>
    %c0_39 = arith.constant 0 : index
    %c0_40 = arith.constant 0 : index
    %114 = vector.load %arg8[%c0_39, %c0_40] : memref<1x22xf32, #tpu.memory_space<vmem>>, vector<1x22xf32>
    %115 = vector.extract_strided_slice %113 {offsets = [0, 0], sizes = [16, 22], strides = [1, 1]} : vector<16x36xbf16> to vector<16x22xbf16>
    %116 = vector.extract_strided_slice %113 {offsets = [0, 1], sizes = [16, 22], strides = [1, 1]} : vector<16x36xbf16> to vector<16x22xbf16>
    %117 = vector.extract_strided_slice %113 {offsets = [0, 2], sizes = [16, 22], strides = [1, 1]} : vector<16x36xbf16> to vector<16x22xbf16>
    %118 = vector.extract_strided_slice %113 {offsets = [0, 6], sizes = [16, 22], strides = [1, 1]} : vector<16x36xbf16> to vector<16x22xbf16>
    %119 = vector.extract_strided_slice %113 {offsets = [0, 7], sizes = [16, 22], strides = [1, 1]} : vector<16x36xbf16> to vector<16x22xbf16>
    %120 = vector.extract_strided_slice %113 {offsets = [0, 8], sizes = [16, 22], strides = [1, 1]} : vector<16x36xbf16> to vector<16x22xbf16>
    %121 = vector.extract_strided_slice %113 {offsets = [0, 12], sizes = [16, 22], strides = [1, 1]} : vector<16x36xbf16> to vector<16x22xbf16>
    %122 = vector.extract_strided_slice %113 {offsets = [0, 13], sizes = [16, 22], strides = [1, 1]} : vector<16x36xbf16> to vector<16x22xbf16>
    %123 = vector.extract_strided_slice %113 {offsets = [0, 14], sizes = [16, 22], strides = [1, 1]} : vector<16x36xbf16> to vector<16x22xbf16>
    %124 = tpu.concatenate %115, %116, %117, %118, %119, %120, %121, %122, %123 in 0 : vector<16x22xbf16>, vector<16x22xbf16>, vector<16x22xbf16>, vector<16x22xbf16>, vector<16x22xbf16>, vector<16x22xbf16>, vector<16x22xbf16>, vector<16x22xbf16>, vector<16x22xbf16> -> vector<144x22xbf16>
    %c0_41 = arith.constant 0 : index
    %c0_42 = arith.constant 0 : index
    %125 = vector.load %arg32[%c0_41, %c0_42] : memref<32x144xbf16, #tpu.memory_space<vmem>>, vector<32x144xbf16>
    %cst_43 = arith.constant dense<0.000000e+00> : vector<32x22xf32>
    %126 = tpu.matmul %125, %124, %cst_43 {dimension_numbers = #tpu.dot_dimension_numbers<[1], [0], [0], [1], [0, 0, 1, 1], [], []>} : vector<32x144xbf16>, vector<144x22xbf16>, vector<32x22xf32> -> vector<32x22xf32>
    %c0_44 = arith.constant 0 : index
    %c0_45 = arith.constant 0 : index
    %127 = vector.load %arg30[%c0_44, %c0_45] : memref<32x1xf32, #tpu.memory_space<vmem>>, vector<32x1xf32>
    %128 = vector.broadcast %127 : vector<32x1xf32> to vector<32x22xf32>
    %129 = arith.addf %126, %128 : vector<32x22xf32>
    %cst_46 = arith.constant 0.000000e+00 : f32
    %130 = vector.broadcast %cst_46 : f32 to vector<32x22xf32>
    %131 = arith.maximumf %129, %130 : vector<32x22xf32>
    %132 = vector.broadcast %114 : vector<1x22xf32> to vector<32x22xf32>
    %133 = arith.mulf %131, %132 : vector<32x22xf32>
    %134 = arith.truncf %133 : vector<32x22xf32> to vector<32x22xbf16>
    %cst_47 = arith.constant 0.000000e+00 : bf16
    %135 = vector.broadcast %cst_47 : bf16 to vector<32x7xbf16>
    %136 = tpu.concatenate %135, %134, %135 in 1 : vector<32x7xbf16>, vector<32x22xbf16>, vector<32x7xbf16> -> vector<32x36xbf16>
    %137 = vector.extract_strided_slice %136 {offsets = [0, 0], sizes = [32, 22], strides = [1, 1]} : vector<32x36xbf16> to vector<32x22xbf16>
    %138 = vector.extract_strided_slice %136 {offsets = [0, 1], sizes = [32, 22], strides = [1, 1]} : vector<32x36xbf16> to vector<32x22xbf16>
    %139 = vector.extract_strided_slice %136 {offsets = [0, 2], sizes = [32, 22], strides = [1, 1]} : vector<32x36xbf16> to vector<32x22xbf16>
    %140 = vector.extract_strided_slice %136 {offsets = [0, 6], sizes = [32, 22], strides = [1, 1]} : vector<32x36xbf16> to vector<32x22xbf16>
    %141 = vector.extract_strided_slice %136 {offsets = [0, 7], sizes = [32, 22], strides = [1, 1]} : vector<32x36xbf16> to vector<32x22xbf16>
    %142 = vector.extract_strided_slice %136 {offsets = [0, 8], sizes = [32, 22], strides = [1, 1]} : vector<32x36xbf16> to vector<32x22xbf16>
    %143 = vector.extract_strided_slice %136 {offsets = [0, 12], sizes = [32, 22], strides = [1, 1]} : vector<32x36xbf16> to vector<32x22xbf16>
    %144 = vector.extract_strided_slice %136 {offsets = [0, 13], sizes = [32, 22], strides = [1, 1]} : vector<32x36xbf16> to vector<32x22xbf16>
    %145 = vector.extract_strided_slice %136 {offsets = [0, 14], sizes = [32, 22], strides = [1, 1]} : vector<32x36xbf16> to vector<32x22xbf16>
    %146 = tpu.concatenate %137, %138, %139, %140, %141, %142, %143, %144, %145 in 0 : vector<32x22xbf16>, vector<32x22xbf16>, vector<32x22xbf16>, vector<32x22xbf16>, vector<32x22xbf16>, vector<32x22xbf16>, vector<32x22xbf16>, vector<32x22xbf16>, vector<32x22xbf16> -> vector<288x22xbf16>
    %c0_48 = arith.constant 0 : index
    %c0_49 = arith.constant 0 : index
    %147 = vector.load %arg33[%c0_48, %c0_49] : memref<32x288xbf16, #tpu.memory_space<vmem>>, vector<32x288xbf16>
    %cst_50 = arith.constant dense<0.000000e+00> : vector<32x22xf32>
    %148 = tpu.matmul %147, %146, %cst_50 {dimension_numbers = #tpu.dot_dimension_numbers<[1], [0], [0], [1], [0, 0, 1, 1], [], []>} : vector<32x288xbf16>, vector<288x22xbf16>, vector<32x22xf32> -> vector<32x22xf32>
    %c0_51 = arith.constant 0 : index
    %c0_52 = arith.constant 0 : index
    %149 = vector.load %arg31[%c0_51, %c0_52] : memref<32x1xf32, #tpu.memory_space<vmem>>, vector<32x1xf32>
    %150 = vector.broadcast %149 : vector<32x1xf32> to vector<32x22xf32>
    %151 = arith.addf %148, %150 : vector<32x22xf32>
    %cst_53 = arith.constant 0.000000e+00 : f32
    %152 = vector.broadcast %cst_53 : f32 to vector<32x22xf32>
    %153 = arith.maximumf %151, %152 : vector<32x22xf32>
    %154 = vector.broadcast %114 : vector<1x22xf32> to vector<32x22xf32>
    %155 = arith.mulf %153, %154 : vector<32x22xf32>
    %156 = arith.truncf %155 : vector<32x22xf32> to vector<32x22xbf16>
    %cst_54 = arith.constant 0.000000e+00 : bf16
    %157 = vector.broadcast %cst_54 : bf16 to vector<32x7xbf16>
    %158 = tpu.concatenate %157, %156, %157 in 1 : vector<32x7xbf16>, vector<32x22xbf16>, vector<32x7xbf16> -> vector<32x36xbf16>
    %159 = vector.extract_strided_slice %153 {offsets = [0, 0], sizes = [32, 15], strides = [1, 1]} : vector<32x22xf32> to vector<32x15xf32>
    %160 = vector.extract_strided_slice %153 {offsets = [0, 1], sizes = [32, 15], strides = [1, 1]} : vector<32x22xf32> to vector<32x15xf32>
    %161 = arith.maximumf %159, %160 : vector<32x15xf32>
    %162 = vector.extract_strided_slice %153 {offsets = [0, 6], sizes = [32, 15], strides = [1, 1]} : vector<32x22xf32> to vector<32x15xf32>
    %163 = vector.extract_strided_slice %153 {offsets = [0, 7], sizes = [32, 15], strides = [1, 1]} : vector<32x22xf32> to vector<32x15xf32>
    %164 = arith.maximumf %162, %163 : vector<32x15xf32>
    %165 = arith.maximumf %161, %164 : vector<32x15xf32>
    %166 = arith.truncf %165 : vector<32x15xf32> to vector<32x15xbf16>
    %c0_55 = arith.constant 0 : index
    %c0_56 = arith.constant 0 : index
    %167 = vector.load %arg41[%c0_55, %c0_56] : memref<15x16xbf16, #tpu.memory_space<vmem>>, vector<15x16xbf16>
    %cst_57 = arith.constant dense<0.000000e+00> : vector<32x16xf32>
    %168 = tpu.matmul %166, %167, %cst_57 {dimension_numbers = #tpu.dot_dimension_numbers<[1], [0], [0], [1], [0, 0, 1, 1], [], []>} : vector<32x15xbf16>, vector<15x16xbf16>, vector<32x16xf32> -> vector<32x16xf32>
    %169 = arith.truncf %168 : vector<32x16xf32> to vector<32x16xbf16>
    %c0_58 = arith.constant 0 : index
    %c0_59 = arith.constant 0 : index
    %170 = vector.load %arg9[%c0_58, %c0_59] : memref<1x6xf32, #tpu.memory_space<vmem>>, vector<1x6xf32>
    %171 = vector.extract_strided_slice %169 {offsets = [0, 0], sizes = [32, 6], strides = [1, 1]} : vector<32x16xbf16> to vector<32x6xbf16>
    %172 = vector.extract_strided_slice %169 {offsets = [0, 1], sizes = [32, 6], strides = [1, 1]} : vector<32x16xbf16> to vector<32x6xbf16>
    %173 = vector.extract_strided_slice %169 {offsets = [0, 2], sizes = [32, 6], strides = [1, 1]} : vector<32x16xbf16> to vector<32x6xbf16>
    %174 = vector.extract_strided_slice %169 {offsets = [0, 4], sizes = [32, 6], strides = [1, 1]} : vector<32x16xbf16> to vector<32x6xbf16>
    %175 = vector.extract_strided_slice %169 {offsets = [0, 5], sizes = [32, 6], strides = [1, 1]} : vector<32x16xbf16> to vector<32x6xbf16>
    %176 = vector.extract_strided_slice %169 {offsets = [0, 6], sizes = [32, 6], strides = [1, 1]} : vector<32x16xbf16> to vector<32x6xbf16>
    %177 = vector.extract_strided_slice %169 {offsets = [0, 8], sizes = [32, 6], strides = [1, 1]} : vector<32x16xbf16> to vector<32x6xbf16>
    %178 = vector.extract_strided_slice %169 {offsets = [0, 9], sizes = [32, 6], strides = [1, 1]} : vector<32x16xbf16> to vector<32x6xbf16>
    %179 = vector.extract_strided_slice %169 {offsets = [0, 10], sizes = [32, 6], strides = [1, 1]} : vector<32x16xbf16> to vector<32x6xbf16>
    %180 = tpu.concatenate %171, %172, %173, %174, %175, %176, %177, %178, %179 in 0 : vector<32x6xbf16>, vector<32x6xbf16>, vector<32x6xbf16>, vector<32x6xbf16>, vector<32x6xbf16>, vector<32x6xbf16>, vector<32x6xbf16>, vector<32x6xbf16>, vector<32x6xbf16> -> vector<288x6xbf16>
    %c0_60 = arith.constant 0 : index
    %c0_61 = arith.constant 0 : index
    %181 = vector.load %arg4[%c0_60, %c0_61] : memref<64x288xbf16, #tpu.memory_space<vmem>>, vector<64x288xbf16>
    %cst_62 = arith.constant dense<0.000000e+00> : vector<64x6xf32>
    %182 = tpu.matmul %181, %180, %cst_62 {dimension_numbers = #tpu.dot_dimension_numbers<[1], [0], [0], [1], [0, 0, 1, 1], [], []>} : vector<64x288xbf16>, vector<288x6xbf16>, vector<64x6xf32> -> vector<64x6xf32>
    %c0_63 = arith.constant 0 : index
    %c0_64 = arith.constant 0 : index
    %183 = vector.load %arg2[%c0_63, %c0_64] : memref<64x1xf32, #tpu.memory_space<vmem>>, vector<64x1xf32>
    %184 = vector.broadcast %183 : vector<64x1xf32> to vector<64x6xf32>
    %185 = arith.addf %182, %184 : vector<64x6xf32>
    %cst_65 = arith.constant 0.000000e+00 : f32
    %186 = vector.broadcast %cst_65 : f32 to vector<64x6xf32>
    %187 = arith.maximumf %185, %186 : vector<64x6xf32>
    %188 = vector.broadcast %170 : vector<1x6xf32> to vector<64x6xf32>
    %189 = arith.mulf %187, %188 : vector<64x6xf32>
    %190 = arith.truncf %189 : vector<64x6xf32> to vector<64x6xbf16>
    %cst_66 = arith.constant 0.000000e+00 : bf16
    %191 = vector.broadcast %cst_66 : bf16 to vector<64x5xbf16>
    %192 = tpu.concatenate %191, %190, %191 in 1 : vector<64x5xbf16>, vector<64x6xbf16>, vector<64x5xbf16> -> vector<64x16xbf16>
    %193 = vector.extract_strided_slice %192 {offsets = [0, 0], sizes = [64, 6], strides = [1, 1]} : vector<64x16xbf16> to vector<64x6xbf16>
    %194 = vector.extract_strided_slice %192 {offsets = [0, 1], sizes = [64, 6], strides = [1, 1]} : vector<64x16xbf16> to vector<64x6xbf16>
    %195 = vector.extract_strided_slice %192 {offsets = [0, 2], sizes = [64, 6], strides = [1, 1]} : vector<64x16xbf16> to vector<64x6xbf16>
    %196 = vector.extract_strided_slice %192 {offsets = [0, 4], sizes = [64, 6], strides = [1, 1]} : vector<64x16xbf16> to vector<64x6xbf16>
    %197 = vector.extract_strided_slice %192 {offsets = [0, 5], sizes = [64, 6], strides = [1, 1]} : vector<64x16xbf16> to vector<64x6xbf16>
    %198 = vector.extract_strided_slice %192 {offsets = [0, 6], sizes = [64, 6], strides = [1, 1]} : vector<64x16xbf16> to vector<64x6xbf16>
    %199 = vector.extract_strided_slice %192 {offsets = [0, 8], sizes = [64, 6], strides = [1, 1]} : vector<64x16xbf16> to vector<64x6xbf16>
    %200 = vector.extract_strided_slice %192 {offsets = [0, 9], sizes = [64, 6], strides = [1, 1]} : vector<64x16xbf16> to vector<64x6xbf16>
    %201 = vector.extract_strided_slice %192 {offsets = [0, 10], sizes = [64, 6], strides = [1, 1]} : vector<64x16xbf16> to vector<64x6xbf16>
    %202 = tpu.concatenate %193, %194, %195, %196, %197, %198, %199, %200, %201 in 0 : vector<64x6xbf16>, vector<64x6xbf16>, vector<64x6xbf16>, vector<64x6xbf16>, vector<64x6xbf16>, vector<64x6xbf16>, vector<64x6xbf16>, vector<64x6xbf16>, vector<64x6xbf16> -> vector<576x6xbf16>
    %c0_67 = arith.constant 0 : index
    %c0_68 = arith.constant 0 : index
    %203 = vector.load %arg5[%c0_67, %c0_68] : memref<64x576xbf16, #tpu.memory_space<vmem>>, vector<64x576xbf16>
    %cst_69 = arith.constant dense<0.000000e+00> : vector<64x6xf32>
    %204 = tpu.matmul %203, %202, %cst_69 {dimension_numbers = #tpu.dot_dimension_numbers<[1], [0], [0], [1], [0, 0, 1, 1], [], []>} : vector<64x576xbf16>, vector<576x6xbf16>, vector<64x6xf32> -> vector<64x6xf32>
    %c0_70 = arith.constant 0 : index
    %c0_71 = arith.constant 0 : index
    %205 = vector.load %arg3[%c0_70, %c0_71] : memref<64x1xf32, #tpu.memory_space<vmem>>, vector<64x1xf32>
    %206 = vector.broadcast %205 : vector<64x1xf32> to vector<64x6xf32>
    %207 = arith.addf %204, %206 : vector<64x6xf32>
    %cst_72 = arith.constant 0.000000e+00 : f32
    %208 = vector.broadcast %cst_72 : f32 to vector<64x6xf32>
    %209 = arith.maximumf %207, %208 : vector<64x6xf32>
    %210 = vector.broadcast %170 : vector<1x6xf32> to vector<64x6xf32>
    %211 = arith.mulf %209, %210 : vector<64x6xf32>
    %212 = arith.truncf %211 : vector<64x6xf32> to vector<64x6xbf16>
    %cst_73 = arith.constant 0.000000e+00 : bf16
    %213 = vector.broadcast %cst_73 : bf16 to vector<64x5xbf16>
    %214 = tpu.concatenate %213, %212, %213 in 1 : vector<64x5xbf16>, vector<64x6xbf16>, vector<64x5xbf16> -> vector<64x16xbf16>
    %c0_74 = arith.constant 0 : index
    %c0_75 = arith.constant 0 : index
    %215 = vector.load %arg43[%c0_74, %c0_75] : memref<128x64xbf16, #tpu.memory_space<vmem>>, vector<128x64xbf16>
    %cst_76 = arith.constant dense<0.000000e+00> : vector<128x16xf32>
    %216 = tpu.matmul %215, %214, %cst_76 {dimension_numbers = #tpu.dot_dimension_numbers<[1], [0], [0], [1], [0, 0, 1, 1], [], []>} : vector<128x64xbf16>, vector<64x16xbf16>, vector<128x16xf32> -> vector<128x16xf32>
    %217 = vector.extract_strided_slice %216 {offsets = [0, 0], sizes = [32, 16], strides = [1, 1]} : vector<128x16xf32> to vector<32x16xf32>
    %218 = vector.extract_strided_slice %216 {offsets = [32, 0], sizes = [32, 16], strides = [1, 1]} : vector<128x16xf32> to vector<32x16xf32>
    %219 = vector.extract_strided_slice %216 {offsets = [64, 0], sizes = [32, 16], strides = [1, 1]} : vector<128x16xf32> to vector<32x16xf32>
    %220 = vector.extract_strided_slice %216 {offsets = [96, 0], sizes = [32, 16], strides = [1, 1]} : vector<128x16xf32> to vector<32x16xf32>
    %221 = tpu.concatenate %217, %218, %219, %220 in 1 : vector<32x16xf32>, vector<32x16xf32>, vector<32x16xf32>, vector<32x16xf32> -> vector<32x64xf32>
    %222 = arith.truncf %221 : vector<32x64xf32> to vector<32x64xbf16>
    %c0_77 = arith.constant 0 : index
    %c0_78 = arith.constant 0 : index
    %223 = vector.load %arg36[%c0_77, %c0_78] : memref<64x36xbf16, #tpu.memory_space<vmem>>, vector<64x36xbf16>
    %cst_79 = arith.constant dense<0.000000e+00> : vector<32x36xf32>
    %224 = tpu.matmul %222, %223, %cst_79 {dimension_numbers = #tpu.dot_dimension_numbers<[1], [0], [0], [1], [0, 0, 1, 1], [], []>} : vector<32x64xbf16>, vector<64x36xbf16>, vector<32x36xf32> -> vector<32x36xf32>
    %c0_80 = arith.constant 0 : index
    %c0_81 = arith.constant 0 : index
    %225 = vector.load %arg42[%c0_80, %c0_81] : memref<32x36xf32, #tpu.memory_space<vmem>>, vector<32x36xf32>
    %226 = arith.addf %224, %225 : vector<32x36xf32>
    %227 = arith.truncf %226 : vector<32x36xf32> to vector<32x36xbf16>
    %c0_82 = arith.constant 0 : index
    %c0_83 = arith.constant 0 : index
    %228 = vector.load %arg8[%c0_82, %c0_83] : memref<1x22xf32, #tpu.memory_space<vmem>>, vector<1x22xf32>
    %229 = vector.extract_strided_slice %227 {offsets = [0, 0], sizes = [32, 22], strides = [1, 1]} : vector<32x36xbf16> to vector<32x22xbf16>
    %230 = vector.extract_strided_slice %227 {offsets = [0, 1], sizes = [32, 22], strides = [1, 1]} : vector<32x36xbf16> to vector<32x22xbf16>
    %231 = vector.extract_strided_slice %227 {offsets = [0, 2], sizes = [32, 22], strides = [1, 1]} : vector<32x36xbf16> to vector<32x22xbf16>
    %232 = vector.extract_strided_slice %227 {offsets = [0, 6], sizes = [32, 22], strides = [1, 1]} : vector<32x36xbf16> to vector<32x22xbf16>
    %233 = vector.extract_strided_slice %227 {offsets = [0, 7], sizes = [32, 22], strides = [1, 1]} : vector<32x36xbf16> to vector<32x22xbf16>
    %234 = vector.extract_strided_slice %227 {offsets = [0, 8], sizes = [32, 22], strides = [1, 1]} : vector<32x36xbf16> to vector<32x22xbf16>
    %235 = vector.extract_strided_slice %227 {offsets = [0, 12], sizes = [32, 22], strides = [1, 1]} : vector<32x36xbf16> to vector<32x22xbf16>
    %236 = vector.extract_strided_slice %227 {offsets = [0, 13], sizes = [32, 22], strides = [1, 1]} : vector<32x36xbf16> to vector<32x22xbf16>
    %237 = vector.extract_strided_slice %227 {offsets = [0, 14], sizes = [32, 22], strides = [1, 1]} : vector<32x36xbf16> to vector<32x22xbf16>
    %238 = vector.extract_strided_slice %158 {offsets = [0, 0], sizes = [32, 22], strides = [1, 1]} : vector<32x36xbf16> to vector<32x22xbf16>
    %239 = vector.extract_strided_slice %158 {offsets = [0, 1], sizes = [32, 22], strides = [1, 1]} : vector<32x36xbf16> to vector<32x22xbf16>
    %240 = vector.extract_strided_slice %158 {offsets = [0, 2], sizes = [32, 22], strides = [1, 1]} : vector<32x36xbf16> to vector<32x22xbf16>
    %241 = vector.extract_strided_slice %158 {offsets = [0, 6], sizes = [32, 22], strides = [1, 1]} : vector<32x36xbf16> to vector<32x22xbf16>
    %242 = vector.extract_strided_slice %158 {offsets = [0, 7], sizes = [32, 22], strides = [1, 1]} : vector<32x36xbf16> to vector<32x22xbf16>
    %243 = vector.extract_strided_slice %158 {offsets = [0, 8], sizes = [32, 22], strides = [1, 1]} : vector<32x36xbf16> to vector<32x22xbf16>
    %244 = vector.extract_strided_slice %158 {offsets = [0, 12], sizes = [32, 22], strides = [1, 1]} : vector<32x36xbf16> to vector<32x22xbf16>
    %245 = vector.extract_strided_slice %158 {offsets = [0, 13], sizes = [32, 22], strides = [1, 1]} : vector<32x36xbf16> to vector<32x22xbf16>
    %246 = vector.extract_strided_slice %158 {offsets = [0, 14], sizes = [32, 22], strides = [1, 1]} : vector<32x36xbf16> to vector<32x22xbf16>
    %247 = tpu.concatenate %229, %230, %231, %232, %233, %234, %235, %236, %237, %238, %239, %240, %241, %242, %243, %244 in 0 : vector<32x22xbf16>, vector<32x22xbf16>, vector<32x22xbf16>, vector<32x22xbf16>, vector<32x22xbf16>, vector<32x22xbf16>, vector<32x22xbf16>, vector<32x22xbf16>, vector<32x22xbf16>, vector<32x22xbf16>, vector<32x22xbf16>, vector<32x22xbf16>, vector<32x22xbf16>, vector<32x22xbf16>, vector<32x22xbf16>, vector<32x22xbf16> -> vector<512x22xbf16>
    %248 = tpu.concatenate %245, %246 in 0 : vector<32x22xbf16>, vector<32x22xbf16> -> vector<64x22xbf16>
    %249 = tpu.concatenate %247, %248 in 0 : vector<512x22xbf16>, vector<64x22xbf16> -> vector<576x22xbf16>
    %c0_84 = arith.constant 0 : index
    %c0_85 = arith.constant 0 : index
    %250 = vector.load %arg12[%c0_84, %c0_85] : memref<32x576xbf16, #tpu.memory_space<vmem>>, vector<32x576xbf16>
    %cst_86 = arith.constant dense<0.000000e+00> : vector<32x22xf32>
    %251 = tpu.matmul %250, %249, %cst_86 {dimension_numbers = #tpu.dot_dimension_numbers<[1], [0], [0], [1], [0, 0, 1, 1], [], []>} : vector<32x576xbf16>, vector<576x22xbf16>, vector<32x22xf32> -> vector<32x22xf32>
    %c0_87 = arith.constant 0 : index
    %c0_88 = arith.constant 0 : index
    %252 = vector.load %arg10[%c0_87, %c0_88] : memref<32x1xf32, #tpu.memory_space<vmem>>, vector<32x1xf32>
    %253 = vector.broadcast %252 : vector<32x1xf32> to vector<32x22xf32>
    %254 = arith.addf %251, %253 : vector<32x22xf32>
    %cst_89 = arith.constant 0.000000e+00 : f32
    %255 = vector.broadcast %cst_89 : f32 to vector<32x22xf32>
    %256 = arith.maximumf %254, %255 : vector<32x22xf32>
    %257 = vector.broadcast %228 : vector<1x22xf32> to vector<32x22xf32>
    %258 = arith.mulf %256, %257 : vector<32x22xf32>
    %259 = arith.truncf %258 : vector<32x22xf32> to vector<32x22xbf16>
    %cst_90 = arith.constant 0.000000e+00 : bf16
    %260 = vector.broadcast %cst_90 : bf16 to vector<32x7xbf16>
    %261 = tpu.concatenate %260, %259, %260 in 1 : vector<32x7xbf16>, vector<32x22xbf16>, vector<32x7xbf16> -> vector<32x36xbf16>
    %262 = vector.extract_strided_slice %261 {offsets = [0, 0], sizes = [32, 22], strides = [1, 1]} : vector<32x36xbf16> to vector<32x22xbf16>
    %263 = vector.extract_strided_slice %261 {offsets = [0, 1], sizes = [32, 22], strides = [1, 1]} : vector<32x36xbf16> to vector<32x22xbf16>
    %264 = vector.extract_strided_slice %261 {offsets = [0, 2], sizes = [32, 22], strides = [1, 1]} : vector<32x36xbf16> to vector<32x22xbf16>
    %265 = vector.extract_strided_slice %261 {offsets = [0, 6], sizes = [32, 22], strides = [1, 1]} : vector<32x36xbf16> to vector<32x22xbf16>
    %266 = vector.extract_strided_slice %261 {offsets = [0, 7], sizes = [32, 22], strides = [1, 1]} : vector<32x36xbf16> to vector<32x22xbf16>
    %267 = vector.extract_strided_slice %261 {offsets = [0, 8], sizes = [32, 22], strides = [1, 1]} : vector<32x36xbf16> to vector<32x22xbf16>
    %268 = vector.extract_strided_slice %261 {offsets = [0, 12], sizes = [32, 22], strides = [1, 1]} : vector<32x36xbf16> to vector<32x22xbf16>
    %269 = vector.extract_strided_slice %261 {offsets = [0, 13], sizes = [32, 22], strides = [1, 1]} : vector<32x36xbf16> to vector<32x22xbf16>
    %270 = vector.extract_strided_slice %261 {offsets = [0, 14], sizes = [32, 22], strides = [1, 1]} : vector<32x36xbf16> to vector<32x22xbf16>
    %271 = tpu.concatenate %262, %263, %264, %265, %266, %267, %268, %269, %270 in 0 : vector<32x22xbf16>, vector<32x22xbf16>, vector<32x22xbf16>, vector<32x22xbf16>, vector<32x22xbf16>, vector<32x22xbf16>, vector<32x22xbf16>, vector<32x22xbf16>, vector<32x22xbf16> -> vector<288x22xbf16>
    %c0_91 = arith.constant 0 : index
    %c0_92 = arith.constant 0 : index
    %272 = vector.load %arg13[%c0_91, %c0_92] : memref<32x288xbf16, #tpu.memory_space<vmem>>, vector<32x288xbf16>
    %cst_93 = arith.constant dense<0.000000e+00> : vector<32x22xf32>
    %273 = tpu.matmul %272, %271, %cst_93 {dimension_numbers = #tpu.dot_dimension_numbers<[1], [0], [0], [1], [0, 0, 1, 1], [], []>} : vector<32x288xbf16>, vector<288x22xbf16>, vector<32x22xf32> -> vector<32x22xf32>
    %c0_94 = arith.constant 0 : index
    %c0_95 = arith.constant 0 : index
    %274 = vector.load %arg11[%c0_94, %c0_95] : memref<32x1xf32, #tpu.memory_space<vmem>>, vector<32x1xf32>
    %275 = vector.broadcast %274 : vector<32x1xf32> to vector<32x22xf32>
    %276 = arith.addf %273, %275 : vector<32x22xf32>
    %cst_96 = arith.constant 0.000000e+00 : f32
    %277 = vector.broadcast %cst_96 : f32 to vector<32x22xf32>
    %278 = arith.maximumf %276, %277 : vector<32x22xf32>
    %279 = vector.broadcast %228 : vector<1x22xf32> to vector<32x22xf32>
    %280 = arith.mulf %278, %279 : vector<32x22xf32>
    %281 = arith.truncf %280 : vector<32x22xf32> to vector<32x22xbf16>
    %cst_97 = arith.constant 0.000000e+00 : bf16
    %282 = vector.broadcast %cst_97 : bf16 to vector<32x7xbf16>
    %283 = tpu.concatenate %282, %281, %282 in 1 : vector<32x7xbf16>, vector<32x22xbf16>, vector<32x7xbf16> -> vector<32x36xbf16>
    %c0_98 = arith.constant 0 : index
    %c0_99 = arith.constant 0 : index
    %284 = vector.load %arg45[%c0_98, %c0_99] : memref<64x32xbf16, #tpu.memory_space<vmem>>, vector<64x32xbf16>
    %cst_100 = arith.constant dense<0.000000e+00> : vector<64x36xf32>
    %285 = tpu.matmul %284, %283, %cst_100 {dimension_numbers = #tpu.dot_dimension_numbers<[1], [0], [0], [1], [0, 0, 1, 1], [], []>} : vector<64x32xbf16>, vector<32x36xbf16>, vector<64x36xf32> -> vector<64x36xf32>
    %286 = vector.extract_strided_slice %285 {offsets = [0, 0], sizes = [16, 36], strides = [1, 1]} : vector<64x36xf32> to vector<16x36xf32>
    %287 = vector.extract_strided_slice %285 {offsets = [16, 0], sizes = [16, 36], strides = [1, 1]} : vector<64x36xf32> to vector<16x36xf32>
    %288 = vector.extract_strided_slice %285 {offsets = [32, 0], sizes = [16, 36], strides = [1, 1]} : vector<64x36xf32> to vector<16x36xf32>
    %289 = vector.extract_strided_slice %285 {offsets = [48, 0], sizes = [16, 36], strides = [1, 1]} : vector<64x36xf32> to vector<16x36xf32>
    %290 = tpu.concatenate %286, %287, %288, %289 in 1 : vector<16x36xf32>, vector<16x36xf32>, vector<16x36xf32>, vector<16x36xf32> -> vector<16x144xf32>
    %291 = arith.truncf %290 : vector<16x144xf32> to vector<16x144xbf16>
    %c0_101 = arith.constant 0 : index
    %c0_102 = arith.constant 0 : index
    %292 = vector.load %arg37[%c0_101, %c0_102] : memref<144x100xbf16, #tpu.memory_space<vmem>>, vector<144x100xbf16>
    %cst_103 = arith.constant dense<0.000000e+00> : vector<16x100xf32>
    %293 = tpu.matmul %291, %292, %cst_103 {dimension_numbers = #tpu.dot_dimension_numbers<[1], [0], [0], [1], [0, 0, 1, 1], [], []>} : vector<16x144xbf16>, vector<144x100xbf16>, vector<16x100xf32> -> vector<16x100xf32>
    %c0_104 = arith.constant 0 : index
    %c0_105 = arith.constant 0 : index
    %294 = vector.load %arg44[%c0_104, %c0_105] : memref<16x100xf32, #tpu.memory_space<vmem>>, vector<16x100xf32>
    %295 = arith.addf %293, %294 : vector<16x100xf32>
    %296 = arith.truncf %295 : vector<16x100xf32> to vector<16x100xbf16>
    %c0_106 = arith.constant 0 : index
    %c0_107 = arith.constant 0 : index
    %297 = vector.load %arg7[%c0_106, %c0_107] : memref<1x78xf32, #tpu.memory_space<vmem>>, vector<1x78xf32>
    %298 = vector.extract_strided_slice %296 {offsets = [0, 0], sizes = [16, 78], strides = [1, 1]} : vector<16x100xbf16> to vector<16x78xbf16>
    %299 = vector.extract_strided_slice %296 {offsets = [0, 1], sizes = [16, 78], strides = [1, 1]} : vector<16x100xbf16> to vector<16x78xbf16>
    %300 = vector.extract_strided_slice %296 {offsets = [0, 2], sizes = [16, 78], strides = [1, 1]} : vector<16x100xbf16> to vector<16x78xbf16>
    %301 = vector.extract_strided_slice %296 {offsets = [0, 10], sizes = [16, 78], strides = [1, 1]} : vector<16x100xbf16> to vector<16x78xbf16>
    %302 = vector.extract_strided_slice %296 {offsets = [0, 11], sizes = [16, 78], strides = [1, 1]} : vector<16x100xbf16> to vector<16x78xbf16>
    %303 = vector.extract_strided_slice %296 {offsets = [0, 12], sizes = [16, 78], strides = [1, 1]} : vector<16x100xbf16> to vector<16x78xbf16>
    %304 = vector.extract_strided_slice %296 {offsets = [0, 20], sizes = [16, 78], strides = [1, 1]} : vector<16x100xbf16> to vector<16x78xbf16>
    %305 = vector.extract_strided_slice %296 {offsets = [0, 21], sizes = [16, 78], strides = [1, 1]} : vector<16x100xbf16> to vector<16x78xbf16>
    %306 = vector.extract_strided_slice %296 {offsets = [0, 22], sizes = [16, 78], strides = [1, 1]} : vector<16x100xbf16> to vector<16x78xbf16>
    %307 = vector.extract_strided_slice %102 {offsets = [0, 0], sizes = [16, 78], strides = [1, 1]} : vector<16x100xbf16> to vector<16x78xbf16>
    %308 = vector.extract_strided_slice %102 {offsets = [0, 1], sizes = [16, 78], strides = [1, 1]} : vector<16x100xbf16> to vector<16x78xbf16>
    %309 = vector.extract_strided_slice %102 {offsets = [0, 2], sizes = [16, 78], strides = [1, 1]} : vector<16x100xbf16> to vector<16x78xbf16>
    %310 = vector.extract_strided_slice %102 {offsets = [0, 10], sizes = [16, 78], strides = [1, 1]} : vector<16x100xbf16> to vector<16x78xbf16>
    %311 = vector.extract_strided_slice %102 {offsets = [0, 11], sizes = [16, 78], strides = [1, 1]} : vector<16x100xbf16> to vector<16x78xbf16>
    %312 = vector.extract_strided_slice %102 {offsets = [0, 12], sizes = [16, 78], strides = [1, 1]} : vector<16x100xbf16> to vector<16x78xbf16>
    %313 = vector.extract_strided_slice %102 {offsets = [0, 20], sizes = [16, 78], strides = [1, 1]} : vector<16x100xbf16> to vector<16x78xbf16>
    %314 = vector.extract_strided_slice %102 {offsets = [0, 21], sizes = [16, 78], strides = [1, 1]} : vector<16x100xbf16> to vector<16x78xbf16>
    %315 = vector.extract_strided_slice %102 {offsets = [0, 22], sizes = [16, 78], strides = [1, 1]} : vector<16x100xbf16> to vector<16x78xbf16>
    %316 = tpu.concatenate %298, %299, %300, %301, %302, %303, %304, %305, %306, %307, %308, %309, %310, %311, %312, %313 in 0 : vector<16x78xbf16>, vector<16x78xbf16>, vector<16x78xbf16>, vector<16x78xbf16>, vector<16x78xbf16>, vector<16x78xbf16>, vector<16x78xbf16>, vector<16x78xbf16>, vector<16x78xbf16>, vector<16x78xbf16>, vector<16x78xbf16>, vector<16x78xbf16>, vector<16x78xbf16>, vector<16x78xbf16>, vector<16x78xbf16>, vector<16x78xbf16> -> vector<256x78xbf16>
    %317 = tpu.concatenate %314, %315 in 0 : vector<16x78xbf16>, vector<16x78xbf16> -> vector<32x78xbf16>
    %318 = tpu.concatenate %316, %317 in 0 : vector<256x78xbf16>, vector<32x78xbf16> -> vector<288x78xbf16>
    %c0_108 = arith.constant 0 : index
    %c0_109 = arith.constant 0 : index
    %319 = vector.load %arg16[%c0_108, %c0_109] : memref<16x288xbf16, #tpu.memory_space<vmem>>, vector<16x288xbf16>
    %cst_110 = arith.constant dense<0.000000e+00> : vector<16x78xf32>
    %320 = tpu.matmul %319, %318, %cst_110 {dimension_numbers = #tpu.dot_dimension_numbers<[1], [0], [0], [1], [0, 0, 1, 1], [], []>} : vector<16x288xbf16>, vector<288x78xbf16>, vector<16x78xf32> -> vector<16x78xf32>
    %c0_111 = arith.constant 0 : index
    %c0_112 = arith.constant 0 : index
    %321 = vector.load %arg14[%c0_111, %c0_112] : memref<16x1xf32, #tpu.memory_space<vmem>>, vector<16x1xf32>
    %322 = vector.broadcast %321 : vector<16x1xf32> to vector<16x78xf32>
    %323 = arith.addf %320, %322 : vector<16x78xf32>
    %cst_113 = arith.constant 0.000000e+00 : f32
    %324 = vector.broadcast %cst_113 : f32 to vector<16x78xf32>
    %325 = arith.maximumf %323, %324 : vector<16x78xf32>
    %326 = vector.broadcast %297 : vector<1x78xf32> to vector<16x78xf32>
    %327 = arith.mulf %325, %326 : vector<16x78xf32>
    %328 = arith.truncf %327 : vector<16x78xf32> to vector<16x78xbf16>
    %cst_114 = arith.constant 0.000000e+00 : bf16
    %329 = vector.broadcast %cst_114 : bf16 to vector<16x11xbf16>
    %330 = tpu.concatenate %329, %328, %329 in 1 : vector<16x11xbf16>, vector<16x78xbf16>, vector<16x11xbf16> -> vector<16x100xbf16>
    %331 = vector.extract_strided_slice %330 {offsets = [0, 0], sizes = [16, 78], strides = [1, 1]} : vector<16x100xbf16> to vector<16x78xbf16>
    %332 = vector.extract_strided_slice %330 {offsets = [0, 1], sizes = [16, 78], strides = [1, 1]} : vector<16x100xbf16> to vector<16x78xbf16>
    %333 = vector.extract_strided_slice %330 {offsets = [0, 2], sizes = [16, 78], strides = [1, 1]} : vector<16x100xbf16> to vector<16x78xbf16>
    %334 = vector.extract_strided_slice %330 {offsets = [0, 10], sizes = [16, 78], strides = [1, 1]} : vector<16x100xbf16> to vector<16x78xbf16>
    %335 = vector.extract_strided_slice %330 {offsets = [0, 11], sizes = [16, 78], strides = [1, 1]} : vector<16x100xbf16> to vector<16x78xbf16>
    %336 = vector.extract_strided_slice %330 {offsets = [0, 12], sizes = [16, 78], strides = [1, 1]} : vector<16x100xbf16> to vector<16x78xbf16>
    %337 = vector.extract_strided_slice %330 {offsets = [0, 20], sizes = [16, 78], strides = [1, 1]} : vector<16x100xbf16> to vector<16x78xbf16>
    %338 = vector.extract_strided_slice %330 {offsets = [0, 21], sizes = [16, 78], strides = [1, 1]} : vector<16x100xbf16> to vector<16x78xbf16>
    %339 = vector.extract_strided_slice %330 {offsets = [0, 22], sizes = [16, 78], strides = [1, 1]} : vector<16x100xbf16> to vector<16x78xbf16>
    %340 = tpu.concatenate %331, %332, %333, %334, %335, %336, %337, %338, %339 in 0 : vector<16x78xbf16>, vector<16x78xbf16>, vector<16x78xbf16>, vector<16x78xbf16>, vector<16x78xbf16>, vector<16x78xbf16>, vector<16x78xbf16>, vector<16x78xbf16>, vector<16x78xbf16> -> vector<144x78xbf16>
    %c0_115 = arith.constant 0 : index
    %c0_116 = arith.constant 0 : index
    %341 = vector.load %arg17[%c0_115, %c0_116] : memref<16x144xbf16, #tpu.memory_space<vmem>>, vector<16x144xbf16>
    %cst_117 = arith.constant dense<0.000000e+00> : vector<16x78xf32>
    %342 = tpu.matmul %341, %340, %cst_117 {dimension_numbers = #tpu.dot_dimension_numbers<[1], [0], [0], [1], [0, 0, 1, 1], [], []>} : vector<16x144xbf16>, vector<144x78xbf16>, vector<16x78xf32> -> vector<16x78xf32>
    %c0_118 = arith.constant 0 : index
    %c0_119 = arith.constant 0 : index
    %343 = vector.load %arg15[%c0_118, %c0_119] : memref<16x1xf32, #tpu.memory_space<vmem>>, vector<16x1xf32>
    %344 = vector.broadcast %343 : vector<16x1xf32> to vector<16x78xf32>
    %345 = arith.addf %342, %344 : vector<16x78xf32>
    %cst_120 = arith.constant 0.000000e+00 : f32
    %346 = vector.broadcast %cst_120 : f32 to vector<16x78xf32>
    %347 = arith.maximumf %345, %346 : vector<16x78xf32>
    %348 = vector.broadcast %297 : vector<1x78xf32> to vector<16x78xf32>
    %349 = arith.mulf %347, %348 : vector<16x78xf32>
    %350 = arith.truncf %349 : vector<16x78xf32> to vector<16x78xbf16>
    %cst_121 = arith.constant 0.000000e+00 : bf16
    %351 = vector.broadcast %cst_121 : bf16 to vector<16x11xbf16>
    %352 = tpu.concatenate %351, %350, %351 in 1 : vector<16x11xbf16>, vector<16x78xbf16>, vector<16x11xbf16> -> vector<16x100xbf16>
    %c0_122 = arith.constant 0 : index
    %c0_123 = arith.constant 0 : index
    %353 = vector.load %arg47[%c0_122, %c0_123] : memref<32x16xbf16, #tpu.memory_space<vmem>>, vector<32x16xbf16>
    %cst_124 = arith.constant dense<0.000000e+00> : vector<32x100xf32>
    %354 = tpu.matmul %353, %352, %cst_124 {dimension_numbers = #tpu.dot_dimension_numbers<[1], [0], [0], [1], [0, 0, 1, 1], [], []>} : vector<32x16xbf16>, vector<16x100xbf16>, vector<32x100xf32> -> vector<32x100xf32>
    %355 = vector.extract_strided_slice %354 {offsets = [0, 0], sizes = [8, 100], strides = [1, 1]} : vector<32x100xf32> to vector<8x100xf32>
    %356 = vector.extract_strided_slice %354 {offsets = [8, 0], sizes = [8, 100], strides = [1, 1]} : vector<32x100xf32> to vector<8x100xf32>
    %357 = vector.extract_strided_slice %354 {offsets = [16, 0], sizes = [8, 100], strides = [1, 1]} : vector<32x100xf32> to vector<8x100xf32>
    %358 = vector.extract_strided_slice %354 {offsets = [24, 0], sizes = [8, 100], strides = [1, 1]} : vector<32x100xf32> to vector<8x100xf32>
    %359 = tpu.concatenate %355, %356, %357, %358 in 1 : vector<8x100xf32>, vector<8x100xf32>, vector<8x100xf32>, vector<8x100xf32> -> vector<8x400xf32>
    %360 = arith.truncf %359 : vector<8x400xf32> to vector<8x400xbf16>
    %c0_125 = arith.constant 0 : index
    %c0_126 = arith.constant 0 : index
    %361 = vector.load %arg38[%c0_125, %c0_126] : memref<400x324xbf16, #tpu.memory_space<vmem>>, vector<400x324xbf16>
    %cst_127 = arith.constant dense<0.000000e+00> : vector<8x324xf32>
    %362 = tpu.matmul %360, %361, %cst_127 {dimension_numbers = #tpu.dot_dimension_numbers<[1], [0], [0], [1], [0, 0, 1, 1], [], []>} : vector<8x400xbf16>, vector<400x324xbf16>, vector<8x324xf32> -> vector<8x324xf32>
    %c0_128 = arith.constant 0 : index
    %c0_129 = arith.constant 0 : index
    %363 = vector.load %arg46[%c0_128, %c0_129] : memref<8x324xf32, #tpu.memory_space<vmem>>, vector<8x324xf32>
    %364 = arith.addf %362, %363 : vector<8x324xf32>
    %365 = arith.truncf %364 : vector<8x324xf32> to vector<8x324xbf16>
    %c0_130 = arith.constant 0 : index
    %c0_131 = arith.constant 0 : index
    %366 = vector.load %arg6[%c0_130, %c0_131] : memref<1x286xf32, #tpu.memory_space<vmem>>, vector<1x286xf32>
    %367 = vector.extract_strided_slice %365 {offsets = [0, 0], sizes = [8, 286], strides = [1, 1]} : vector<8x324xbf16> to vector<8x286xbf16>
    %368 = vector.extract_strided_slice %365 {offsets = [0, 1], sizes = [8, 286], strides = [1, 1]} : vector<8x324xbf16> to vector<8x286xbf16>
    %369 = vector.extract_strided_slice %365 {offsets = [0, 2], sizes = [8, 286], strides = [1, 1]} : vector<8x324xbf16> to vector<8x286xbf16>
    %370 = vector.extract_strided_slice %365 {offsets = [0, 18], sizes = [8, 286], strides = [1, 1]} : vector<8x324xbf16> to vector<8x286xbf16>
    %371 = vector.extract_strided_slice %365 {offsets = [0, 19], sizes = [8, 286], strides = [1, 1]} : vector<8x324xbf16> to vector<8x286xbf16>
    %372 = vector.extract_strided_slice %365 {offsets = [0, 20], sizes = [8, 286], strides = [1, 1]} : vector<8x324xbf16> to vector<8x286xbf16>
    %373 = vector.extract_strided_slice %365 {offsets = [0, 36], sizes = [8, 286], strides = [1, 1]} : vector<8x324xbf16> to vector<8x286xbf16>
    %374 = vector.extract_strided_slice %365 {offsets = [0, 37], sizes = [8, 286], strides = [1, 1]} : vector<8x324xbf16> to vector<8x286xbf16>
    %375 = vector.extract_strided_slice %365 {offsets = [0, 38], sizes = [8, 286], strides = [1, 1]} : vector<8x324xbf16> to vector<8x286xbf16>
    %376 = vector.extract_strided_slice %46 {offsets = [0, 0], sizes = [8, 286], strides = [1, 1]} : vector<8x324xbf16> to vector<8x286xbf16>
    %377 = vector.extract_strided_slice %46 {offsets = [0, 1], sizes = [8, 286], strides = [1, 1]} : vector<8x324xbf16> to vector<8x286xbf16>
    %378 = vector.extract_strided_slice %46 {offsets = [0, 2], sizes = [8, 286], strides = [1, 1]} : vector<8x324xbf16> to vector<8x286xbf16>
    %379 = vector.extract_strided_slice %46 {offsets = [0, 18], sizes = [8, 286], strides = [1, 1]} : vector<8x324xbf16> to vector<8x286xbf16>
    %380 = vector.extract_strided_slice %46 {offsets = [0, 19], sizes = [8, 286], strides = [1, 1]} : vector<8x324xbf16> to vector<8x286xbf16>
    %381 = vector.extract_strided_slice %46 {offsets = [0, 20], sizes = [8, 286], strides = [1, 1]} : vector<8x324xbf16> to vector<8x286xbf16>
    %382 = vector.extract_strided_slice %46 {offsets = [0, 36], sizes = [8, 286], strides = [1, 1]} : vector<8x324xbf16> to vector<8x286xbf16>
    %383 = vector.extract_strided_slice %46 {offsets = [0, 37], sizes = [8, 286], strides = [1, 1]} : vector<8x324xbf16> to vector<8x286xbf16>
    %384 = vector.extract_strided_slice %46 {offsets = [0, 38], sizes = [8, 286], strides = [1, 1]} : vector<8x324xbf16> to vector<8x286xbf16>
    %385 = tpu.concatenate %367, %368, %369, %370, %371, %372, %373, %374, %375, %376, %377, %378, %379, %380, %381, %382 in 0 : vector<8x286xbf16>, vector<8x286xbf16>, vector<8x286xbf16>, vector<8x286xbf16>, vector<8x286xbf16>, vector<8x286xbf16>, vector<8x286xbf16>, vector<8x286xbf16>, vector<8x286xbf16>, vector<8x286xbf16>, vector<8x286xbf16>, vector<8x286xbf16>, vector<8x286xbf16>, vector<8x286xbf16>, vector<8x286xbf16>, vector<8x286xbf16> -> vector<128x286xbf16>
    %386 = tpu.concatenate %383, %384 in 0 : vector<8x286xbf16>, vector<8x286xbf16> -> vector<16x286xbf16>
    %387 = tpu.concatenate %385, %386 in 0 : vector<128x286xbf16>, vector<16x286xbf16> -> vector<144x286xbf16>
    %c0_132 = arith.constant 0 : index
    %c0_133 = arith.constant 0 : index
    %388 = vector.load %arg20[%c0_132, %c0_133] : memref<8x144xbf16, #tpu.memory_space<vmem>>, vector<8x144xbf16>
    %cst_134 = arith.constant dense<0.000000e+00> : vector<8x286xf32>
    %389 = tpu.matmul %388, %387, %cst_134 {dimension_numbers = #tpu.dot_dimension_numbers<[1], [0], [0], [1], [0, 0, 1, 1], [], []>} : vector<8x144xbf16>, vector<144x286xbf16>, vector<8x286xf32> -> vector<8x286xf32>
    %c0_135 = arith.constant 0 : index
    %c0_136 = arith.constant 0 : index
    %390 = vector.load %arg18[%c0_135, %c0_136] : memref<8x1xf32, #tpu.memory_space<vmem>>, vector<8x1xf32>
    %391 = vector.broadcast %390 : vector<8x1xf32> to vector<8x286xf32>
    %392 = arith.addf %389, %391 : vector<8x286xf32>
    %cst_137 = arith.constant 0.000000e+00 : f32
    %393 = vector.broadcast %cst_137 : f32 to vector<8x286xf32>
    %394 = arith.maximumf %392, %393 : vector<8x286xf32>
    %395 = vector.broadcast %366 : vector<1x286xf32> to vector<8x286xf32>
    %396 = arith.mulf %394, %395 : vector<8x286xf32>
    %397 = arith.truncf %396 : vector<8x286xf32> to vector<8x286xbf16>
    %cst_138 = arith.constant 0.000000e+00 : bf16
    %398 = vector.broadcast %cst_138 : bf16 to vector<8x19xbf16>
    %399 = tpu.concatenate %398, %397, %398 in 1 : vector<8x19xbf16>, vector<8x286xbf16>, vector<8x19xbf16> -> vector<8x324xbf16>
    %400 = vector.extract_strided_slice %399 {offsets = [0, 0], sizes = [8, 286], strides = [1, 1]} : vector<8x324xbf16> to vector<8x286xbf16>
    %401 = vector.extract_strided_slice %399 {offsets = [0, 1], sizes = [8, 286], strides = [1, 1]} : vector<8x324xbf16> to vector<8x286xbf16>
    %402 = vector.extract_strided_slice %399 {offsets = [0, 2], sizes = [8, 286], strides = [1, 1]} : vector<8x324xbf16> to vector<8x286xbf16>
    %403 = vector.extract_strided_slice %399 {offsets = [0, 18], sizes = [8, 286], strides = [1, 1]} : vector<8x324xbf16> to vector<8x286xbf16>
    %404 = vector.extract_strided_slice %399 {offsets = [0, 19], sizes = [8, 286], strides = [1, 1]} : vector<8x324xbf16> to vector<8x286xbf16>
    %405 = vector.extract_strided_slice %399 {offsets = [0, 20], sizes = [8, 286], strides = [1, 1]} : vector<8x324xbf16> to vector<8x286xbf16>
    %406 = vector.extract_strided_slice %399 {offsets = [0, 36], sizes = [8, 286], strides = [1, 1]} : vector<8x324xbf16> to vector<8x286xbf16>
    %407 = vector.extract_strided_slice %399 {offsets = [0, 37], sizes = [8, 286], strides = [1, 1]} : vector<8x324xbf16> to vector<8x286xbf16>
    %408 = vector.extract_strided_slice %399 {offsets = [0, 38], sizes = [8, 286], strides = [1, 1]} : vector<8x324xbf16> to vector<8x286xbf16>
    %409 = tpu.concatenate %400, %401, %402, %403, %404, %405, %406, %407, %408 in 0 : vector<8x286xbf16>, vector<8x286xbf16>, vector<8x286xbf16>, vector<8x286xbf16>, vector<8x286xbf16>, vector<8x286xbf16>, vector<8x286xbf16>, vector<8x286xbf16>, vector<8x286xbf16> -> vector<72x286xbf16>
    %c0_139 = arith.constant 0 : index
    %c0_140 = arith.constant 0 : index
    %410 = vector.load %arg21[%c0_139, %c0_140] : memref<8x72xbf16, #tpu.memory_space<vmem>>, vector<8x72xbf16>
    %cst_141 = arith.constant dense<0.000000e+00> : vector<8x286xf32>
    %411 = tpu.matmul %410, %409, %cst_141 {dimension_numbers = #tpu.dot_dimension_numbers<[1], [0], [0], [1], [0, 0, 1, 1], [], []>} : vector<8x72xbf16>, vector<72x286xbf16>, vector<8x286xf32> -> vector<8x286xf32>
    %c0_142 = arith.constant 0 : index
    %c0_143 = arith.constant 0 : index
    %412 = vector.load %arg19[%c0_142, %c0_143] : memref<8x1xf32, #tpu.memory_space<vmem>>, vector<8x1xf32>
    %413 = vector.broadcast %412 : vector<8x1xf32> to vector<8x286xf32>
    %414 = arith.addf %411, %413 : vector<8x286xf32>
    %cst_144 = arith.constant 0.000000e+00 : f32
    %415 = vector.broadcast %cst_144 : f32 to vector<8x286xf32>
    %416 = arith.maximumf %414, %415 : vector<8x286xf32>
    %417 = vector.broadcast %366 : vector<1x286xf32> to vector<8x286xf32>
    %418 = arith.mulf %416, %417 : vector<8x286xf32>
    %419 = arith.truncf %418 : vector<8x286xf32> to vector<8x286xbf16>
    %cst_145 = arith.constant 0.000000e+00 : bf16
    %420 = vector.broadcast %cst_145 : bf16 to vector<8x19xbf16>
    %421 = tpu.concatenate %420, %419, %420 in 1 : vector<8x19xbf16>, vector<8x286xbf16>, vector<8x19xbf16> -> vector<8x324xbf16>
    %c0_146 = arith.constant 0 : index
    %c0_147 = arith.constant 0 : index
    %422 = vector.load %arg35[%c0_146, %c0_147] : memref<1x8xbf16, #tpu.memory_space<vmem>>, vector<1x8xbf16>
    %cst_148 = arith.constant dense<0.000000e+00> : vector<1x324xf32>
    %423 = tpu.matmul %422, %421, %cst_148 {dimension_numbers = #tpu.dot_dimension_numbers<[1], [0], [0], [1], [0, 0, 1, 1], [], []>} : vector<1x8xbf16>, vector<8x324xbf16>, vector<1x324xf32> -> vector<1x324xf32>
    %c0_149 = arith.constant 0 : index
    %c0_150 = arith.constant 0 : index
    %424 = vector.load %arg34[%c0_149, %c0_150] : memref<1x1xf32, #tpu.memory_space<vmem>>, vector<1x1xf32>
    %425 = vector.broadcast %424 : vector<1x1xf32> to vector<1x324xf32>
    %426 = arith.addf %423, %425 : vector<1x324xf32>
    %c0_151 = arith.constant 0 : index
    %c0_152 = arith.constant 0 : index
    %c0_153 = arith.constant 0 : index
    %427 = vector.load %arg48[%c0_151, %c0_152, %c0_153] : memref<1x1x324xf32, #tpu.memory_space<vmem>>, vector<1x1x324xf32>
    %428 = vector.shape_cast %427 : vector<1x1x324xf32> to vector<1x324xf32>
    %429 = vector.shape_cast %426 : vector<1x324xf32> to vector<1x1x324xf32>
    tpu.vector_store %arg48[%c0_151, %c0_152, %c0_153], %429 {strides = array<i32>} : memref<1x1x324xf32, #tpu.memory_space<vmem>>, vector<1x1x324xf32>,
    return
  }
  func.func @transform_0(%arg0: i32) -> (i32, i32, i32) {
    %c0_i32 = arith.constant 0 : i32
    %c0_i32_0 = arith.constant 0 : i32
    %c0_i32_1 = arith.constant 0 : i32
    return %arg0, %c0_i32, %c0_i32_0 : i32, i32, i32
  }
  func.func @transform_1(%arg0: i32) -> (i32, i32) {
    %c0_i32 = arith.constant 0 : i32
    %c0_i32_0 = arith.constant 0 : i32
    %c0_i32_1 = arith.constant 0 : i32
    return %c0_i32, %c0_i32_0 : i32, i32
  }
  func.func @transform_2(%arg0: i32) -> (i32, i32) {
    %c0_i32 = arith.constant 0 : i32
    %c0_i32_0 = arith.constant 0 : i32
    %c0_i32_1 = arith.constant 0 : i32
    return %c0_i32, %c0_i32_0 : i32, i32
  }
  func.func @transform_3(%arg0: i32) -> (i32, i32) {
    %c0_i32 = arith.constant 0 : i32
    %c0_i32_0 = arith.constant 0 : i32
    %c0_i32_1 = arith.constant 0 : i32
    return %c0_i32, %c0_i32_0 : i32, i32
  }
  func.func @transform_4(%arg0: i32) -> (i32, i32) {
    %c0_i32 = arith.constant 0 : i32
    %c0_i32_0 = arith.constant 0 : i32
    %c0_i32_1 = arith.constant 0 : i32
    return %c0_i32, %c0_i32_0 : i32, i32
  }
  func.func @transform_5(%arg0: i32) -> (i32, i32) {
    %c0_i32 = arith.constant 0 : i32
    %c0_i32_0 = arith.constant 0 : i32
    %c0_i32_1 = arith.constant 0 : i32
    return %c0_i32, %c0_i32_0 : i32, i32
  }
  func.func @transform_6(%arg0: i32) -> (i32, i32) {
    %c0_i32 = arith.constant 0 : i32
    %c0_i32_0 = arith.constant 0 : i32
    %c0_i32_1 = arith.constant 0 : i32
    return %c0_i32, %c0_i32_0 : i32, i32
  }
  func.func @transform_7(%arg0: i32) -> (i32, i32) {
    %c0_i32 = arith.constant 0 : i32
    %c0_i32_0 = arith.constant 0 : i32
    %c0_i32_1 = arith.constant 0 : i32
    return %c0_i32, %c0_i32_0 : i32, i32
  }
  func.func @transform_8(%arg0: i32) -> (i32, i32) {
    %c0_i32 = arith.constant 0 : i32
    %c0_i32_0 = arith.constant 0 : i32
    %c0_i32_1 = arith.constant 0 : i32
    return %c0_i32, %c0_i32_0 : i32, i32
  }
  func.func @transform_9(%arg0: i32) -> (i32, i32) {
    %c0_i32 = arith.constant 0 : i32
    %c0_i32_0 = arith.constant 0 : i32
    %c0_i32_1 = arith.constant 0 : i32
    return %c0_i32, %c0_i32_0 : i32, i32
  }
  func.func @transform_10(%arg0: i32) -> (i32, i32) {
    %c0_i32 = arith.constant 0 : i32
    %c0_i32_0 = arith.constant 0 : i32
    %c0_i32_1 = arith.constant 0 : i32
    return %c0_i32, %c0_i32_0 : i32, i32
  }
  func.func @transform_11(%arg0: i32) -> (i32, i32) {
    %c0_i32 = arith.constant 0 : i32
    %c0_i32_0 = arith.constant 0 : i32
    %c0_i32_1 = arith.constant 0 : i32
    return %c0_i32, %c0_i32_0 : i32, i32
  }
  func.func @transform_12(%arg0: i32) -> (i32, i32) {
    %c0_i32 = arith.constant 0 : i32
    %c0_i32_0 = arith.constant 0 : i32
    %c0_i32_1 = arith.constant 0 : i32
    return %c0_i32, %c0_i32_0 : i32, i32
  }
  func.func @transform_13(%arg0: i32) -> (i32, i32) {
    %c0_i32 = arith.constant 0 : i32
    %c0_i32_0 = arith.constant 0 : i32
    %c0_i32_1 = arith.constant 0 : i32
    return %c0_i32, %c0_i32_0 : i32, i32
  }
  func.func @transform_14(%arg0: i32) -> (i32, i32) {
    %c0_i32 = arith.constant 0 : i32
    %c0_i32_0 = arith.constant 0 : i32
    %c0_i32_1 = arith.constant 0 : i32
    return %c0_i32, %c0_i32_0 : i32, i32
  }
  func.func @transform_15(%arg0: i32) -> (i32, i32) {
    %c0_i32 = arith.constant 0 : i32
    %c0_i32_0 = arith.constant 0 : i32
    %c0_i32_1 = arith.constant 0 : i32
    return %c0_i32, %c0_i32_0 : i32, i32
  }
  func.func @transform_16(%arg0: i32) -> (i32, i32) {
    %c0_i32 = arith.constant 0 : i32
    %c0_i32_0 = arith.constant 0 : i32
    %c0_i32_1 = arith.constant 0 : i32
    return %c0_i32, %c0_i32_0 : i32, i32
  }
  func.func @transform_17(%arg0: i32) -> (i32, i32) {
    %c0_i32 = arith.constant 0 : i32
    %c0_i32_0 = arith.constant 0 : i32
    %c0_i32_1 = arith.constant 0 : i32
    return %c0_i32, %c0_i32_0 : i32, i32
  }
  func.func @transform_18(%arg0: i32) -> (i32, i32) {
    %c0_i32 = arith.constant 0 : i32
    %c0_i32_0 = arith.constant 0 : i32
    %c0_i32_1 = arith.constant 0 : i32
    return %c0_i32, %c0_i32_0 : i32, i32
  }
  func.func @transform_19(%arg0: i32) -> (i32, i32) {
    %c0_i32 = arith.constant 0 : i32
    %c0_i32_0 = arith.constant 0 : i32
    %c0_i32_1 = arith.constant 0 : i32
    return %c0_i32, %c0_i32_0 : i32, i32
  }
  func.func @transform_20(%arg0: i32) -> (i32, i32) {
    %c0_i32 = arith.constant 0 : i32
    %c0_i32_0 = arith.constant 0 : i32
    %c0_i32_1 = arith.constant 0 : i32
    return %c0_i32, %c0_i32_0 : i32, i32
  }
  func.func @transform_21(%arg0: i32) -> (i32, i32) {
    %c0_i32 = arith.constant 0 : i32
    %c0_i32_0 = arith.constant 0 : i32
    %c0_i32_1 = arith.constant 0 : i32
    return %c0_i32, %c0_i32_0 : i32, i32
  }
  func.func @transform_22(%arg0: i32) -> (i32, i32) {
    %c0_i32 = arith.constant 0 : i32
    %c0_i32_0 = arith.constant 0 : i32
    %c0_i32_1 = arith.constant 0 : i32
    return %c0_i32, %c0_i32_0 : i32, i32
  }
  func.func @transform_23(%arg0: i32) -> (i32, i32) {
    %c0_i32 = arith.constant 0 : i32
    %c0_i32_0 = arith.constant 0 : i32
    %c0_i32_1 = arith.constant 0 : i32
    return %c0_i32, %c0_i32_0 : i32, i32
  }
  func.func @transform_24(%arg0: i32) -> (i32, i32) {
    %c0_i32 = arith.constant 0 : i32
    %c0_i32_0 = arith.constant 0 : i32
    %c0_i32_1 = arith.constant 0 : i32
    return %c0_i32, %c0_i32_0 : i32, i32
  }
  func.func @transform_25(%arg0: i32) -> (i32, i32) {
    %c0_i32 = arith.constant 0 : i32
    %c0_i32_0 = arith.constant 0 : i32
    %c0_i32_1 = arith.constant 0 : i32
    return %c0_i32, %c0_i32_0 : i32, i32
  }
  func.func @transform_26(%arg0: i32) -> (i32, i32) {
    %c0_i32 = arith.constant 0 : i32
    %c0_i32_0 = arith.constant 0 : i32
    %c0_i32_1 = arith.constant 0 : i32
    return %c0_i32, %c0_i32_0 : i32, i32
  }
  func.func @transform_27(%arg0: i32) -> (i32, i32) {
    %c0_i32 = arith.constant 0 : i32
    %c0_i32_0 = arith.constant 0 : i32
    %c0_i32_1 = arith.constant 0 : i32
    return %c0_i32, %c0_i32_0 : i32, i32
  }
  func.func @transform_28(%arg0: i32) -> (i32, i32) {
    %c0_i32 = arith.constant 0 : i32
    %c0_i32_0 = arith.constant 0 : i32
    %c0_i32_1 = arith.constant 0 : i32
    return %c0_i32, %c0_i32_0 : i32, i32
  }
  func.func @transform_29(%arg0: i32) -> (i32, i32) {
    %c0_i32 = arith.constant 0 : i32
    %c0_i32_0 = arith.constant 0 : i32
    %c0_i32_1 = arith.constant 0 : i32
    return %c0_i32, %c0_i32_0 : i32, i32
  }
  func.func @transform_30(%arg0: i32) -> (i32, i32) {
    %c0_i32 = arith.constant 0 : i32
    %c0_i32_0 = arith.constant 0 : i32
    %c0_i32_1 = arith.constant 0 : i32
    return %c0_i32, %c0_i32_0 : i32, i32
  }
  func.func @transform_31(%arg0: i32) -> (i32, i32) {
    %c0_i32 = arith.constant 0 : i32
    %c0_i32_0 = arith.constant 0 : i32
    %c0_i32_1 = arith.constant 0 : i32
    return %c0_i32, %c0_i32_0 : i32, i32
  }
  func.func @transform_32(%arg0: i32) -> (i32, i32) {
    %c0_i32 = arith.constant 0 : i32
    %c0_i32_0 = arith.constant 0 : i32
    %c0_i32_1 = arith.constant 0 : i32
    return %c0_i32, %c0_i32_0 : i32, i32
  }
  func.func @transform_33(%arg0: i32) -> (i32, i32) {
    %c0_i32 = arith.constant 0 : i32
    %c0_i32_0 = arith.constant 0 : i32
    %c0_i32_1 = arith.constant 0 : i32
    return %c0_i32, %c0_i32_0 : i32, i32
  }
  func.func @transform_34(%arg0: i32) -> (i32, i32) {
    %c0_i32 = arith.constant 0 : i32
    %c0_i32_0 = arith.constant 0 : i32
    %c0_i32_1 = arith.constant 0 : i32
    return %c0_i32, %c0_i32_0 : i32, i32
  }
  func.func @transform_35(%arg0: i32) -> (i32, i32) {
    %c0_i32 = arith.constant 0 : i32
    %c0_i32_0 = arith.constant 0 : i32
    %c0_i32_1 = arith.constant 0 : i32
    return %c0_i32, %c0_i32_0 : i32, i32
  }
  func.func @transform_36(%arg0: i32) -> (i32, i32) {
    %c0_i32 = arith.constant 0 : i32
    %c0_i32_0 = arith.constant 0 : i32
    %c0_i32_1 = arith.constant 0 : i32
    return %c0_i32, %c0_i32_0 : i32, i32
  }
  func.func @transform_37(%arg0: i32) -> (i32, i32) {
    %c0_i32 = arith.constant 0 : i32
    %c0_i32_0 = arith.constant 0 : i32
    %c0_i32_1 = arith.constant 0 : i32
    return %c0_i32, %c0_i32_0 : i32, i32
  }
  func.func @transform_38(%arg0: i32) -> (i32, i32) {
    %c0_i32 = arith.constant 0 : i32
    %c0_i32_0 = arith.constant 0 : i32
    %c0_i32_1 = arith.constant 0 : i32
    return %c0_i32, %c0_i32_0 : i32, i32
  }
  func.func @transform_39(%arg0: i32) -> (i32, i32) {
    %c0_i32 = arith.constant 0 : i32
    %c0_i32_0 = arith.constant 0 : i32
    %c0_i32_1 = arith.constant 0 : i32
    return %c0_i32, %c0_i32_0 : i32, i32
  }
  func.func @transform_40(%arg0: i32) -> (i32, i32) {
    %c0_i32 = arith.constant 0 : i32
    %c0_i32_0 = arith.constant 0 : i32
    %c0_i32_1 = arith.constant 0 : i32
    return %c0_i32, %c0_i32_0 : i32, i32
  }
  func.func @transform_41(%arg0: i32) -> (i32, i32) {
    %c0_i32 = arith.constant 0 : i32
    %c0_i32_0 = arith.constant 0 : i32
    %c0_i32_1 = arith.constant 0 : i32
    return %c0_i32, %c0_i32_0 : i32, i32
  }
  func.func @transform_42(%arg0: i32) -> (i32, i32) {
    %c0_i32 = arith.constant 0 : i32
    %c0_i32_0 = arith.constant 0 : i32
    %c0_i32_1 = arith.constant 0 : i32
    return %c0_i32, %c0_i32_0 : i32, i32
  }
  func.func @transform_43(%arg0: i32) -> (i32, i32) {
    %c0_i32 = arith.constant 0 : i32
    %c0_i32_0 = arith.constant 0 : i32
    %c0_i32_1 = arith.constant 0 : i32
    return %c0_i32, %c0_i32_0 : i32, i32
  }
  func.func @transform_44(%arg0: i32) -> (i32, i32) {
    %c0_i32 = arith.constant 0 : i32
    %c0_i32_0 = arith.constant 0 : i32
    %c0_i32_1 = arith.constant 0 : i32
    return %c0_i32, %c0_i32_0 : i32, i32
  }
  func.func @transform_45(%arg0: i32) -> (i32, i32) {
    %c0_i32 = arith.constant 0 : i32
    %c0_i32_0 = arith.constant 0 : i32
    %c0_i32_1 = arith.constant 0 : i32
    return %c0_i32, %c0_i32_0 : i32, i32
  }
  func.func @transform_46(%arg0: i32) -> (i32, i32) {
    %c0_i32 = arith.constant 0 : i32
    %c0_i32_0 = arith.constant 0 : i32
    %c0_i32_1 = arith.constant 0 : i32
    return %c0_i32, %c0_i32_0 : i32, i32
  }
  func.func @transform_47(%arg0: i32) -> (i32, i32, i32) {
    %c0_i32 = arith.constant 0 : i32
    %c0_i32_0 = arith.constant 0 : i32
    %c0_i32_1 = arith.constant 0 : i32
    return %arg0, %c0_i32, %c0_i32_0 : i32, i32, i32
  }
}

</mosaic_0001>

<bundles_post_ra>
// kernel: unet_apply.1
= control target key start
LH: loop header
LB: loop body
LE: loop exit
PB: predicated region body
PF: predicated region fallthrough
CT: control target
= control target key end

     0   :  { %s8444_s6 = smov 1   ;;  %s8445_s10 = smov 2   ;;  %s10178_s0 = inlined_call_operand.smem [shape: u32[48], index: -1, kind: input, shape index: {}] }
   0x1   :  { %s8536_s5 = sld [smem:[%s10178_s0]]   ;;  %s8446_s14 = smov 3  }
   0x2   :  { %s8541_s9 = sld [smem:[%s10178_s0 + %s8444_s6]]   ;;  %s8447_s18 = smov 4  }
   0x3   :  { %s8546_s13 = sld [smem:[%s10178_s0 + %s8445_s10]]   ;;  %s8448_s22 = smov 5  }
   0x4   :  { %s8551_s17 = sld [smem:[%s10178_s0 + %s8446_s14]]   ;;  %s8449_s26 = smov 6  }
   0x5   :  { %s8556_s21 = sld [smem:[%s10178_s0 + %s8447_s18]]   ;;  %s8450_s30 = smov 7  }
   0x6   :  { %s8561_s25 = sld [smem:[%s10178_s0 + %s8448_s22]]   ;;  %s8451_s4 = smov 8  }
   0x7   :  { %10278 = sst [smem:[#allocation3_spill]] %s8536_s5  ;;  %s8452_s10 = smov 9  }
   0x8   :  { %10279 = sst [smem:[#allocation4_spill]] %s8541_s9  ;;  %s8453_s15 = smov 10  }
   0x9   :  { %10280 = sst [smem:[#allocation5_spill]] %s8546_s13  ;;  %s8454_s20 = smov 11  }
   0xa   :  { %10281 = sst [smem:[#allocation6_spill]] %s8551_s17  ;;  %s8456_s1 = smov 13  }
   0xb   :  { %10282 = sst [smem:[#allocation7_spill]] %s8556_s21  ;;  %s8457_s7 = smov 14  }
   0xc   :  { %s8566_s29 = sld [smem:[%s10178_s0 + %s8449_s26]]   ;;  %s8455_s26 = smov 12  }
   0xd   :  { %s8571_s3 = sld [smem:[%s10178_s0 + %s8450_s30]]   ;;  %s8459_s22 = smov 16  }
   0xe   :  { %s8576_s8 = sld [smem:[%s10178_s0 + %s8451_s4]]   ;;  %s8460_s28 = smov 17  }
   0xf   :  { %s8581_s14 = sld [smem:[%s10178_s0 + %s8452_s10]]   ;;  %s8477_s10 = smov 34  }
  0x10   :  { %s8586_s19 = sld [smem:[%s10178_s0 + %s8453_s15]]   ;;  %s8458_s15 = smov 15  }
  0x11   :  { %s8591_s24 = sld [smem:[%s10178_s0 + %s8454_s20]]   ;;  %s8478_s16 = smov 35  }
  0x12   :  { %s8596_s30 = sld [smem:[%s10178_s0 + %s8455_s26]]   ;;  %s8479_s23 = smov 36  }
  0x13   :  { %10283 = sst [smem:[#allocation8_spill]] %s8571_s3 }
  0x14   :  { %10284 = sst [smem:[#allocation9_spill]] %s8576_s8 }
  0x15   :  { %10285 = sst [smem:[#allocation10_spill]] %s8581_s14 }
  0x16   :  { %10286 = sst [smem:[#allocation11_spill]] %s8586_s19 }
  0x17   :  { %10287 = sst [smem:[#allocation12_spill]] %s8591_s24 }
  0x18   :  { %10288 = sst [smem:[#allocation13_spill]] %s8596_s30 }
  0x19   :  { %s8601_s6 = sld [smem:[%s10178_s0 + %s8456_s1]]   ;;  %s8480_s1 = smov 37  }
  0x1a   :  { %s8606_s12 = sld [smem:[%s10178_s0 + %s8457_s7]]   ;;  %s8461_s7 = smov 18  }
  0x1b   :  { %s8611_s20 = sld [smem:[%s10178_s0 + %s8458_s15]]   ;;  %s8462_s15 = smov 19  }
  0x1c   :  { %s8616_s27 = sld [smem:[%s10178_s0 + %s8459_s22]]   ;;  %s8463_s22 = smov 20  }
  0x1d   :  { %s8621_s4 = sld [smem:[%s10178_s0 + %s8460_s28]]   ;;  %s8464_s28 = smov 21  }
  0x1e   :  { %s8704_s17 = sld [smem:[%s10178_s0 + %s8477_s10]]   ;;  %s8481_s10 = smov 38  }
  0x1f   :  { %10289 = sst [smem:[#allocation14_spill]] %s8601_s6 }
  0x20   :  { %10290 = sst [smem:[#allocation15_spill]] %s8606_s12 }
  0x21   :  { %10291 = sst [smem:[#allocation16_spill]] %s8611_s20 }
  0x22   :  { %10292 = sst [smem:[#allocation17_spill]] %s8616_s27 }
  0x23   :  { %10293 = sst [smem:[#allocation18_spill]] %s8621_s4 }
  0x24   :  { %s8626_s12 = sld [smem:[%s10178_s0 + %s8461_s7]]   ;;  %s8465_s7 = smov 22  }
  0x25   :  { %s8631_s6 = sld [smem:[%s10178_s0 + %s8462_s15]]   ;;  %s8466_s15 = smov 23  }
  0x26   :  { %s8636_s27 = sld [smem:[%s10178_s0 + %s8463_s22]]   ;;  %s8467_s22 = smov 24  }
  0x27   :  { %s8641_s4 = sld [smem:[%s10178_s0 + %s8464_s28]]   ;;  %s8468_s28 = smov 25  }
  0x28   :  { %s8661_s20 = sld [smem:[%s10178_s0 + %s8468_s28]]   ;;  %s8472_s28 = smov 29  }
  0x29   :  { %s8681_s24 = sld [smem:[%s10178_s0 + %s8472_s28]]   ;;  %s8476_s28 = smov 33  }
  0x2a   :  { %10294 = sst [smem:[#allocation19_spill]] %s8626_s12 }
  0x2b   :  { %10295 = sst [smem:[#allocation20_spill]] %s8631_s6 }
  0x2c   :  { %10296 = sst [smem:[#allocation21_spill]] %s8636_s27 }
  0x2d   :  { %10297 = sst [smem:[#allocation22_spill]] %s8641_s4 }
  0x2e   :  { %s8646_s12 = sld [smem:[%s10178_s0 + %s8465_s7]]   ;;  %s8469_s7 = smov 26  }
  0x2f   :  { %s8651_s6 = sld [smem:[%s10178_s0 + %s8466_s15]]   ;;  %s8470_s15 = smov 27  }
  0x30   :  { %s8656_s27 = sld [smem:[%s10178_s0 + %s8467_s22]]   ;;  %s8471_s22 = smov 28  }
  0x31   :  { %s8666_s19 = sld [smem:[%s10178_s0 + %s8469_s7]]   ;;  %s8473_s7 = smov 30  }
  0x32   :  { %s8671_s30 = sld [smem:[%s10178_s0 + %s8470_s15]]   ;;  %s8474_s15 = smov 31  }
  0x33   :  { %s8676_s14 = sld [smem:[%s10178_s0 + %s8471_s22]]   ;;  %s8475_s22 = smov 32  }
  0x34   :  { %s8686_s13 = sld [smem:[%s10178_s0 + %s8473_s7]]   ;;  %s8485_s7 = smov 42  }
  0x35   :  { %10298 = sst [smem:[#allocation23_spill]] %s8651_s6 }
  0x36   :  { %s8691_s21 = sld [smem:[%s10178_s0 + %s8474_s15]]  }
  0x37   :  { %s8696_s8 = sld [smem:[%s10178_s0 + %s8475_s22]]  }
  0x38   :  { %s7115_s9 = sld [smem:[%s10178_s0 + %s8476_s28]]  }
  0x39   :  { %10302 = sst [smem:[#allocation27_spill]] %s8704_s17 }
  0x3a   :  { %10299 = sst [smem:[#allocation24_spill]] %s8686_s13 }
  0x3b   :  { %s8709_s13 = sld [smem:[%s10178_s0 + %s8478_s16]]   ;;  %s8482_s16 = smov 39  }
  0x3c   :  { %10300 = sst [smem:[#allocation25_spill]] %s8691_s21 }
  0x3d   :  { %10301 = sst [smem:[#allocation26_spill]] %s8696_s8 }
  0x3e   :  { %s8714_s8 = sld [smem:[%s10178_s0 + %s8479_s23]]   ;;  %v100_v0 = vstv %s7115_s9  ;;  %s8483_s23 = smov 40  }
  0x3f   :  { %s8719_s3 = sld [smem:[%s10178_s0 + %s8480_s1]]   ;;  %101 = vst [vmem:[#allocation2] sm:$0x1] %v100_v0  ;;  %s8484_s1 = smov 41  }
  0x40   :  { %s8724_s17 = sld [smem:[%s10178_s0 + %s8481_s10]]   ;;  %s8486_s9 = smov 43  }
  0x41   :  { %10303 = sst [smem:[#allocation28_spill]] %s8709_s13 }
  0x42   :  { %s8729_s13 = sld [smem:[%s10178_s0 + %s8482_s16]]  }
  0x43   :  { %s8734_s28 = sld [smem:[%s10178_s0 + %s8483_s23]]   ;;  %s8487_s23 = smov 44  }
  0x44   :  { %10304 = sst [smem:[#allocation29_spill]] %s8714_s8  ;;  %s8489_s8 = smov 46  }
  0x45   :  { %10305 = sst [smem:[#allocation30_spill]] %s8719_s3  ;;  %s8488_s3 = smov 45  }
  0x46   :  { %s8739_s10 = sld [smem:[%s10178_s0 + %s8484_s1]]  }
  0x47   :  { %s8744_s16 = sld [smem:[%s10178_s0 + %s8485_s7]]  }
  0x48   :  { %s8749_s22 = sld [smem:[%s10178_s0 + %s8486_s9]]   ;;  %s8490_s9 = smov 47  }
  0x49   :  { %10306 = sst [smem:[#allocation31_spill]] %s8734_s28  ;;  %s8771_s28 = smov 0  }
  0x4a   :  { %s8754_s21 = sld [smem:[%s10178_s0 + %s8487_s23]]  }
  0x4c   :  { %10307 = sst [smem:[#allocation32_spill]] %s8739_s10 }
  0x4d   :  { %10308 = sst [smem:[#allocation33_spill]] %s8744_s16 }
  0x4e   :  { %10309 = sst [smem:[#allocation34_spill]] %s8749_s22 }
  0x4f   :  { %s8759_s10 = sld [smem:[%s10178_s0 + %s8488_s3]]  }
  0x50   :  { %s8764_s16 = sld [smem:[%s10178_s0 + %s8489_s8]]  }
  0x51   :  { %s8769_s22 = sld [smem:[%s10178_s0 + %s8490_s9]]  }
  0x52 LB: > { %s7130_s23 = sadd.s32 4294967295, %s8442_s28   ;;  %p7134_p0 = scmp.ge.s32.totalorder %s8442_s28, 1  ;;  %s8442_s28 = sphi %s8771_s28, %s107_s28  }
  0x53   : > { %p1286_p1 = scmp.lt.s32.totalorder %s8442_s28, 3 }
  0x55   : > { %p1287_p2 = pnand %p7134_p0, %p1286_p1 }
  0x56   : > { %p1396_p3 = scmp.lt.s32.totalorder (!%p1287_p2), %s7130_s23, 1  ;;  %s10310_s5 = sld [smem:[#allocation3_spill]] (!%p1287_p2)  ;;  %v1411_v1 = vlaneseq (!%p1287_p2)  ;;  %v8491_v2 = vmov (!%p1287_p2), 1966171168   ;;  %v8498_v40 = vmov (!%p1287_p2), 0.0   ;;  %v8500_v43 = vmov (!%p1287_p2), 0  }
  0x57   : > { %1290 = sbr.rel (%p1287_p2) target bundleno = 10119 (0x2787), region = 208  ;;  %v1409_v3 = vunpack.c.l.s4 (!%p1287_p2), %v8491_v2  ;;  %s10213_s3 = smov (!%p1287_p2), 109   ;;  %7778 = vmatprep.subr.bf16.mxu1 (!%p1287_p2), %v8498_v40  ;;  %1705 = vmatprep.mubr.bf16.mxu0 (!%p1287_p2), %v8500_v43  ;;  %vm8501_vm0 = vmmov (!%p1287_p2), 0   ;;  %vm1449_vm1 = vcmask (!%p1287_p2), 1039360   ;;  %vm10201_vm2 = vcmask (!%p1287_p2), 1040384  }
  0x58   : > { %v8782_v4 = vshrl.u32 (!%p1287_p2), %v1411_v1, 7  ;;  %s10245_s1 = smov (!%p1287_p2), 127   ;;  %s10259_s2 = smov (!%p1287_p2), 126   ;;  %7780 = vmatprep.mubr.msk.bf16.mxu1 (!%p1287_p2), %vm8501_vm0, %v8498_v40  ;;  %8103 = vset.pattern.permute.xlu0 (!%p1287_p2), %v8500_v43  ;;  %vm1581_vm3 = vsmask.f32 (!%p1287_p2), 256  ;;  %vm10239_vm5 = vcmask (!%p1287_p2), 900096  }
  0x59   : > { %v1410_v5 = vunpack.c.0.s8 (!%p1287_p2), %v1409_v3  ;;  %s10205_s8 = smov (!%p1287_p2), 110   ;;  %s10225_s7 = smov (!%p1287_p2), 108   ;;  %8104 = vset.pattern.permute.xlu1 (!%p1287_p2), %v8500_v43  ;;  %vm8845_vm4 = vmand (!%p1287_p2), %vm10201_vm2, %vm1581_vm3  ;;  %vm1599_vm6 = vcmask (!%p1287_p2), 1041408   ;;  %vm1600_vm7 = vsmask.f32 (!%p1287_p2), 1280  ;;  %vm10238_vm8 = vcmask (!%p1287_p2), 891904  }
  0x5a   : > { %s10209_s11 = smov (!%p1287_p2), 92   ;;  %s10203_s9 = smov (!%p1287_p2), 91   ;;  %vm1485_vm9 = vcmask (!%p1287_p2), 1031168   ;;  %vm1530_vm10 = vcmask (!%p1287_p2), 883712   ;;  %vm1618_vm11 = vcmask (!%p1287_p2), 1042432   ;;  %vm10212_vm13 = vcmask (!%p1287_p2), 752640   ;;  %vm8862_vm14 = vmand (!%p1287_p2), %vm1599_vm6, %vm1600_vm7 }
  0x5b   : > { %v8786_v6 = vsub.s32 (!%p1287_p2), %v1410_v5, %v8782_v4  ;;  %s10311_s4 = sld [smem:[#allocation22_spill]] (!%p1287_p2)  ;;  %s10207_s15 = smov (!%p1287_p2), 90   ;;  %vm1619_vm12 = vsmask.f32 (!%p1287_p2), 2304  ;;  %vm1637_vm15 = vcmask (!%p1287_p2), 1043456   ;;  %vm10233_vm3 = vcmask (!%p1287_p2), 744448  }
  0x5c   : > { %vm8882_vm7 = vmand (!%p1287_p2), %vm1618_vm11, %vm1619_vm12  ;;  %s10320_s6 = sld [smem:[#allocation23_spill]] (!%p1287_p2)  ;;  %s10215_s18 = smov (!%p1287_p2), 19  }
  0x5e   : > { %s10405_s23 = smov (!%p1396_p3, %s7130_s23), 1 }
  0x5f   : > { %s10202_s0 = smul.u32 3, %s10405_s23 }
  0x61   : > { %s1399_s26 = scalar_lea.vmem %s10310_s5, %s10202_s0  ;;  %v1654_v45 = vld [vmem:[%s10311_s4] sm:$0xff]  ;;  %s10227_s0 = smov 118  }
  0x62   : > { %v1405_v7 = vld [vmem:[%s1399_s26] sm:$0x7]  ;;  %s10219_s26 = smov 117   ;;  %s10338_s4 = smov 119  }
  0x63   : > { %v1414_v8 = vrot.slane %v1405_v7, %v8786_v6  ;;  %v1455_v9 = vcombine.low %v1405_v7, %v1405_v7  ;;  %s8522_s5 = smov 32  }
  0x65   : > { %v8793_v10 = vrot.slane %v1414_v8, %v8786_v6  ;;  %v1503_v11 = vcombine.low %v1414_v8, %v1414_v8  ;;  %v1462_v12 = vrot.slane %v1455_v9, %v8786_v6  ;;  %v1415_v13 = vcombine.high %v1414_v8, %v1414_v8 }
  0x67   : > { %1514 = vrot.lane.b32.xlu1 %v8793_v10, %s10213_s3  ;;  %v1435_v14 = vshll.u32 %v8793_v10, 16  ;;  %v1510_v15 = vrot.slane %v1503_v11, %v8786_v6  ;;  %v1463_v16 = vcombine.high %v1462_v12, %v1462_v12  ;;  %v8801_v17 = vrot.slane %v1415_v13, %v8786_v6 }
  0x68   : > { %v8805_v18 = vcombine.high %v8793_v10, %v8793_v10  ;;  %v1470_v19 = vrot.slane %v1462_v12, %v8786_v6  ;;  %v1536_v31 = vcombine.low %v1462_v12, %v1462_v12  ;;  %v1569_v44 = vcombine.low %v8793_v10, %v8793_v10 }
  0x69   : > { %1443 = vrot.lane.b32.xlu0 %v1435_v14, %s10245_s1  ;;  %v1438_v20 = vshll.u32 %v8801_v17, 16  ;;  %v1477_v22 = vrot.slane %v1463_v16, %v8786_v6  ;;  %v1488_v27 = vrot.slane %v1435_v14, 7  ;;  %v1511_v32 = vcombine.high %v1510_v15, %v1510_v15 }
  0x6a   : > { %v1441_v21 = vshll.u32 %v8805_v18, 16  ;;  %v1478_v24 = vcombine.high %v1470_v19, %v1470_v19  ;;  %v1521_v33 = vrot.slane %v1435_v14, 6  ;;  %v1543_v34 = vrot.slane %v1536_v31, %v8786_v6 }
  0x6b   : > { %1512 = vrot.lane.b32.xlu1 %v1510_v15, %s10213_s3  ;;  %v1489_v25 = vrot.slane %v1438_v20, 7  ;;  %v1522_v28 = vrot.slane %v1438_v20, 6  ;;  %v1555_v37 = vrot.slane %v1438_v20, 5  ;;  %v1570_v41 = vcombine.low %v8801_v17, %v8801_v17 }
  0x6c   : > { %v8083_v23 = vpack.i.bf16 %v1441_v21, %v1438_v20  ;;  %v1490_v26 = vrot.slane %v1441_v21, 7  ;;  %v1523_v30 = vrot.slane %v1441_v21, 6  ;;  %v1544_v36 = vcombine.high %v1543_v34, %v1543_v34 }
  0x6d   : > { %1479 = vrot.lane.b32.xlu0 %v1470_v19, %s10259_s2  ;;  %v1556_v38 = vrot.slane %v1441_v21, 5  ;;  %v1554_v42 = vrot.slane %v1435_v14, 5 }
  0x6e   : > { %v8088_v29 = vpack.i.bf16 %v1490_v26, %v1489_v25  ;;  %v8093_v35 = vpack.i.bf16 %v1523_v30, %v1522_v28 }
  0x6f   : > { %1481 = vrot.lane.b32.xlu1 %v1477_v22, %s10259_s2  ;;  %v8098_v39 = vpack.i.bf16 %v1556_v38, %v1555_v37 }
  0x71   : > { %8084 = vrot.lane.b32.xlu0 %v8083_v23, %s10245_s1 }
  0x73   : > { %1483 = vrot.lane.b32.xlu1 %v1478_v24, %s10259_s2 }
  0x75   : > { %1491 = vrot.lane.b32.xlu0 %v1488_v27, %s10205_s8 }
  0x77   : > { %8089 = vrot.lane.b32.xlu1 %v8088_v29, %s10205_s8 }
  0x79   : > { %1516 = vrot.lane.b32.xlu0 %v1511_v32, %s10213_s3 }
  0x7b   : > { %1524 = vrot.lane.b32.xlu1 %v1521_v33, %s10225_s7 }
  0x7d   : > { %8094 = vrot.lane.b32.xlu0 %v8093_v35, %s10225_s7 }
  0x7f   : > { %1549 = vrot.lane.b32.xlu1 %v1544_v36, %s10209_s11 }
  0x81   : > { %1547 = vrot.lane.b32.xlu0 %v1470_v19, %s10209_s11 }
  0x83   : > { %8099 = vrot.lane.b32.xlu1 %v8098_v39, %s10203_s9  ;;  %v8503_v39 = vmov 65535  }
  0x85   : > { %1545 = vrot.lane.b32.xlu0 %v1543_v34, %s10209_s11 }
  0x87   : > { %1573 = vrot.lane.b32.xlu1 %v1570_v41, %s10207_s15  ;;  %v1665_v41 = vsel %vm1637_vm15, 4294967295, %v8503_v39 }
  0x89   : > { %1557 = vrot.lane.b32.xlu0 %v1554_v42, %s10203_s9 }
  0x8b   : > { %1571 = vrot.lane.b32.xlu1 %v1569_v44, %s10207_s15 }
  0x8d   : > { %1575 = vrot.lane.b32.xlu0 %v8793_v10, %s10207_s15 }
  0x91   : > { %1657 = vperm.xlu0 %8103, %v1654_v45  }
  0xd9   : > { %v1515_v46 = vpop.permute.xlu1 %1514 }
  0xdb   : > { %v1444_v47 = vpop.permute.xlu0 %1443 }
  0xdd   : > { %v1513_v48 = vpop.permute.xlu1 %1512 }
  0xde   : > { %v1519_v23 = vsel %vm10238_vm8, %v1513_v48, %v1515_v46 }
  0xdf   : > { %v1480_v49 = vpop.permute.xlu0 %1479 }
  0xe1   : > { %v1482_v50 = vpop.permute.xlu1 %1481 }
  0xe2   : > { %v1486_v13 = vsel %vm1485_vm9, %v1480_v49, %v1482_v50 }
  0xe3   : > { %v8085_v51 = vpop.permute.xlu0 %8084 }
  0xe4   : > { %v8086_v56 = vunpack.i.l.bf16 %v8085_v51  ;;  %v8087_v57 = vunpack.i.h.bf16 %v8085_v51 }
  0xe5   : > { %v1484_v52 = vpop.permute.xlu1 %1483 }
  0xe6   : > { %v1450_v60 = vsel %vm1449_vm1, %v1444_v47, %v8086_v56  ;;  %v1451_v63 = vsel %vm1449_vm1, %v8086_v56, %v8087_v57  ;;  %v1585_v5 = vsel %vm8845_vm4, %v8805_v18, %v8087_v57  ;;  %v1487_v8 = vsel %vm1485_vm9, %v1482_v50, %v1484_v52 }
  0xe7   : > { %v1492_v53 = vpop.permute.xlu0 %1491  ;;  %v1583_v3 = vsel %vm8845_vm4, %v8793_v10, %v1450_v60  ;;  %v1584_v9 = vsel %vm8845_vm4, %v8801_v17, %v1451_v63  ;;  %v1597_v18 = vsel %vm10201_vm2, %v1585_v5, %v1484_v52  ;;  %vm1638_vm4 = vsmask.f32 3328 }
  0xe8   : > { %v1589_v19 = vsel %vm10201_vm2, %v1583_v3, %v1486_v13  ;;  %v1593_v17 = vsel %vm10201_vm2, %v1584_v9, %v1487_v8  ;;  %vm1664_vm2 = vcmask 1044480   ;;  %vm8901_vm12 = vmand %vm1637_vm15, %vm1638_vm4  ;;  %vm1660_vm4 = vcmask 72704  }
  0xe9   : > { %v8090_v54 = vpop.permute.xlu1 %8089  ;;  %v1760_v5 = vsub.s32 0, %v8782_v4  ;;  %v1764_v9 = vsub.s32 1, %v8782_v4  ;;  %v1768_v13 = vsub.s32 2, %v8782_v4 }
  0xea   : > { %v8091_v62 = vunpack.i.l.bf16 %v8090_v54  ;;  %v8092_v0 = vunpack.i.h.bf16 %v8090_v54 }
  0xeb   : > { %v1517_v55 = vpop.permute.xlu0 %1516 }
  0xec   : > { %v1498_v11 = vsel %vm10239_vm5, %v1492_v53, %v8091_v62  ;;  %v1499_v14 = vsel %vm10239_vm5, %v8091_v62, %v8092_v0  ;;  %v1604_v21 = vsel %vm8862_vm14, %v1597_v18, %v8092_v0  ;;  %v1520_v24 = vsel %vm10238_vm8, %v1515_v46, %v1517_v55 }
  0xed   : > { %v1525_v58 = vpop.permute.xlu1 %1524  ;;  %v1602_v20 = vsel %vm8862_vm14, %v1589_v19, %v1498_v11  ;;  %v1603_v25 = vsel %vm8862_vm14, %v1593_v17, %v1499_v14  ;;  %v1616_v33 = vsel %vm1599_vm6, %v1604_v21, %v1517_v55  ;;  %vm10211_vm14 = vcmask 736256  }
  0xee   : > { %v1608_v34 = vsel %vm1599_vm6, %v1602_v20, %v1519_v23  ;;  %v1612_v35 = vsel %vm1599_vm6, %v1603_v25, %v1520_v24  ;;  %v1666_v53 = vsel %vm1664_vm2, %v1665_v41, 0 }
  0xef   : > { %v8095_v59 = vpop.permute.xlu0 %8094 }
  0xf0   : > { %v8096_v10 = vunpack.i.l.bf16 %v8095_v59  ;;  %v8097_v15 = vunpack.i.h.bf16 %v8095_v59 }
  0xf1   : > { %v1550_v2 = vpop.permute.xlu1 %1549 }
  0xf2   : > { %v1531_v26 = vsel %vm1530_vm10, %v1525_v58, %v8096_v10  ;;  %v1532_v28 = vsel %vm1530_vm10, %v8096_v10, %v8097_v15  ;;  %v1623_v36 = vsel %vm8882_vm7, %v1616_v33, %v8097_v15 }
  0xf3   : > { %v1548_v7 = vpop.permute.xlu0 %1547  ;;  %v1621_v37 = vsel %vm8882_vm7, %v1608_v34, %v1531_v26  ;;  %v1622_v47 = vsel %vm8882_vm7, %v1612_v35, %v1532_v28  ;;  %v1635_v51 = vsel %vm1618_vm11, %v1623_v36, %v1550_v2  ;;  %vm1795_vm7 = vcmask 400384  }
  0xf4   : > { %v1553_v42 = vsel %vm10212_vm13, %v1548_v7, %v1550_v2  ;;  %v1653_v2 = vld [vmem:[%s10320_s6] sm:$0xf]  ;;  %s10346_s6 = sld [smem:[#allocation12_spill]] }
  0xf5   : > { %v8100_v16 = vpop.permute.xlu1 %8099  ;;  %v1631_v56 = vsel %vm1618_vm11, %v1622_v47, %v1553_v42 }
  0xf6   : > { %v8102_v29 = vunpack.i.h.bf16 %v8100_v16  ;;  %v8101_v30 = vunpack.i.l.bf16 %v8100_v16 }
  0xf7   : > { %v1546_v22 = vpop.permute.xlu0 %1545 }
  0xf8   : > { %v1552_v31 = vsel %vm10212_vm13, %v1546_v22, %v1548_v7  ;;  %v1565_v50 = vsel %vm10233_vm3, %v8101_v30, %v8102_v29  ;;  %v1642_v55 = vsel %vm8901_vm12, %v1635_v51, %v8102_v29  ;;  %v1406_v7 = vld [vmem:[%s8561_s25] sm:$0x7] }
  0xf9   : > { %v1574_v32 = vpop.permute.xlu1 %1573  ;;  %v1627_v44 = vsel %vm1618_vm11, %v1621_v37, %v1552_v31  ;;  %v1641_v59 = vsel %vm8901_vm12, %v1631_v56, %v1565_v50  ;;  %v8934_v16 = vrot.slane %v1406_v7, %v1760_v5  ;;  %v8936_v20 = vrot.slane %v1406_v7, %v1764_v9 }
  0xfa   : > { %v8938_v25 = vrot.slane %v1406_v7, %v1768_v13  ;;  %vm1788_vm11 = vcmask 154624  }
  0xfb   : > { %v1558_v38 = vpop.permute.xlu0 %1557 }
  0xfc   : > { %v1564_v46 = vsel %vm10233_vm3, %v1558_v38, %v8101_v30 }
  0xfd   : > { %v1640_v48 = vsel %vm8901_vm12, %v1627_v44, %v1564_v46  ;;  %v1572_v49 = vpop.permute.xlu1 %1571  ;;  %v1914_v46 = vld [vmem:[%s8646_s12] sm:$0xff]  ;;  %vm1920_vm12 = vcmask 588800  }
  0xfe   : > { %v1578_v52 = vsel %vm10211_vm14, %v1572_v49, %v1574_v32 }
  0xff   : > { %v1576_v54 = vpop.permute.xlu0 %1575  ;;  %v1646_v60 = vsel %vm1637_vm15, %v1640_v48, %v1578_v52 }
 0x100   : > { %v1652_v57 = vsel %vm1637_vm15, %v1642_v55, %v1576_v54  ;;  %v1579_v58 = vsel %vm10211_vm14, %v1574_v32, %v1576_v54  ;;  %v1667_v0 = vand.u32 %v1666_v53, %v1646_v60 }
 0x101   : > { %v1671_v61 = vand.u32 %v1666_v53, %v1652_v57  ;;  %v1649_v62 = vsel %vm1637_vm15, %v1641_v59, %v1579_v58 }
 0x102   : > { %v1669_v63 = vand.u32 %v1666_v53, %v1649_v62 }
 0x103   : > { %7779 = vmatpush3.bf16.msra.mxu1 %v1671_v61 }
 0x104   : > { %1673 = vmatprep.subr.bf16.mxu0 %v1669_v63  ;;  %7784 = vmatprep.subr.bf16.mxu1 %v8498_v40 }
 0x105   : > { %1674 = vmatpush1.bf16.msra.mxu0 %v1667_v0 }
 0x106   : > { %7781 = vmatmul.mubr.msk.bf16.vlgmr.msra.gmra.mrb[0].mxu1 %vm1660_vm4, %v1653_v2 }
 0x107   : > { %7794 = vmatprep.mubr.msk.bf16.mxu1 %vm8501_vm0, %v8498_v40 }
 0x108   : > { %7135 = vmatmul.mubr.msk.bf16.vlgmr.msra.gmra.mrb[0].mxu0 %vm1660_vm4, %v1653_v2  ;;  %vm2216_vm4 = vcmask 1045504  }
 0x109   : > { %1965 = vmatprep.mubr.bf16.mxu0 %v8500_v43 }
 0x110   : > { %v1658_v3 = vpop.permute.xlu0 %1657 }
 0x1d9   : > { %v1748_v8 = vpop.f32.mrb[0].mxu1 }
 0x1da   : > { %v7782_v11 = vpop.f32.mrb[1].mxu1  ;;  %v1749_v10 = vadd.f32 %v1748_v8, %v1658_v3 }
 0x1db   : > { %v1707_v12 = vpop.f32.mrb[0].mxu0  ;;  %v1751_v14 = vpop.f32.mrb[2].mxu1 }
 0x1dc   : > { %v1708_v15 = vadd.f32 %v1707_v12, %v1658_v3  ;;  %v1709_v18 = vpop.f32.mrb[1].mxu0  ;;  %v7783_v19 = vpop.f32.mrb[3].mxu1  ;;  %v1756_v24 = vmax.f32 %v1749_v10, 0.0 }
 0x1dd   : > { %v1710_v17 = vadd.f32 %v1709_v18, %v1658_v3  ;;  %v1711_v21 = vpop.f32.mrb[2].mxu0 }
 0x1de   : > { %v1754_v22 = vmax.f32 %v1708_v15, 0.0  ;;  %v1712_v23 = vpop.f32.mrb[3].mxu0  ;;  %v1775_v30 = vmul.f32 %v8938_v25, %v1756_v24 }
 0x1df   : > { %v1755_v26 = vmax.f32 %v1710_v17, 0.0 }
 0x1e0   : > { %v1773_v27 = vmul.f32 %v8934_v16, %v1754_v22  ;;  %v1778_v32 = vpack.c.bf16 %v1775_v30, %v1775_v30 }
 0x1e1   : > { %v1774_v28 = vmul.f32 %v8936_v20, %v1755_v26 }
 0x1e2   : > { %v1776_v29 = vpack.c.bf16 %v1773_v27, %v1773_v27 }
 0x1e3   : > { %v1777_v31 = vpack.c.bf16 %v1774_v28, %v1774_v28 }
 0x1e4   : > { %1782 = vrot.lane.b32.xlu0 %v1776_v29, %s10215_s18 }
 0x1e5   : > { %1784 = vrot.lane.b32.xlu1 %v1777_v31, %s10215_s18 }
 0x1e9   : > { %1786 = vrot.lane.b32.xlu1 %v1778_v32, %s10215_s18  ;;  %s10234_s18 = smov 121  }
 0x256   : > { %v1783_v33 = vpop.permute.xlu0 %1782 }
 0x257   : > { %v1794_v34 = vsel %vm1788_vm11, 0, %v1783_v33  ;;  %v1785_v35 = vpop.permute.xlu1 %1784 }
 0x258   : > { %1811 = vrot.lane.b32.xlu0 %v1794_v34, %s10259_s2  ;;  %v1800_v36 = vrot.slane %v1794_v34, 4  ;;  %v1789_v42 = vsel %vm1788_vm11, %v1783_v33, %v1785_v35 }
 0x259   : > { %v1801_v44 = vrot.slane %v1789_v42, 4 }
 0x25a   : > { %1803 = vrot.lane.b32.xlu1 %v1800_v36, %s10245_s1 }
 0x25b   : > { %v1787_v37 = vpop.permute.xlu1 %1786 }
 0x25c   : > { %v1790_v38 = vsel %vm1788_vm11, %v1785_v35, %v1787_v37  ;;  %1827 = vrot.lane.b32.xlu0 %v1794_v34, %s10213_s3 }
 0x25d   : > { %v1797_v41 = vsel %vm1795_vm7, %v1790_v38, 0 }
 0x25e   : > { %1815 = vrot.lane.b32.xlu1 %v1797_v41, %s10259_s2  ;;  %v1802_v45 = vrot.slane %v1797_v41, 4 }
 0x260   : > { %1813 = vrot.lane.b32.xlu0 %v1789_v42, %s10259_s2 }
 0x262   : > { %1819 = vrot.lane.b32.xlu1 %v1800_v36, %s10205_s8 }
 0x264   : > { %1829 = vrot.lane.b32.xlu0 %v1789_v42, %s10213_s3 }
 0x266   : > { %1831 = vrot.lane.b32.xlu1 %v1797_v41, %s10213_s3  ;;  %s10322_s3 = sld [smem:[#allocation25_spill]] }
 0x268   : > { %1821 = vrot.lane.b32.xlu0 %v1801_v44, %s10205_s8 }
 0x26a   : > { %1835 = vrot.lane.b32.xlu1 %v1800_v36, %s10225_s7 }
 0x26c   : > { %1837 = vrot.lane.b32.xlu0 %v1801_v44, %s10225_s7 }
 0x26e   : > { %1805 = vrot.lane.b32.xlu1 %v1801_v44, %s10245_s1 }
 0x270   : > { %1807 = vrot.lane.b32.xlu0 %v1802_v45, %s10245_s1 }
 0x272   : > { %1847 = vrot.lane.b32.xlu1 %v1797_v41, %s10209_s11 }
 0x274   : > { %1845 = vrot.lane.b32.xlu0 %v1789_v42, %s10209_s11 }
 0x276   : > { %1823 = vrot.lane.b32.xlu1 %v1802_v45, %s10205_s8 }
 0x278   : > { %1853 = vrot.lane.b32.xlu0 %v1801_v44, %s10203_s9  ;;  %v1913_v44 = vld [vmem:[%s8656_s27] sm:$0xf] }
 0x27a   : > { %1839 = vrot.lane.b32.xlu1 %v1802_v45, %s10225_s7 }
 0x27c   : > { %1843 = vrot.lane.b32.xlu0 %v1794_v34, %s10209_s11  ;;  %s10223_s11 = smov 11  }
 0x27e   : > { %1855 = vrot.lane.b32.xlu1 %v1802_v45, %s10203_s9 }
 0x280   : > { %1859 = vrot.lane.b32.xlu0 %v1794_v34, %s10207_s15 }
 0x282   : > { %1851 = vrot.lane.b32.xlu1 %v1800_v36, %s10203_s9  ;;  %s10240_s9 = smov 116  }
 0x284   : > { %1863 = vrot.lane.b32.xlu0 %v1797_v41, %s10207_s15 }
 0x286   : > { %1861 = vrot.lane.b32.xlu1 %v1789_v42, %s10207_s15  ;;  %s10217_s15 = smov 107  }
 0x28a   : > { %1917 = vperm.xlu1 %8104, %v1914_v46  }
 0x2ca   : > { %v1812_v47 = vpop.permute.xlu0 %1811 }
 0x2cc   : > { %v1804_v48 = vpop.permute.xlu1 %1803 }
 0x2ce   : > { %v1828_v49 = vpop.permute.xlu0 %1827 }
 0x2d0   : > { %v1816_v50 = vpop.permute.xlu1 %1815 }
 0x2d2   : > { %v1814_v51 = vpop.permute.xlu0 %1813 }
 0x2d3   : > { %v1818_v9 = vsel %vm1485_vm9, %v1814_v51, %v1816_v50  ;;  %v1817_v10 = vsel %vm1485_vm9, %v1812_v47, %v1814_v51 }
 0x2d4   : > { %v1820_v52 = vpop.permute.xlu1 %1819 }
 0x2d6   : > { %v1830_v53 = vpop.permute.xlu0 %1829 }
 0x2d7   : > { %v1833_v23 = vsel %vm10238_vm8, %v1828_v49, %v1830_v53 }
 0x2d8   : > { %v1832_v54 = vpop.permute.xlu1 %1831 }
 0x2d9   : > { %v1834_v17 = vsel %vm10238_vm8, %v1830_v53, %v1832_v54  ;;  %vm3092_vm8 = vcmask 1046528  }
 0x2da   : > { %v1822_v55 = vpop.permute.xlu0 %1821 }
 0x2db   : > { %v1825_v7 = vsel %vm10239_vm5, %v1820_v52, %v1822_v55 }
 0x2dc   : > { %v1836_v56 = vpop.permute.xlu1 %1835  ;;  %v1879_v15 = vsel %vm1637_vm15, %v1817_v10, %v1825_v7  ;;  %v8199_v10 = vld [vmem:[%s8724_s17 + $0x60] sm:$0xff]  }
 0x2de   : > { %v1838_v57 = vpop.permute.xlu0 %1837 }
 0x2df   : > { %v1841_v18 = vsel %vm1530_vm10, %v1836_v56, %v1838_v57 }
 0x2e0   : > { %v1806_v58 = vpop.permute.xlu1 %1805  ;;  %v1891_v27 = vsel %vm1637_vm15, %v1833_v23, %v1841_v18  ;;  %v2217_v18 = vsel %vm1664_vm2, 4294967295, %v8503_v39  ;;  %vm2212_vm2 = vcmask 89088  }
 0x2e1   : > { %v1809_v59 = vsel %vm1449_vm1, %v1804_v48, %v1806_v58 }
 0x2e2   : > { %v1808_v60 = vpop.permute.xlu0 %1807  ;;  %v1868_v2 = vsel %vm1637_vm15, %v1794_v34, %v1809_v59 }
 0x2e3   : > { %v1810_v61 = vsel %vm1449_vm1, %v1806_v58, %v1808_v60  ;;  %v1875_v62 = vsel %vm1637_vm15, %v1797_v41, %v1808_v60  ;;  %v8191_v60 = vld [vmem:[%s8724_s17 + $0x40] sm:$0xff]  }
 0x2e4   : > { %7785 = vmatpush3.bf16.msra.mxu1 %v1875_v62  ;;  %v1848_v63 = vpop.permute.xlu1 %1847  ;;  %v1872_v0 = vsel %vm1637_vm15, %v1789_v42, %v1810_v61  ;;  %v8192_v61 = vld [vmem:[%s8724_s17] sm:$0xff]   ;;  %v8193_v62 = vld [vmem:[%s8724_s17 + $0x48] sm:$0xff]  }
 0x2e5   : > { %1933 = vmatprep.subr.bf16.mxu0 %v1872_v0  ;;  %7786 = vmatprep.subr.bf16.mxu1 %v8498_v40 }
 0x2e6   : > { %v1846_v3 = vpop.permute.xlu0 %1845  ;;  %1934 = vmatpush1.bf16.msra.mxu0 %v1868_v2 }
 0x2e7   : > { %v1850_v29 = vsel %vm10212_vm13, %v1846_v3, %v1848_v63 }
 0x2e8   : > { %v1824_v8 = vpop.permute.xlu1 %1823 }
 0x2e9   : > { %v1826_v11 = vsel %vm10239_vm5, %v1822_v55, %v1824_v8  ;;  %v1887_v12 = vsel %vm1637_vm15, %v1816_v50, %v1824_v8  ;;  %v8195_v8 = vld [vmem:[%s8724_s17 + $0x50] sm:$0xff]  }
 0x2ea   : > { %v1854_v13 = vpop.permute.xlu0 %1853  ;;  %7787 = vmatpush3.bf16.msra.mxu1 %v1887_v12  ;;  %v1883_v14 = vsel %vm1637_vm15, %v1818_v9, %v1826_v11  ;;  %v8196_v9 = vld [vmem:[%s8724_s17 + $0x10] sm:$0xff]   ;;  %v8197_v11 = vld [vmem:[%s8724_s17 + $0x58] sm:$0xff]  }
 0x2eb   : > { %1935 = vmatprep.subr.bf16.mxu0 %v1883_v14  ;;  %7788 = vmatprep.subr.bf16.mxu1 %v8498_v40  ;;  %v8198_v12 = vld [vmem:[%s8724_s17 + $0x18] sm:$0xff]   ;;  %v8201_v14 = vld [vmem:[%s8724_s17 + $0x68] sm:$0xff]  }
 0x2ec   : > { %1936 = vmatpush1.bf16.msra.mxu0 %v1879_v15  ;;  %v1840_v19 = vpop.permute.xlu1 %1839  ;;  %v8202_v15 = vld [vmem:[%s8724_s17 + $0x28] sm:$0xff]  }
 0x2ed   : > { %v1842_v21 = vsel %vm1530_vm10, %v1838_v57, %v1840_v19  ;;  %v1899_v22 = vsel %vm1637_vm15, %v1832_v54, %v1840_v19  ;;  %v2218_v19 = vsel %vm2216_vm4, %v2217_v18, 0  ;;  %vm2420_vm4 = vcmask 728064  }
 0x2ee   : > { %v1844_v24 = vpop.permute.xlu0 %1843  ;;  %7789 = vmatpush3.bf16.msra.mxu1 %v1899_v22  ;;  %v1895_v26 = vsel %vm1637_vm15, %v1834_v17, %v1842_v21  ;;  %v8203_v17 = vld [vmem:[%s8724_s17 + $0x70] sm:$0xff]   ;;  %v8205_v22 = vld [vmem:[%s8724_s17 + $0x80] sm:$0x3f]  }
 0x2ef   : > { %1937 = vmatprep.subr.bf16.mxu0 %v1895_v26  ;;  %7790 = vmatprep.subr.bf16.mxu1 %v8498_v40  ;;  %v1849_v35 = vsel %vm10212_vm13, %v1844_v24, %v1846_v3  ;;  %v8194_v3 = vld [vmem:[%s8724_s17 + $0x8] sm:$0xff]   ;;  %v8204_v21 = vld [vmem:[%s8724_s17 + $0x30] sm:$0xff]   ;;  %v2220_v23 = vand.u32 %v8205_v22, %v2218_v19  ;;  %v8206_v24 = vld [vmem:[%s8724_s17 + $0x78] sm:$0xff]   ;;  %vm10321_vm13 = vcmask 1040384  }
 0x2f0   : > { %1938 = vmatpush1.bf16.msra.mxu0 %v1891_v27  ;;  %v1856_v28 = vpop.permute.xlu1 %1855  ;;  %v8207_v26 = vld [vmem:[%s8724_s17 + $0x38] sm:$0xff]  }
 0x2f1   : > { %v1858_v30 = vsel %vm10233_vm3, %v1854_v13, %v1856_v28  ;;  %v1911_v31 = vsel %vm1637_vm15, %v1848_v63, %v1856_v28 }
 0x2f2   : > { %v1860_v32 = vpop.permute.xlu0 %1859  ;;  %7791 = vmatpush3.bf16.msra.mxu1 %v1911_v31  ;;  %v1907_v33 = vsel %vm1637_vm15, %v1850_v29, %v1858_v30 }
 0x2f3   : > { %1939 = vmatprep.subr.bf16.mxu0 %v1907_v33  ;;  %7792 = vmatprep.subr.bf16.mxu1 %v8498_v40 }
 0x2f4   : > { %v1852_v34 = vpop.permute.xlu1 %1851 }
 0x2f5   : > { %v1857_v36 = vsel %vm10233_vm3, %v1852_v34, %v1854_v13  ;;  %v8200_v13 = vld [vmem:[%s8724_s17 + $0x20] sm:$0xff]   ;;  %vm2907_vm3 = vcmask 261120  }
 0x2f6   : > { %v1864_v37 = vpop.permute.xlu0 %1863  ;;  %v1903_v38 = vsel %vm1637_vm15, %v1849_v35, %v1857_v36 }
 0x2f7   : > { %1940 = vmatpush1.bf16.msra.mxu0 %v1903_v38  ;;  %v1931_v41 = vsel %vm1637_vm15, %v1864_v37, 0 }
 0x2f8   : > { %7793 = vmatpush3.bf16.msra.mxu1 %v1931_v41  ;;  %v1862_v42 = vpop.permute.xlu1 %1861 }
 0x2f9   : > { %v1865_v45 = vsel %vm10211_vm14, %v1860_v32, %v1862_v42  ;;  %v1866_v46 = vsel %vm10211_vm14, %v1862_v42, %v1864_v37  ;;  %7798 = vmatprep.subr.bf16.mxu1 %v8498_v40  ;;  %vm2471_vm14 = vcmask 130048  }
 0x2fa   : > { %7137 = vmatprep.subr.msk.bf16.mxu0 %vm1637_vm15, %v1866_v46  ;;  %v1925_v47 = vsel %vm1637_vm15, %v1865_v45, 0 }
 0x2fb   : > { %1942 = vmatpush1.bf16.msra.mxu0 %v1925_v47  ;;  %7795 = vmatmul.mubr.msk.bf16.vlgmr.msra.gmra.mrb[4].mxu1 %vm1920_vm12, %v1913_v44 }
 0x2fc   : > { %7800 = vmatprep.mubr.msk.bf16.mxu1 %vm8501_vm0, %v8498_v40  ;;  %7397 = vmatprep.subr.bf16.mxu0 %v8191_v60 }
 0x2fd   : > { %7799 = vmatpush3.bf16.msra.mxu1 %v2220_v23 }
 0x2fe   : > { %7138 = vmatmul.mubr.msk.bf16.vlgmr.msra.gmra.mrb[4].mxu0 %vm1920_vm12, %v1913_v44  ;;  %7804 = vmatprep.subr.bf16.mxu1 %v8498_v40 }
 0x2ff   : > { %7398 = vmatpush3.bf16.msra.mxu0 %v8192_v61 }
 0x300   : > { %7399 = vmatprep.subr.bf16.mxu0 %v8193_v62 }
 0x303   : > { %7400 = vmatpush3.bf16.msra.mxu0 %v8194_v3 }
 0x304   : > { %7401 = vmatprep.subr.bf16.mxu0 %v8195_v8  ;;  %v2340_v8 = vld [vmem:[%s8661_s20] sm:$0xff] }
 0x307   : > { %7402 = vmatpush3.bf16.msra.mxu0 %v8196_v9 }
 0x308   : > { %7403 = vmatprep.subr.bf16.mxu0 %v8197_v11 }
 0x309   : > { %v1918_v48 = vpop.permute.xlu1 %1917 }
 0x30b   : > { %7404 = vmatpush3.bf16.msra.mxu0 %v8198_v12 }
 0x30c   : > { %7405 = vmatprep.subr.bf16.mxu0 %v8199_v10 }
 0x30f   : > { %7406 = vmatpush3.bf16.msra.mxu0 %v8200_v13 }
 0x310   : > { %7407 = vmatprep.subr.bf16.mxu0 %v8201_v14 }
 0x313   : > { %7408 = vmatpush3.bf16.msra.mxu0 %v8202_v15 }
 0x314   : > { %7409 = vmatprep.subr.bf16.mxu0 %v8203_v17 }
 0x317   : > { %7410 = vmatpush3.bf16.msra.mxu0 %v8204_v21 }
 0x318   : > { %7411 = vmatprep.subr.bf16.mxu0 %v8206_v24  ;;  %v8208_v24 = vld [vmem:[%s8671_s30] sm:$0xff]  }
 0x31b   : > { %7412 = vmatpush3.bf16.msra.mxu0 %v8207_v26 }
 0x31c   : > { %7818 = vmatprep.subr.bf16.mxu0 %v8498_v40 }
 0x3ce   : > { %v2008_v49 = vpop.f32.mrb[4].mxu1 }
 0x3cf   : > { %v7796_v50 = vpop.f32.mrb[5].mxu1  ;;  %v2009_v51 = vadd.f32 %v2008_v49, %v1918_v48 }
 0x3d0   : > { %v2011_v52 = vpop.f32.mrb[6].mxu1 }
 0x3d1   : > { %v1967_v53 = vpop.f32.mrb[4].mxu0  ;;  %v7797_v54 = vpop.f32.mrb[7].mxu1  ;;  %v9016_v57 = vmax.f32 %v2009_v51, 0.0 }
 0x3d2   : > { %v1969_v55 = vpop.f32.mrb[5].mxu0  ;;  %v1968_v56 = vadd.f32 %v1967_v53, %v1918_v48 }
 0x3d3   : > { %v1970_v58 = vadd.f32 %v1969_v55, %v1918_v48  ;;  %v1971_v59 = vpop.f32.mrb[6].mxu0 }
 0x3d4   : > { %v1972_v63 = vpop.f32.mrb[7].mxu0  ;;  %v9021_v0 = vmax.f32 %v1968_v56, 0.0 }
 0x3d5   : > { %v9023_v2 = vmax.f32 %v1970_v58, 0.0 }
 0x3d6   : > { %2041 = vrot.lane.b32.xlu1 %v9021_v0, %s10245_s1 }
 0x3d7   : > { %v8105_v7 = vpack.i.bf16 %v9016_v57, %v9023_v2 }
 0x3d9   : > { %8106 = vrot.lane.b32.xlu0 %v8105_v7, %s10245_s1  ;;  %v2341_v7 = vld [vmem:[%s8661_s20 + $0x8] sm:$0xff] }
 0x448   : > { %v2042_v30 = vpop.permute.xlu1 %2041 }
 0x44b   : > { %v8107_v27 = vpop.permute.xlu0 %8106 }
 0x44c   : > { %v8109_v28 = vunpack.i.h.bf16 %v8107_v27  ;;  %v8108_v29 = vunpack.i.l.bf16 %v8107_v27 }
 0x44e   : > { %v2055_v31 = vmax.f32 %v9016_v57, %v8109_v28  ;;  %v2048_v32 = vsel %vm1449_vm1, %v2042_v30, %v8108_v29  ;;  %v2049_v33 = vsel %vm1449_vm1, %v8108_v29, %v8109_v28 }
 0x44f   : > { %v2053_v34 = vmax.f32 %v9021_v0, %v2048_v32  ;;  %v2054_v35 = vmax.f32 %v9023_v2, %v2049_v33 }
 0x451   : > { %2059 = vrot.lane.b32.xlu1 %v2053_v34, %s10205_s8  ;;  %v8110_v36 = vpack.i.bf16 %v2055_v31, %v2054_v35 }
 0x453   : > { %8111 = vrot.lane.b32.xlu0 %v8110_v36, %s10205_s8  ;;  %s10221_s8 = smov 106  }
 0x4c3   : > { %v2060_v42 = vpop.permute.xlu1 %2059 }
 0x4c5   : > { %v8112_v37 = vpop.permute.xlu0 %8111 }
 0x4c6   : > { %v8114_v38 = vunpack.i.h.bf16 %v8112_v37  ;;  %v8113_v41 = vunpack.i.l.bf16 %v8112_v37 }
 0x4c8   : > { %v2073_v44 = vmax.f32 %v2055_v31, %v8114_v38  ;;  %v2066_v45 = vsel %vm10239_vm5, %v2060_v42, %v8113_v41  ;;  %v2067_v46 = vsel %vm10239_vm5, %v8113_v41, %v8114_v38  ;;  %vm3093_vm5 = vcmask 1047552  }
 0x4c9   : > { %v2072_v47 = vmax.f32 %v2054_v35, %v2067_v46  ;;  %v2071_v48 = vmax.f32 %v2053_v34, %v2066_v45  ;;  %v7160_v35 = vld [vmem:[%s8566_s29] ss:$0 sm:$0xff]  ;;  %v2451_v46 = vld [vmem:[%s8666_s19 + $0x8] sm:$0xff] }
 0x4ca   : > { %v2076_v49 = vpack.c.bf16 %v2073_v44, %v2073_v44 }
 0x4cb   : > { %v2075_v50 = vpack.c.bf16 %v2072_v47, %v2072_v47  ;;  %v2074_v51 = vpack.c.bf16 %v2071_v48, %v2071_v48  ;;  %v2450_v47 = vld [vmem:[%s8666_s19] sm:$0xff] }
 0x4cc   : > { %7801 = vmatmul.mubr.msk.bf16.vlgmr.msra.gmra.mrb[8].mxu1 %vm2212_vm2, %v2076_v49  ;;  %v8209_v48 = vld [vmem:[%s8676_s14 + $0x4] ss:$8 sps:$4 sm:$0xff]  }
 0x4cd   : > { %2254 = vmatprep.mubr.bf16.mxu0 %v2075_v50  ;;  %7814 = vmatprep.mubr.msk.bf16.mxu1 %vm8501_vm0, %v8498_v40 }
 0x4ce   : > { %2255 = vmatmul.mubr.bf16.vlgmr.msra.gmra.mrb[8].mxu0 %v2074_v51 }
 0x4cf   : > { %7828 = vmatprep.mubr.msk.bf16.mxu0 %vm8501_vm0, %v8498_v40 }
 0x59f   : > { %v2296_v52 = vpop.f32.mrb[8].mxu1 }
 0x5a0   : > { %v7802_v53 = vpop.f32.mrb[9].mxu1 }
 0x5a1   : > { %v7413_v54 = vpop.f32.mrb[8].mxu0  ;;  %v2299_v55 = vpop.f32.mrb[10].mxu1 }
 0x5a2   : > { %v7414_v56 = vpop.f32.mrb[9].mxu0  ;;  %v7803_v58 = vpop.f32.mrb[11].mxu1 }
 0x5a3   : > { %v7415_v59 = vadd.f32 %v7414_v56, %v7413_v54  ;;  %v7416_v60 = vpop.f32.mrb[10].mxu0  ;;  %v8211_v58 = vld [vmem:[%s8676_s14] ss:$8 sps:$4 sm:$0xff]  }
 0x5a4   : > { %v7417_v61 = vpop.f32.mrb[11].mxu0 }
 0x5a5   : > { %v2297_v62 = vadd.f32 %v7415_v59, %v2296_v52 }
 0x5a7   : > { %v2302_v63 = vpack.c.bf16 %v2297_v62, %v2297_v62 }
 0x5a9   : > { %2308 = vrot.lane.b32.xlu1 %v2302_v63, %s10259_s2  ;;  %v2305_v3 = vrot.slane %v2302_v63, 4 }
 0x5ab   : > { %2306 = vrot.lane.b32.xlu0 %v2305_v3, %s10245_s1 }
 0x5ad   : > { %2312 = vrot.lane.b32.xlu1 %v2302_v63, %s10219_s26 }
 0x5af   : > { %2310 = vrot.lane.b32.xlu0 %v2305_v3, %s10227_s0 }
 0x5b1   : > { %2316 = vrot.lane.b32.xlu1 %v2302_v63, %s10225_s7 }
 0x5b3   : > { %2314 = vrot.lane.b32.xlu0 %v2305_v3, %s10240_s9 }
 0x5b5   : > { %2320 = vrot.lane.b32.xlu1 %v2302_v63, %s10221_s8 }
 0x5b7   : > { %2318 = vrot.lane.b32.xlu0 %v2305_v3, %s10217_s15 }
 0x5b9   : > { %2349 = vperm.xlu1 %8104, %v2341_v7   ;;  %v8212_v7 = vld [vmem:[%s8729_s13] sm:$0xff]  }
 0x5ba   : > { %7819 = vmatpush3.bf16.msra.mxu0 %v8212_v7 }
 0x5bb   : > { %2344 = vperm.xlu0 %8103, %v2340_v8   ;;  %7820 = vmatprep.subr.bf16.mxu0 %v8498_v40 }
 0x61b   : > { %v2309_v9 = vpop.permute.xlu1 %2308 }
 0x61d   : > { %v2307_v11 = vpop.permute.xlu0 %2306 }
 0x61e   : > { %v2324_v12 = vsel %vm1637_vm15, %v2302_v63, %v2307_v11  ;;  %v8213_v11 = vld [vmem:[%s8729_s13 + $0x8] sm:$0xff]  }
 0x61f   : > { %v2313_v10 = vpop.permute.xlu1 %2312  ;;  %7805 = vmatpush3.bf16.msra.mxu1 %v2324_v12  ;;  %7821 = vmatpush3.bf16.msra.mxu0 %v8213_v11 }
 0x620   : > { %7806 = vmatprep.subr.bf16.mxu1 %v8498_v40  ;;  %7822 = vmatprep.subr.bf16.mxu0 %v8498_v40 }
 0x621   : > { %v2311_v13 = vpop.permute.xlu0 %2310 }
 0x622   : > { %v2328_v14 = vsel %vm1637_vm15, %v2309_v9, %v2311_v13 }
 0x623   : > { %7807 = vmatpush3.bf16.msra.mxu1 %v2328_v14  ;;  %v2317_v15 = vpop.permute.xlu1 %2316  ;;  %v8214_v14 = vld [vmem:[%s8729_s13 + $0x10] sm:$0xff]  }
 0x624   : > { %7808 = vmatprep.subr.bf16.mxu1 %v8498_v40  ;;  %7823 = vmatpush3.bf16.msra.mxu0 %v8214_v14 }
 0x625   : > { %v2315_v18 = vpop.permute.xlu0 %2314  ;;  %7824 = vmatprep.subr.bf16.mxu0 %v8498_v40 }
 0x626   : > { %v2332_v19 = vsel %vm1637_vm15, %v2313_v10, %v2315_v18  ;;  %v8216_v18 = vld [vmem:[%s8729_s13 + $0x20] ss:$0 sps:$4 sm:$0x33]  }
 0x627   : > { %7809 = vmatpush3.bf16.msra.mxu1 %v2332_v19  ;;  %v2321_v22 = vpop.permute.xlu1 %2320  ;;  %v2589_v19 = vsel %vm10321_vm13, 4294967295, %v8503_v39  ;;  %vm2785_vm13 = vcmask 56320  }
 0x628   : > { %7810 = vmatprep.subr.bf16.mxu1 %v8498_v40  ;;  %v2361_v23 = vsel %vm1637_vm15, %v2321_v22, 0 }
 0x629   : > { %v2319_v17 = vpop.permute.xlu0 %2318 }
 0x62a   : > { %v2336_v21 = vsel %vm1637_vm15, %v2317_v15, %v2319_v17  ;;  %v8215_v15 = vld [vmem:[%s8729_s13 + $0x18] sm:$0xff]   ;;  %v2590_v17 = vsel %vm1599_vm6, %v2589_v19, 0  ;;  %vm2585_vm6 = vcmask 547840  }
 0x62b   : > { %7811 = vmatpush3.bf16.msra.mxu1 %v2336_v21  ;;  %7825 = vmatpush3.bf16.msra.mxu0 %v8215_v15  ;;  %v2592_v21 = vand.u32 %v8216_v18, %v2590_v17 }
 0x62c   : > { %7812 = vmatprep.subr.bf16.mxu1 %v8498_v40  ;;  %7826 = vmatprep.subr.bf16.mxu0 %v8498_v40 }
 0x62f   : > { %7813 = vmatpush3.bf16.msra.mxu1 %v2361_v23  ;;  %7827 = vmatpush3.bf16.msra.mxu0 %v2592_v21 }
 0x630   : > { %2475 = vmatprep.subr.bf16.mxu1 %v8500_v43  ;;  %2714 = vmatprep.subr.bf16.mxu0 %v8500_v43 }
 0x632   : > { %7815 = vmatmul.mubr.msk.bf16.vlgmr.msra.gmra.mrb[12].mxu1 %vm1920_vm12, %v8208_v24 }
 0x633   : > { %7163 = vmatprep.mubr.msk.bf16.mxu1 %vm2471_vm14, %v8209_v48 }
 0x638   : > { %v2350_v30 = vpop.permute.xlu1 %2349 }
 0x63a   : > { %v2345_v26 = vpop.permute.xlu0 %2344 }
 0x705   : > { %v2397_v27 = vpop.f32.mrb[12].mxu1 }
 0x706   : > { %v2398_v28 = vadd.f32 %v2397_v27, %v2345_v26  ;;  %v7816_v29 = vpop.f32.mrb[13].mxu1 }
 0x707   : > { %v2400_v31 = vpop.f32.mrb[14].mxu1 }
 0x708   : > { %v2404_v32 = vmax.f32 %v2398_v28, 0.0  ;;  %v2401_v33 = vadd.f32 %v2400_v31, %v2350_v30  ;;  %v7817_v34 = vpop.f32.mrb[15].mxu1 }
 0x70a   : > { %v2405_v36 = vmax.f32 %v2401_v33, 0.0  ;;  %v2412_v37 = vmul.f32 %v7160_v35, %v2404_v32 }
 0x70c   : > { %v2413_v38 = vmul.f32 %v7160_v35, %v2405_v36 }
 0x70e   : > { %v2414_v41 = vpack.c.bf16 %v2413_v38, %v2412_v37 }
 0x710   : > { %2416 = vrot.lane.b32.xlu0 %v2414_v41, %s10223_s11  ;;  %s10236_s11 = smov 115  }
 0x782   : > { %v2417_v42 = vpop.permute.xlu0 %2416 }
 0x783   : > { %v2419_v44 = vsel %vm2212_vm2, 0, %v2417_v42  ;;  %v2667_v42 = vld [vmem:[%s8681_s24 + $0x8] sm:$0xff] }
 0x784   : > { %v2421_v45 = vsel %vm2420_vm4, %v2419_v44, 0  ;;  %v2666_v44 = vld [vmem:[%s8681_s24] sm:$0xff] }
 0x785   : > { %2427 = vrot.lane.b32.xlu0 %v2421_v45, %s10259_s2  ;;  %2424 = vrot.lane.b32.xlu1 %v2421_v45, %s10245_s1 }
 0x786   : > { %2476 = vmatpush1.bf16.msra.mxu1 %v2421_v45 }
 0x787   : > { %2477 = vmatprep.subr.bf16.mxu1 %v8500_v43 }
 0x789   : > { %2433 = vrot.lane.b32.xlu0 %v2421_v45, %s10219_s26  ;;  %2430 = vrot.lane.b32.xlu1 %v2421_v45, %s10227_s0  ;;  %s10256_s26 = smov 120  }
 0x78d   : > { %2439 = vrot.lane.b32.xlu0 %v2421_v45, %s10225_s7  ;;  %2436 = vrot.lane.b32.xlu1 %v2421_v45, %s10240_s9  ;;  %s10323_s7 = sld [smem:[#allocation8_spill]] }
 0x791   : > { %2445 = vrot.lane.b32.xlu0 %v2421_v45, %s10221_s8  ;;  %2442 = vrot.lane.b32.xlu1 %v2421_v45, %s10217_s15  ;;  %s10247_s15 = smov 122   ;;  %s10229_s8 = smov 114   ;;  %v8217_v45 = vld [vmem:[%s10322_s3 + $0x4] ss:$8 sps:$4 sm:$0xff]  }
 0x795   : > { %2459 = vperm.xlu0 %8103, %v2451_v46   ;;  %2454 = vperm.xlu1 %8104, %v2450_v47   ;;  %v2669_v46 = vld [vmem:[%s8681_s24 + $0x18] sm:$0xff]  ;;  %v2668_v47 = vld [vmem:[%s8681_s24 + $0x10] sm:$0xff] }
 0x7f7   : > { %v2425_v49 = vpop.permute.xlu1 %2424  ;;  %v2428_v50 = vpop.permute.xlu0 %2427 }
 0x7f8   : > { %2478 = vmatpush1.bf16.msra.mxu1 %v2425_v49 }
 0x7f9   : > { %2479 = vmatprep.subr.bf16.mxu1 %v8500_v43 }
 0x7fb   : > { %v2431_v51 = vpop.permute.xlu1 %2430  ;;  %v2434_v52 = vpop.permute.xlu0 %2433 }
 0x7fc   : > { %2480 = vmatpush1.bf16.msra.mxu1 %v2428_v50 }
 0x7fd   : > { %2481 = vmatprep.subr.bf16.mxu1 %v8500_v43 }
 0x7ff   : > { %v2437_v53 = vpop.permute.xlu1 %2436  ;;  %v2440_v54 = vpop.permute.xlu0 %2439 }
 0x800   : > { %2482 = vmatpush1.bf16.msra.mxu1 %v2431_v51 }
 0x801   : > { %2483 = vmatprep.subr.bf16.mxu1 %v8500_v43 }
 0x803   : > { %v2443_v55 = vpop.permute.xlu1 %2442  ;;  %v2446_v56 = vpop.permute.xlu0 %2445 }
 0x804   : > { %2484 = vmatpush1.bf16.msra.mxu1 %v2434_v52 }
 0x805   : > { %2485 = vmatprep.subr.bf16.mxu1 %v8500_v43 }
 0x808   : > { %2486 = vmatpush1.bf16.msra.mxu1 %v2437_v53 }
 0x809   : > { %2487 = vmatprep.subr.bf16.mxu1 %v8500_v43 }
 0x80c   : > { %2488 = vmatpush1.bf16.msra.mxu1 %v2440_v54 }
 0x80d   : > { %2489 = vmatprep.subr.bf16.mxu1 %v8500_v43 }
 0x810   : > { %2490 = vmatpush1.bf16.msra.mxu1 %v2443_v55 }
 0x811   : > { %2491 = vmatprep.subr.bf16.mxu1 %v8500_v43 }
 0x814   : > { %2492 = vmatpush1.bf16.msra.mxu1 %v2446_v56  ;;  %v2455_v59 = vpop.permute.xlu1 %2454  ;;  %v2460_v63 = vpop.permute.xlu0 %2459  ;;  %v8219_v56 = vld [vmem:[%s10322_s3] ss:$8 sps:$4 sm:$0xff]  }
 0x817   : > { %2508 = vmatmul.mubr.bf16.vlgmr.msra.gmra.mrb[16].mxu1 %v8211_v58  ;;  %v8220_v58 = vld [vmem:[%s10322_s3 + $0x14] ss:$8 sps:$4 sm:$0xff]  }
 0x8ea   : > { %v2509_v60 = vpop.f32.mrb[16].mxu1 }
 0x8eb   : > { %v2510_v61 = vadd.f32 %v2509_v60, %v2455_v59  ;;  %v2511_v62 = vpop.f32.mrb[17].mxu1  ;;  %v8222_v59 = vld [vmem:[%s10322_s3 + $0x10] ss:$8 sps:$4 sm:$0xff]   ;;  %s10336_s3 = smov 120  }
 0x8ec   : > { %v2512_v3 = vpop.f32.mrb[18].mxu1 }
 0x8ed   : > { %v2513_v8 = vadd.f32 %v2512_v3, %v2460_v63  ;;  %v2514_v9 = vpop.f32.mrb[19].mxu1  ;;  %v9111_v12 = vmax.f32 %v2510_v61, 0.0 }
 0x8ef   : > { %v9113_v10 = vmax.f32 %v2513_v8, 0.0 }
 0x8f1   : > { %v8115_v13 = vpack.i.bf16 %v9113_v10, %v9111_v12 }
 0x8f3   : > { %8116 = vrot.lane.b32.xlu1 %v8115_v13, %s10245_s1  ;;  %v7176_v13 = vld [vmem:[%s10323_s7] ss:$0 sm:$0xff] }
 0x965   : > { %v8117_v22 = vpop.permute.xlu1 %8116 }
 0x966   : > { %v8119_v23 = vunpack.i.h.bf16 %v8117_v22  ;;  %v8118_v24 = vunpack.i.l.bf16 %v8117_v22 }
 0x968   : > { %v2537_v26 = vmax.f32 %v9113_v10, %v8119_v23  ;;  %v2536_v27 = vmax.f32 %v9111_v12, %v8118_v24 }
 0x96a   : > { %v8120_v28 = vpack.i.bf16 %v2537_v26, %v2536_v27 }
 0x96c   : > { %8121 = vrot.lane.b32.xlu0 %v8120_v28, %s10227_s0  ;;  %s10231_s0 = smov 7  }
 0x9de   : > { %v8122_v29 = vpop.permute.xlu0 %8121 }
 0x9df   : > { %v8124_v30 = vunpack.i.h.bf16 %v8122_v29  ;;  %v8123_v31 = vunpack.i.l.bf16 %v8122_v29 }
 0x9e1   : > { %v2547_v32 = vmax.f32 %v2537_v26, %v8124_v30  ;;  %v2546_v33 = vmax.f32 %v2536_v27, %v8123_v31 }
 0x9e3   : > { %v2548_v34 = vpack.c.bf16 %v2547_v32, %v2546_v33 }
 0x9e5   : > { %7829 = vmatmul.mubr.msk.bf16.vlgmr.msra.gmra.mrb[12].mxu0 %vm2585_vm6, %v2548_v34  ;;  %vm2790_vm6 = vcmask 236544  }
 0x9e6   : > { %7174 = vmatprep.mubr.msk.bf16.mxu0 %vm2471_vm14, %v8217_v45 }
 0xab8   : > { %v2628_v35 = vpop.f32.mrb[12].mxu0 }
 0xab9   : > { %v7830_v36 = vpop.f32.mrb[13].mxu0 }
 0xaba   : > { %v2631_v37 = vpop.f32.mrb[14].mxu0 }
 0xabb   : > { %v2635_v38 = vpack.c.bf16 %v2631_v37, %v2628_v35  ;;  %v7831_v41 = vpop.f32.mrb[15].mxu0 }
 0xabd   : > { %2641 = vrot.lane.b32.xlu0 %v2635_v38, %s10259_s2  ;;  %2638 = vrot.lane.b32.xlu1 %v2635_v38, %s10245_s1 }
 0xabe   : > { %2715 = vmatpush1.bf16.msra.mxu0 %v2635_v38 }
 0xabf   : > { %2716 = vmatprep.subr.bf16.mxu0 %v8500_v43 }
 0xac1   : > { %2647 = vrot.lane.b32.xlu0 %v2635_v38, %s10234_s18  ;;  %2644 = vrot.lane.b32.xlu1 %v2635_v38, %s10247_s15 }
 0xac5   : > { %2653 = vrot.lane.b32.xlu0 %v2635_v38, %s10240_s9  ;;  %2650 = vrot.lane.b32.xlu1 %v2635_v38, %s10256_s26 }
 0xac9   : > { %2659 = vrot.lane.b32.xlu0 %v2635_v38, %s10229_s8  ;;  %2656 = vrot.lane.b32.xlu1 %v2635_v38, %s10236_s11  ;;  %s10324_s8 = sld [smem:[#allocation26_spill]] }
 0xacd   : > { %2677 = vperm.xlu0 %8103, %v2667_v42   ;;  %2672 = vperm.xlu1 %8104, %v2666_v44  }
 0xacf   : > { %v8225_v42 = vld [vmem:[%s10324_s8 + $0x4] ss:$12 sps:$4 sm:$0xff]   ;;  %v8226_v44 = vld [vmem:[%s10324_s8 + $0x8] ss:$12 sps:$4 sm:$0xff]  }
 0xad0   : > { %2946 = vmatprep.mubr.bf16.mxu1 %v8225_v42 }
 0xad1   : > { %2687 = vperm.xlu0 %8103, %v2669_v46   ;;  %2682 = vperm.xlu1 %8104, %v2668_v47  }
 0xb2f   : > { %v2639_v48 = vpop.permute.xlu1 %2638  ;;  %v2642_v49 = vpop.permute.xlu0 %2641 }
 0xb30   : > { %2717 = vmatpush1.bf16.msra.mxu0 %v2639_v48 }
 0xb31   : > { %2718 = vmatprep.subr.bf16.mxu0 %v8500_v43 }
 0xb33   : > { %v2645_v50 = vpop.permute.xlu1 %2644  ;;  %v2648_v51 = vpop.permute.xlu0 %2647 }
 0xb34   : > { %2719 = vmatpush1.bf16.msra.mxu0 %v2642_v49 }
 0xb35   : > { %2720 = vmatprep.subr.bf16.mxu0 %v8500_v43 }
 0xb37   : > { %v2651_v52 = vpop.permute.xlu1 %2650  ;;  %v2654_v53 = vpop.permute.xlu0 %2653 }
 0xb38   : > { %2721 = vmatpush1.bf16.msra.mxu0 %v2645_v50 }
 0xb39   : > { %2722 = vmatprep.subr.bf16.mxu0 %v8500_v43 }
 0xb3b   : > { %v2657_v54 = vpop.permute.xlu1 %2656  ;;  %v2660_v55 = vpop.permute.xlu0 %2659 }
 0xb3c   : > { %2723 = vmatpush1.bf16.msra.mxu0 %v2648_v51 }
 0xb3d   : > { %2724 = vmatprep.subr.bf16.mxu0 %v8500_v43 }
 0xb40   : > { %2725 = vmatpush1.bf16.msra.mxu0 %v2651_v52 }
 0xb41   : > { %2726 = vmatprep.subr.bf16.mxu0 %v8500_v43 }
 0xb44   : > { %2727 = vmatpush1.bf16.msra.mxu0 %v2654_v53 }
 0xb45   : > { %2728 = vmatprep.subr.bf16.mxu0 %v8500_v43 }
 0xb48   : > { %2729 = vmatpush1.bf16.msra.mxu0 %v2657_v54 }
 0xb49   : > { %2730 = vmatprep.subr.bf16.mxu0 %v8500_v43 }
 0xb4c   : > { %2731 = vmatpush1.bf16.msra.mxu0 %v2660_v55  ;;  %v2673_v60 = vpop.permute.xlu1 %2672  ;;  %v2678_v3 = vpop.permute.xlu0 %2677 }
 0xb4f   : > { %2747 = vmatmul.mubr.bf16.vlgmr.msra.gmra.mrb[16].mxu0 %v8219_v56 }
 0xb50   : > { %7175 = vmatprep.mubr.msk.bf16.mxu0 %vm2471_vm14, %v8220_v58  ;;  %v2683_v19 = vpop.permute.xlu1 %2682  ;;  %v2688_v24 = vpop.permute.xlu0 %2687 }
 0xb57   : > { %2755 = vmatmul.mubr.bf16.gmra.mrb[20].mxu0 %v8222_v59 }
 0xb58   : > { %7836 = vmatprep.mubr.msk.bf16.mxu0 %vm2907_vm3, %v8226_v44 }
 0xc22   : > { %v2748_v61 = vpop.f32.mrb[16].mxu0 }
 0xc23   : > { %v2749_v62 = vadd.f32 %v2748_v61, %v2673_v60  ;;  %v2750_v63 = vpop.f32.mrb[17].mxu0 }
 0xc24   : > { %v2751_v7 = vpop.f32.mrb[18].mxu0 }
 0xc25   : > { %v2763_v8 = vmax.f32 %v2749_v62, 0.0  ;;  %v2752_v9 = vadd.f32 %v2751_v7, %v2678_v3  ;;  %v2753_v11 = vpop.f32.mrb[19].mxu0  ;;  %v8223_v7 = vld [vmem:[%s10324_s8] ss:$12 sps:$4 sm:$0xff]  }
 0xc26   : > { %v8227_v11 = vld [vmem:[%s10324_s8 + $0x20] ss:$12 sps:$4 sm:$0xff]  }
 0xc27   : > { %v2764_v14 = vmax.f32 %v2752_v9, 0.0  ;;  %v2773_v15 = vmul.f32 %v7176_v13, %v2763_v8  ;;  %v8228_v8 = vld [vmem:[%s10324_s8 + $0x1c] ss:$12 sps:$4 sm:$0xff]  }
 0xc29   : > { %v2774_v18 = vmul.f32 %v7176_v13, %v2764_v14 }
 0xc2a   : > { %v2756_v17 = vpop.f32.mrb[20].mxu0 }
 0xc2b   : > { %v2757_v21 = vadd.f32 %v2756_v17, %v2683_v19  ;;  %v2758_v22 = vpop.f32.mrb[21].mxu0  ;;  %v2777_v23 = vpack.c.bf16 %v2774_v18, %v2773_v15 }
 0xc2c   : > { %v2759_v26 = vpop.f32.mrb[22].mxu0 }
 0xc2d   : > { %v2765_v27 = vmax.f32 %v2757_v21, 0.0  ;;  %v2760_v28 = vadd.f32 %v2759_v26, %v2688_v24  ;;  %v2761_v29 = vpop.f32.mrb[23].mxu0  ;;  %2781 = vrot.lane.b32.xlu1 %v2777_v23, %s10231_s0 }
 0xc2f   : > { %v2766_v30 = vmax.f32 %v2760_v28, 0.0  ;;  %v2775_v31 = vmul.f32 %v7176_v13, %v2765_v27 }
 0xc31   : > { %v2776_v32 = vmul.f32 %v7176_v13, %v2766_v30  ;;  %v8230_v13 = vld [vmem:[%s10324_s8 + $0x18] ss:$12 sps:$4 sm:$0xff]   ;;  %s10349_s8 = smov 115  }
 0xc33   : > { %v2778_v33 = vpack.c.bf16 %v2776_v32, %v2775_v31 }
 0xc35   : > { %2783 = vrot.lane.b32.xlu0 %v2778_v33, %s10231_s0  ;;  %s10325_s0 = sld [smem:[#allocation24_spill]] }
 0xc3b   : > { %v2853_v45 = vld [vmem:[%s10325_s0] sm:$0xff]  ;;  %v2855_v46 = vld [vmem:[%s10325_s0 + $0x10] sm:$0xff]  ;;  %v2854_v47 = vld [vmem:[%s10325_s0 + $0x8] sm:$0xff] }
 0xc3c   : > { %v2856_v48 = vld [vmem:[%s10325_s0 + $0x18] sm:$0xff]  ;;  %s10329_s0 = sld [smem:[#allocation4_spill]] }
 0xc9f   : > { %v2782_v34 = vpop.permute.xlu1 %2781 }
 0xca0   : > { %v2787_v35 = vsel %vm2785_vm13, 0, %v2782_v34 }
 0xca1   : > { %v2791_v36 = vsel %vm2790_vm6, %v2787_v35, 0 }
 0xca2   : > { %2815 = vrot.lane.b32.xlu1 %v2791_v36, %s10234_s18 }
 0xca6   : > { %2821 = vrot.lane.b32.xlu1 %v2791_v36, %s10256_s26 }
 0xca7   : > { %v2784_v37 = vpop.permute.xlu0 %2783 }
 0xca8   : > { %v2789_v38 = vsel %vm2785_vm13, 0, %v2784_v37 }
 0xca9   : > { %v2793_v41 = vsel %vm2790_vm6, %v2789_v38, 0 }
 0xcaa   : > { %2817 = vrot.lane.b32.xlu0 %v2793_v41, %s10234_s18  ;;  %2823 = vrot.lane.b32.xlu1 %v2793_v41, %s10256_s26  ;;  %s10326_s18 = smov 114  }
 0xcae   : > { %2797 = vrot.lane.b32.xlu0 %v2791_v36, %s10245_s1  ;;  %2827 = vrot.lane.b32.xlu1 %v2791_v36, %s10240_s9 }
 0xcb2   : > { %2799 = vrot.lane.b32.xlu0 %v2793_v41, %s10245_s1  ;;  %2829 = vrot.lane.b32.xlu1 %v2793_v41, %s10240_s9  ;;  %s10243_s9 = smov 123  }
 0xcb6   : > { %2803 = vrot.lane.b32.xlu0 %v2791_v36, %s10259_s2  ;;  %2833 = vrot.lane.b32.xlu1 %v2791_v36, %s10236_s11 }
 0xcba   : > { %2805 = vrot.lane.b32.xlu0 %v2793_v41, %s10259_s2  ;;  %2835 = vrot.lane.b32.xlu1 %v2793_v41, %s10236_s11  ;;  %s10327_s11 = sld [smem:[#allocation31_spill]] }
 0xcbe   : > { %2809 = vrot.lane.b32.xlu0 %v2791_v36, %s10247_s15  ;;  %2839 = vrot.lane.b32.xlu1 %v2791_v36, %s10326_s18 }
 0xcc2   : > { %2811 = vrot.lane.b32.xlu0 %v2793_v41, %s10247_s15  ;;  %2859 = vperm.xlu1 %8104, %v2853_v45  }
 0xcc6   : > { %2841 = vrot.lane.b32.xlu0 %v2793_v41, %s10326_s18  ;;  %2869 = vperm.xlu1 %8104, %v2855_v46  }
 0xcca   : > { %2864 = vperm.xlu0 %8103, %v2854_v47  }
 0xcce   : > { %2874 = vperm.xlu0 %8103, %v2856_v48  }
 0xd14   : > { %v2816_v49 = vpop.permute.xlu1 %2815 }
 0xd15   : > { %7433 = vmatprep.subr.bf16.mxu1 %v2816_v49 }
 0xd16   : > { %7434 = vmatpush3.bf16.msra.mxu1 %v2791_v36 }
 0xd18   : > { %v2822_v50 = vpop.permute.xlu1 %2821 }
 0xd1c   : > { %v2818_v51 = vpop.permute.xlu0 %2817  ;;  %v2824_v52 = vpop.permute.xlu1 %2823 }
 0xd1d   : > { %7435 = vmatprep.subr.bf16.mxu1 %v2818_v51 }
 0xd1e   : > { %7436 = vmatpush3.bf16.msra.mxu1 %v2793_v41 }
 0xd1f   : > { %7437 = vmatprep.subr.bf16.mxu1 %v2822_v50 }
 0xd20   : > { %v2798_v53 = vpop.permute.xlu0 %2797  ;;  %v2828_v54 = vpop.permute.xlu1 %2827 }
 0xd22   : > { %7438 = vmatpush3.bf16.msra.mxu1 %v2798_v53 }
 0xd23   : > { %7439 = vmatprep.subr.bf16.mxu1 %v2824_v52 }
 0xd24   : > { %v2800_v55 = vpop.permute.xlu0 %2799  ;;  %v2830_v56 = vpop.permute.xlu1 %2829 }
 0xd26   : > { %7440 = vmatpush3.bf16.msra.mxu1 %v2800_v55 }
 0xd27   : > { %7441 = vmatprep.subr.bf16.mxu1 %v2828_v54 }
 0xd28   : > { %v2804_v58 = vpop.permute.xlu0 %2803  ;;  %v2834_v59 = vpop.permute.xlu1 %2833 }
 0xd2a   : > { %7442 = vmatpush3.bf16.msra.mxu1 %v2804_v58  ;;  %v8231_v58 = vld [vmem:[%s10327_s11] sm:$0xff]   ;;  %s10328_s11 = sld [smem:[#allocation6_spill]] }
 0xd2b   : > { %7443 = vmatprep.subr.bf16.mxu1 %v2830_v56 }
 0xd2c   : > { %v2806_v60 = vpop.permute.xlu0 %2805  ;;  %v2836_v61 = vpop.permute.xlu1 %2835 }
 0xd2e   : > { %7444 = vmatpush3.bf16.msra.mxu1 %v2806_v60 }
 0xd2f   : > { %7445 = vmatprep.subr.bf16.mxu1 %v2834_v59  ;;  %v3094_v59 = vsel %vm3092_vm8, 4294967295, %v8503_v39  ;;  %vm3505_vm8 = vcmask 39936  }
 0xd30   : > { %v2810_v62 = vpop.permute.xlu0 %2809  ;;  %v2840_v63 = vpop.permute.xlu1 %2839  ;;  %v3095_v60 = vsel %vm3093_vm5, %v3094_v59, 0  ;;  %vm3085_vm5 = vcmask 121856  }
 0xd31   : > { %7832 = vmatprep.subr.bf16.mxu0 %v2840_v63 }
 0xd32   : > { %7446 = vmatpush3.bf16.msra.mxu1 %v2810_v62  ;;  %7833 = vmatpush3.bf16.msra.mxu0 %v2840_v63  ;;  %v3097_v63 = vand.u32 %v8231_v58, %v3095_v60 }
 0xd33   : > { %7447 = vmatprep.subr.bf16.mxu1 %v2836_v61 }
 0xd34   : > { %v2812_v3 = vpop.permute.xlu0 %2811 }
 0xd36   : > { %7448 = vmatpush3.bf16.msra.mxu1 %v2812_v3 }
 0xd38   : > { %v2842_v9 = vpop.permute.xlu0 %2841 }
 0xd39   : > { %2947 = vmatmul.mubr.bf16.vlgmr.msra.gmra.mrb[20].mxu1 %v8223_v7  ;;  %7834 = vmatprep.subr.bf16.mxu0 %v2842_v9 }
 0xd3a   : > { %7835 = vmatpush3.bf16.msra.mxu0 %v2842_v9  ;;  %2954 = vmatprep.mubr.bf16.mxu1 %v8228_v8 }
 0xd3b   : > { %7840 = vmatprep.subr.bf16.mxu0 %v3097_v63 }
 0xd3d   : > { %7837 = vmatmul.mubr.msk.bf16.vlgmr.msra.gmra.mrb[24].mxu0 %vm2907_vm3, %v8227_v11 }
 0xd3e   : > { %7841 = vmatpush3.bf16.msra.mxu0 %v3097_v63 }
 0xd41   : > { %2955 = vmatmul.mubr.bf16.gmra.mrb[24].mxu1 %v8230_v13  ;;  %v2860_v17 = vpop.permute.xlu1 %2859 }
 0xd45   : > { %v2870_v41 = vpop.permute.xlu1 %2869 }
 0xd49   : > { %v2865_v26 = vpop.permute.xlu0 %2864 }
 0xd4d   : > { %v2875_v47 = vpop.permute.xlu0 %2874 }
 0xe0c   : > { %v7449_v14 = vpop.f32.mrb[20].mxu1 }
 0xe0d   : > { %v7450_v15 = vpop.f32.mrb[21].mxu1 }
 0xe0e   : > { %v7451_v18 = vadd.f32 %v7450_v15, %v7449_v14  ;;  %v7452_v19 = vpop.f32.mrb[22].mxu1 }
 0xe0f   : > { %v7453_v21 = vpop.f32.mrb[23].mxu1 }
 0xe10   : > { %v7454_v22 = vadd.f32 %v7453_v21, %v7452_v19  ;;  %v7838_v23 = vpop.f32.mrb[24].mxu0  ;;  %v2949_v24 = vadd.f32 %v7451_v18, %v2860_v17 }
 0xe11   : > { %v2997_v27 = vpop.f32.mrb[25].mxu0 }
 0xe12   : > { %v2998_v28 = vadd.f32 %v2997_v27, %v2949_v24  ;;  %v7839_v29 = vpop.f32.mrb[26].mxu0  ;;  %v2952_v30 = vadd.f32 %v7454_v22, %v2865_v26 }
 0xe13   : > { %v3000_v31 = vpop.f32.mrb[27].mxu0 }
 0xe14   : > { %v3001_v32 = vadd.f32 %v3000_v31, %v2952_v30  ;;  %v7455_v33 = vpop.f32.mrb[24].mxu1  ;;  %v9193_v35 = vmax.f32 %v2998_v28, 0.0 }
 0xe15   : > { %v7456_v34 = vpop.f32.mrb[25].mxu1 }
 0xe16   : > { %v9195_v36 = vmax.f32 %v3001_v32, 0.0  ;;  %v7457_v37 = vadd.f32 %v7456_v34, %v7455_v33  ;;  %v7458_v38 = vpop.f32.mrb[26].mxu1 }
 0xe17   : > { %v7459_v42 = vpop.f32.mrb[27].mxu1 }
 0xe18   : > { %v8125_v44 = vpack.i.bf16 %v9195_v36, %v9193_v35  ;;  %v2957_v45 = vadd.f32 %v7457_v37, %v2870_v41  ;;  %v7460_v46 = vadd.f32 %v7459_v42, %v7458_v38  ;;  %v8234_v37 = vld [vmem:[%s10328_s11 + $0x4] ss:$12 sps:$4 sm:$0xff]   ;;  %v8235_v38 = vld [vmem:[%s10328_s11 + $0x8] ss:$12 sps:$4 sm:$0xff]  }
 0xe19   : > { %3369 = vmatprep.mubr.bf16.mxu1 %v8234_v37  ;;  %v3218_v41 = vld [vmem:[%s10329_s0 + $0x8] sm:$0xff]  ;;  %v3217_v42 = vld [vmem:[%s10329_s0] sm:$0xff] }
 0xe1a   : > { %v3006_v48 = vadd.f32 %v7838_v23, %v2957_v45  ;;  %v2960_v49 = vadd.f32 %v7460_v46, %v2875_v47  ;;  %8126 = vrot.lane.b32.xlu1 %v8125_v44, %s10245_s1  ;;  %v3220_v44 = vld [vmem:[%s10329_s0 + $0x18] sm:$0xff]  ;;  %v3219_v45 = vld [vmem:[%s10329_s0 + $0x10] sm:$0xff]  ;;  %v3222_v46 = vld [vmem:[%s10329_s0 + $0x28] sm:$0xff] }
 0xe1b   : > { %v3221_v47 = vld [vmem:[%s10329_s0 + $0x20] sm:$0xff] }
 0xe1c   : > { %v3009_v50 = vadd.f32 %v7839_v29, %v2960_v49  ;;  %v9200_v51 = vmax.f32 %v3006_v48, 0.0  ;;  %v3224_v48 = vld [vmem:[%s10329_s0 + $0x38] sm:$0xff]  ;;  %v3223_v49 = vld [vmem:[%s10329_s0 + $0x30] sm:$0xff]  ;;  %s10333_s0 = smov 124  }
 0xe1e   : > { %v9202_v52 = vmax.f32 %v3009_v50, 0.0 }
 0xe20   : > { %v8130_v53 = vpack.i.bf16 %v9202_v52, %v9200_v51 }
 0xe22   : > { %8131 = vrot.lane.b32.xlu0 %v8130_v53, %s10245_s1 }
 0xe8c   : > { %v8127_v54 = vpop.permute.xlu1 %8126 }
 0xe8d   : > { %v8129_v55 = vunpack.i.h.bf16 %v8127_v54  ;;  %v8128_v56 = vunpack.i.l.bf16 %v8127_v54 }
 0xe8f   : > { %v3053_v61 = vmax.f32 %v9195_v36, %v8129_v55  ;;  %v3052_v62 = vmax.f32 %v9193_v35, %v8128_v56 }
 0xe91   : > { %v8135_v3 = vpack.i.bf16 %v3053_v61, %v3052_v62 }
 0xe93   : > { %8136 = vrot.lane.b32.xlu1 %v8135_v3, %s10247_s15 }
 0xe94   : > { %v8132_v7 = vpop.permute.xlu0 %8131 }
 0xe95   : > { %v8134_v8 = vunpack.i.h.bf16 %v8132_v7  ;;  %v8133_v9 = vunpack.i.l.bf16 %v8132_v7 }
 0xe97   : > { %v3055_v11 = vmax.f32 %v9202_v52, %v8134_v8  ;;  %v3054_v13 = vmax.f32 %v9200_v51, %v8133_v9 }
 0xe99   : > { %v8140_v14 = vpack.i.bf16 %v3055_v11, %v3054_v13 }
 0xe9b   : > { %8141 = vrot.lane.b32.xlu0 %v8140_v14, %s10247_s15  ;;  %v8237_v14 = vld [vmem:[%s10328_s11 + $0x1c] ss:$12 sps:$4 sm:$0xff]  }
 0xf05   : > { %v8137_v39 = vpop.permute.xlu1 %8136 }
 0xf06   : > { %v8139_v15 = vunpack.i.h.bf16 %v8137_v39  ;;  %v8138_v18 = vunpack.i.l.bf16 %v8137_v39  ;;  %v8236_v39 = vld [vmem:[%s10328_s11 + $0x20] ss:$12 sps:$4 sm:$0xff]  }
 0xf08   : > { %v3073_v19 = vmax.f32 %v3053_v61, %v8139_v15  ;;  %v3072_v17 = vmax.f32 %v3052_v62, %v8138_v18  ;;  %v8243_v15 = vld [vmem:[%s10328_s11 + $0x38] ss:$12 sps:$4 sm:$0xff]  }
 0xf09   : > { %v8239_v18 = vld [vmem:[%s10328_s11 + $0x18] ss:$12 sps:$4 sm:$0xff]  }
 0xf0a   : > { %v3076_v21 = vpack.c.bf16 %v3073_v19, %v3072_v17  ;;  %v8240_v19 = vld [vmem:[%s10328_s11 + $0x34] ss:$12 sps:$4 sm:$0xff]   ;;  %v8244_v17 = vld [vmem:[%s10328_s11 + $0x50] ss:$12 sps:$4 sm:$0xff]  }
 0xf0c   : > { %7842 = vmatprep.mubr.msk.bf16.mxu0 %vm3085_vm5, %v3076_v21  ;;  %v8242_v21 = vld [vmem:[%s10328_s11 + $0x30] ss:$12 sps:$4 sm:$0xff]  }
 0xf0d   : > { %v8142_v22 = vpop.permute.xlu0 %8141 }
 0xf0e   : > { %v8144_v23 = vunpack.i.h.bf16 %v8142_v22  ;;  %v8143_v24 = vunpack.i.l.bf16 %v8142_v22  ;;  %v8245_v22 = vld [vmem:[%s10328_s11 + $0x4c] ss:$12 sps:$4 sm:$0xff]  }
 0xf10   : > { %v3075_v26 = vmax.f32 %v3055_v11, %v8144_v23  ;;  %v3074_v27 = vmax.f32 %v3054_v13, %v8143_v24  ;;  %v8232_v11 = vld [vmem:[%s10328_s11] ss:$12 sps:$4 sm:$0xff]   ;;  %v8247_v23 = vld [vmem:[%s10328_s11 + $0x48] ss:$12 sps:$4 sm:$0xff]  }
 0xf12   : > { %v3077_v28 = vpack.c.bf16 %v3075_v26, %v3074_v27 }
 0xf14   : > { %7843 = vmatmul.mubr.msk.bf16.vlgmr.msra.gmra.mrb[28].mxu0 %vm3085_vm5, %v3077_v28  ;;  %vm3794_vm5 = vcmask 523264  }
 0xf15   : > { %7850 = vmatprep.mubr.msk.bf16.mxu0 %vm2907_vm3, %v8235_v38 }
 0xfe7   : > { %v7844_v29 = vpop.f32.mrb[28].mxu0 }
 0xfe8   : > { %v3133_v30 = vpop.f32.mrb[29].mxu0 }
 0xfe9   : > { %v7845_v31 = vpop.f32.mrb[30].mxu0 }
 0xfea   : > { %v3149_v32 = vpack.c.bf16 %v7845_v31, %v7844_v29  ;;  %v3136_v33 = vpop.f32.mrb[31].mxu0 }
 0xfeb   : > { %v3148_v34 = vpack.c.bf16 %v3136_v33, %v3133_v30 }
 0xfec   : > { %3173 = vrot.lane.b32.xlu0 %v3149_v32, %s10243_s9 }
 0xfed   : > { %3171 = vrot.lane.b32.xlu1 %v3148_v34, %s10243_s9  ;;  %s10251_s9 = smov 124  }
 0xff0   : > { %3153 = vrot.lane.b32.xlu0 %v3148_v34, %s10245_s1 }
 0xff1   : > { %3177 = vrot.lane.b32.xlu1 %v3148_v34, %s10247_s15 }
 0xff4   : > { %3155 = vrot.lane.b32.xlu0 %v3149_v32, %s10245_s1  ;;  %s10249_s1 = smov 119  }
 0xff5   : > { %3179 = vrot.lane.b32.xlu1 %v3149_v32, %s10247_s15  ;;  %s10330_s15 = smov 118  }
 0xff8   : > { %3159 = vrot.lane.b32.xlu0 %v3148_v34, %s10259_s2 }
 0xff9   : > { %3183 = vrot.lane.b32.xlu1 %v3148_v34, %s10256_s26 }
 0xffc   : > { %3161 = vrot.lane.b32.xlu0 %v3149_v32, %s10259_s2 }
 0xffd   : > { %3185 = vrot.lane.b32.xlu1 %v3149_v32, %s10256_s26 }
0x1000   : > { %3165 = vrot.lane.b32.xlu0 %v3148_v34, %s10251_s9 }
0x1001   : > { %3189 = vrot.lane.b32.xlu1 %v3148_v34, %s10249_s1 }
0x1004   : > { %3167 = vrot.lane.b32.xlu0 %v3149_v32, %s10251_s9  ;;  %s10332_s9 = smov 123  }
0x1005   : > { %3191 = vrot.lane.b32.xlu1 %v3149_v32, %s10249_s1  ;;  %s10331_s1 = sld [smem:[#allocation9_spill]] }
0x1008   : > { %3197 = vrot.lane.b32.xlu0 %v3149_v32, %s10330_s15 }
0x1009   : > { %3195 = vrot.lane.b32.xlu1 %v3148_v34, %s10330_s15 }
0x100c   : > { %3232 = vperm.xlu0 %8103, %v3218_v41  }
0x100d   : > { %3227 = vperm.xlu1 %8104, %v3217_v42  }
0x1010   : > { %3242 = vperm.xlu0 %8103, %v3220_v44  }
0x1011   : > { %3237 = vperm.xlu1 %8104, %v3219_v45  }
0x1014   : > { %3252 = vperm.xlu0 %8103, %v3222_v46  }
0x1015   : > { %3247 = vperm.xlu1 %8104, %v3221_v47  }
0x1018   : > { %3262 = vperm.xlu0 %8103, %v3224_v48   ;;  %v9256_v48 = vld [vmem:[%s10331_s1] ss:$0 sm:$0xff]  ;;  %s10254_s1 = smov 5  }
0x1019   : > { %3257 = vperm.xlu1 %8104, %v3223_v49  }
0x105e   : > { %v3174_v50 = vpop.permute.xlu0 %3173 }
0x105f   : > { %v3172_v53 = vpop.permute.xlu1 %3171 }
0x1060   : > { %7468 = vmatprep.subr.bf16.mxu1 %v3172_v53 }
0x1061   : > { %7469 = vmatpush3.bf16.msra.mxu1 %v3148_v34 }
0x1062   : > { %v3154_v54 = vpop.permute.xlu0 %3153  ;;  %7470 = vmatprep.subr.bf16.mxu1 %v3174_v50 }
0x1063   : > { %v3178_v55 = vpop.permute.xlu1 %3177 }
0x1065   : > { %7471 = vmatpush3.bf16.msra.mxu1 %v3149_v32 }
0x1066   : > { %v3156_v56 = vpop.permute.xlu0 %3155  ;;  %7472 = vmatprep.subr.bf16.mxu1 %v3178_v55 }
0x1067   : > { %v3180_v58 = vpop.permute.xlu1 %3179 }
0x1069   : > { %7473 = vmatpush3.bf16.msra.mxu1 %v3154_v54 }
0x106a   : > { %v3160_v59 = vpop.permute.xlu0 %3159  ;;  %7474 = vmatprep.subr.bf16.mxu1 %v3180_v58 }
0x106b   : > { %v3184_v60 = vpop.permute.xlu1 %3183 }
0x106d   : > { %7475 = vmatpush3.bf16.msra.mxu1 %v3156_v56 }
0x106e   : > { %v3162_v61 = vpop.permute.xlu0 %3161  ;;  %7476 = vmatprep.subr.bf16.mxu1 %v3184_v60 }
0x106f   : > { %v3186_v62 = vpop.permute.xlu1 %3185 }
0x1071   : > { %7477 = vmatpush3.bf16.msra.mxu1 %v3160_v59 }
0x1072   : > { %v3166_v63 = vpop.permute.xlu0 %3165  ;;  %7478 = vmatprep.subr.bf16.mxu1 %v3186_v62 }
0x1073   : > { %v3190_v3 = vpop.permute.xlu1 %3189 }
0x1075   : > { %7479 = vmatpush3.bf16.msra.mxu1 %v3162_v61 }
0x1076   : > { %7480 = vmatprep.subr.bf16.mxu1 %v3190_v3  ;;  %v3168_v7 = vpop.permute.xlu0 %3167 }
0x1077   : > { %v3192_v8 = vpop.permute.xlu1 %3191 }
0x1079   : > { %7481 = vmatpush3.bf16.msra.mxu1 %v3166_v63 }
0x107a   : > { %7482 = vmatprep.subr.bf16.mxu1 %v3192_v8  ;;  %v3198_v13 = vpop.permute.xlu0 %3197 }
0x107b   : > { %v3196_v9 = vpop.permute.xlu1 %3195 }
0x107c   : > { %7846 = vmatprep.subr.bf16.mxu0 %v3196_v9 }
0x107d   : > { %7483 = vmatpush3.bf16.msra.mxu1 %v3168_v7  ;;  %7847 = vmatpush3.bf16.msra.mxu0 %v3196_v9 }
0x107e   : > { %7848 = vmatprep.subr.bf16.mxu0 %v3198_v13 }
0x1080   : > { %3370 = vmatmul.mubr.bf16.vlgmr.msra.gmra.mrb[28].mxu1 %v8232_v11 }
0x1081   : > { %7849 = vmatpush3.bf16.msra.mxu0 %v3198_v13  ;;  %3377 = vmatprep.mubr.bf16.mxu1 %v8237_v14 }
0x1084   : > { %7851 = vmatmul.mubr.msk.bf16.vlgmr.msra.gmra.mrb[32].mxu0 %vm2907_vm3, %v8236_v39 }
0x1085   : > { %7854 = vmatprep.mubr.msk.bf16.mxu0 %vm2907_vm3, %v8243_v15 }
0x1088   : > { %3378 = vmatmul.mubr.bf16.gmra.mrb[32].mxu1 %v8239_v18 }
0x1089   : > { %3385 = vmatprep.mubr.bf16.mxu1 %v8240_v19 }
0x108b   : > { %v3233_v34 = vpop.permute.xlu0 %3232 }
0x108c   : > { %7855 = vmatmul.mubr.msk.bf16.gmra.mrb[36].mxu0 %vm2907_vm3, %v8244_v17  ;;  %v3228_v29 = vpop.permute.xlu1 %3227 }
0x108f   : > { %v3243_v63 = vpop.permute.xlu0 %3242 }
0x1090   : > { %3386 = vmatmul.mubr.bf16.gmra.mrb[36].mxu1 %v8242_v21  ;;  %v3238_v55 = vpop.permute.xlu1 %3237 }
0x1091   : > { %3393 = vmatprep.mubr.bf16.mxu1 %v8245_v22 }
0x1094   : > { %v3248_v22 = vpop.permute.xlu1 %3247 }
0x1098   : > { %3394 = vmatmul.mubr.bf16.gmra.mrb[40].mxu1 %v8247_v23 }
0x1153   : > { %v7484_v24 = vpop.f32.mrb[28].mxu1 }
0x1154   : > { %v7485_v26 = vpop.f32.mrb[29].mxu1 }
0x1155   : > { %v7486_v27 = vadd.f32 %v7485_v26, %v7484_v24  ;;  %v7487_v28 = vpop.f32.mrb[30].mxu1 }
0x1156   : > { %v7488_v30 = vpop.f32.mrb[31].mxu1 }
0x1157   : > { %v7489_v31 = vadd.f32 %v7488_v30, %v7487_v28  ;;  %v7852_v32 = vpop.f32.mrb[32].mxu0  ;;  %v3372_v33 = vadd.f32 %v7486_v27, %v3228_v29  ;;  %v3253_v29 = vpop.permute.xlu0 %3252 }
0x1158   : > { %v3436_v37 = vpop.f32.mrb[33].mxu0 }
0x1159   : > { %v3437_v38 = vadd.f32 %v3436_v37, %v3372_v33  ;;  %v7853_v41 = vpop.f32.mrb[34].mxu0  ;;  %v3375_v42 = vadd.f32 %v7489_v31, %v3233_v34 }
0x115a   : > { %v3439_v44 = vpop.f32.mrb[35].mxu0 }
0x115b   : > { %v3467_v45 = vmax.f32 %v3437_v38, 0.0  ;;  %v3440_v46 = vadd.f32 %v3439_v44, %v3375_v42  ;;  %v7490_v47 = vpop.f32.mrb[32].mxu1 }
0x115c   : > { %v7491_v49 = vpop.f32.mrb[33].mxu1 }
0x115d   : > { %v3468_v50 = vmax.f32 %v3440_v46, 0.0  ;;  %v7492_v53 = vadd.f32 %v7491_v49, %v7490_v47  ;;  %v7493_v54 = vpop.f32.mrb[34].mxu1  ;;  %v3481_v58 = vmul.f32 %v9256_v48, %v3467_v45  ;;  %v3258_v45 = vpop.permute.xlu1 %3257 }
0x115e   : > { %v7494_v56 = vpop.f32.mrb[35].mxu1 }
0x115f   : > { %v3482_v59 = vmul.f32 %v9256_v48, %v3468_v50  ;;  %v3380_v60 = vadd.f32 %v7492_v53, %v3238_v55  ;;  %v7495_v61 = vadd.f32 %v7494_v56, %v7493_v54  ;;  %v7856_v62 = vpop.f32.mrb[36].mxu0  ;;  %v3263_v54 = vpop.permute.xlu0 %3262 }
0x1160   : > { %v3452_v3 = vpop.f32.mrb[37].mxu0 }
0x1161   : > { %v3489_v7 = vpack.c.bf16 %v3482_v59, %v3481_v58  ;;  %v3445_v8 = vadd.f32 %v7852_v32, %v3380_v60  ;;  %v3383_v9 = vadd.f32 %v7495_v61, %v3243_v63  ;;  %v7857_v11 = vpop.f32.mrb[38].mxu0 }
0x1162   : > { %v3455_v13 = vpop.f32.mrb[39].mxu0 }
0x1163   : > { %v3469_v14 = vmax.f32 %v3445_v8, 0.0  ;;  %v3448_v39 = vadd.f32 %v7853_v41, %v3383_v9  ;;  %v7496_v15 = vpop.f32.mrb[36].mxu1  ;;  %3497 = vrot.lane.b32.xlu1 %v3489_v7, %s10254_s1 }
0x1164   : > { %v7497_v18 = vpop.f32.mrb[37].mxu1 }
0x1165   : > { %v3470_v19 = vmax.f32 %v3448_v39, 0.0  ;;  %v7498_v17 = vadd.f32 %v7497_v18, %v7496_v15  ;;  %v7499_v21 = vpop.f32.mrb[38].mxu1  ;;  %v3483_v24 = vmul.f32 %v9256_v48, %v3469_v14 }
0x1166   : > { %v7500_v23 = vpop.f32.mrb[39].mxu1 }
0x1167   : > { %v3484_v26 = vmul.f32 %v9256_v48, %v3470_v19  ;;  %v7501_v27 = vadd.f32 %v7500_v23, %v7499_v21  ;;  %v3388_v28 = vadd.f32 %v7498_v17, %v3248_v22 }
0x1169   : > { %v3453_v30 = vadd.f32 %v3452_v3, %v3388_v28  ;;  %v3391_v31 = vadd.f32 %v7501_v27, %v3253_v29  ;;  %v3490_v32 = vpack.c.bf16 %v3484_v26, %v3483_v24 }
0x116b   : > { %v3471_v33 = vmax.f32 %v3453_v30, 0.0  ;;  %v3456_v34 = vadd.f32 %v3455_v13, %v3391_v31  ;;  %v7502_v37 = vpop.f32.mrb[40].mxu1  ;;  %3499 = vrot.lane.b32.xlu0 %v3490_v32, %s10254_s1 }
0x116c   : > { %v7503_v38 = vpop.f32.mrb[41].mxu1 }
0x116d   : > { %v3472_v41 = vmax.f32 %v3456_v34, 0.0  ;;  %v7504_v42 = vadd.f32 %v7503_v38, %v7502_v37  ;;  %v7505_v44 = vpop.f32.mrb[42].mxu1  ;;  %v3485_v47 = vmul.f32 %v9256_v48, %v3471_v33 }
0x116e   : > { %v7506_v46 = vpop.f32.mrb[43].mxu1 }
0x116f   : > { %v3486_v49 = vmul.f32 %v9256_v48, %v3472_v41  ;;  %v3396_v50 = vadd.f32 %v7504_v42, %v3258_v45  ;;  %v7507_v53 = vadd.f32 %v7506_v46, %v7505_v44 }
0x1171   : > { %v3491_v55 = vpack.c.bf16 %v3486_v49, %v3485_v47  ;;  %v3461_v56 = vadd.f32 %v7856_v62, %v3396_v50  ;;  %v3399_v58 = vadd.f32 %v7507_v53, %v3263_v54 }
0x1173   : > { %v3473_v59 = vmax.f32 %v3461_v56, 0.0  ;;  %v3464_v60 = vadd.f32 %v7857_v11, %v3399_v58  ;;  %3501 = vrot.lane.b32.xlu1 %v3491_v55, %s10254_s1 }
0x1175   : > { %v3474_v61 = vmax.f32 %v3464_v60, 0.0  ;;  %v3487_v63 = vmul.f32 %v9256_v48, %v3473_v59 }
0x1177   : > { %v3488_v3 = vmul.f32 %v9256_v48, %v3474_v61 }
0x1179   : > { %v3492_v7 = vpack.c.bf16 %v3488_v3, %v3487_v63 }
0x117b   : > { %3503 = vrot.lane.b32.xlu0 %v3492_v7, %s10254_s1  ;;  %s10334_s1 = smov 127  }
0x11d5   : > { %v3498_v8 = vpop.permute.xlu1 %3497 }
0x11d6   : > { %v3507_v9 = vsel %vm3505_vm8, 0, %v3498_v8 }
0x11d7   : > { %v9272_v13 = vsel %vm2212_vm2, %v3507_v9, 0 }
0x11d8   : > { %3586 = vrot.lane.b32.xlu0 %v9272_v13, %s10256_s26  ;;  %3538 = vrot.lane.b32.xlu1 %v9272_v13, %s10259_s2  ;;  %s10335_s26 = sld [smem:[#allocation7_spill]] }
0x11dc   : > { %3562 = vrot.lane.b32.xlu0 %v9272_v13, %s10332_s9  ;;  %3550 = vrot.lane.b32.xlu1 %v9272_v13, %s10333_s0 }
0x11dd   : > { %v3500_v62 = vpop.permute.xlu0 %3499 }
0x11de   : > { %v3509_v11 = vsel %vm3505_vm8, 0, %v3500_v62  ;;  %v8250_v22 = vld [vmem:[%s10335_s26 + $0x4] ss:$20 sps:$4 sm:$0xff]   ;;  %v8259_v23 = vld [vmem:[%s10335_s26 + $0xc] ss:$20 sps:$4 sm:$0xff]  }
0x11df   : > { %v9284_v14 = vsel %vm2212_vm2, %v3509_v11, 0  ;;  %3839 = vmatprep.mubr.bf16.mxu0 %v8250_v22  ;;  %3904 = vmatprep.mubr.bf16.mxu1 %v8259_v23  ;;  %v8248_v63 = vld [vmem:[%s10335_s26] ss:$20 sps:$4 sm:$0xff]   ;;  %v8253_v62 = vld [vmem:[%s10335_s26 + $0x28] ss:$20 sps:$4 sm:$0xff]  }
0x11e0   : > { %3540 = vrot.lane.b32.xlu0 %v9284_v14, %s10259_s2  ;;  %3526 = vrot.lane.b32.xlu1 %v9272_v13, %s10334_s1  ;;  %v8251_v3 = vld [vmem:[%s10335_s26 + $0x2c] ss:$20 sps:$4 sm:$0xff]   ;;  %v8254_v11 = vld [vmem:[%s10335_s26 + $0x54] ss:$20 sps:$4 sm:$0xff]  }
0x11e1   : > { %v8257_v22 = vld [vmem:[%s10335_s26 + $0x8] ss:$20 sps:$4 sm:$0xff]  }
0x11e2   : > { %v8263_v23 = vld [vmem:[%s10335_s26 + $0x34] ss:$20 sps:$4 sm:$0xff]  }
0x11e4   : > { %3588 = vrot.lane.b32.xlu0 %v9284_v14, %s10336_s3  ;;  %3552 = vrot.lane.b32.xlu1 %v9284_v14, %s10333_s0 }
0x11e5   : > { %v3502_v39 = vpop.permute.xlu1 %3501 }
0x11e6   : > { %v3511_v15 = vsel %vm3505_vm8, 0, %v3502_v39 }
0x11e7   : > { %v9296_v18 = vsel %vm2212_vm2, %v3511_v15, 0 }
0x11e8   : > { %3542 = vrot.lane.b32.xlu1 %v9296_v18, %s10259_s2 }
0x11ec   : > { %3528 = vrot.lane.b32.xlu1 %v9284_v14, %s10334_s1 }
0x11ed   : > { %v3504_v19 = vpop.permute.xlu0 %3503 }
0x11ee   : > { %v3513_v17 = vsel %vm3505_vm8, 0, %v3504_v19  ;;  %v8256_v19 = vld [vmem:[%s10335_s26 + $0x50] ss:$20 sps:$4 sm:$0xff]  }
0x11ef   : > { %v9304_v21 = vsel %vm2212_vm2, %v3513_v17, 0  ;;  %v8260_v17 = vld [vmem:[%s10335_s26 + $0x7c] ss:$20 sps:$4 sm:$0xff]  }
0x11f0   : > { %3544 = vrot.lane.b32.xlu0 %v9304_v21, %s10259_s2  ;;  %3554 = vrot.lane.b32.xlu1 %v9296_v18, %s10333_s0  ;;  %s10337_s2 = sld [smem:[#allocation5_spill]] }
0x11f4   : > { %3564 = vrot.lane.b32.xlu0 %v9284_v14, %s10332_s9  ;;  %3530 = vrot.lane.b32.xlu1 %v9296_v18, %s10334_s1 }
0x11f6   : > { %v3646_v24 = vld [vmem:[%s10337_s2] sm:$0xff]  ;;  %v3648_v26 = vld [vmem:[%s10337_s2 + $0x10] sm:$0xff]  ;;  %v3647_v27 = vld [vmem:[%s10337_s2 + $0x8] sm:$0xff] }
0x11f7   : > { %v3650_v28 = vld [vmem:[%s10337_s2 + $0x20] sm:$0xff]  ;;  %v3649_v29 = vld [vmem:[%s10337_s2 + $0x18] sm:$0xff]  ;;  %v3652_v30 = vld [vmem:[%s10337_s2 + $0x30] sm:$0xff] }
0x11f8   : > { %3590 = vrot.lane.b32.xlu0 %v9296_v18, %s10336_s3  ;;  %3556 = vrot.lane.b32.xlu1 %v9304_v21, %s10333_s0  ;;  %s10339_s0 = smov 122   ;;  %v3651_v31 = vld [vmem:[%s10337_s2 + $0x28] sm:$0xff]  ;;  %v3653_v32 = vld [vmem:[%s10337_s2 + $0x38] sm:$0xff]  ;;  %s8521_s2 = smov 16  }
0x11fc   : > { %3566 = vrot.lane.b32.xlu0 %v9296_v18, %s10332_s9  ;;  %3532 = vrot.lane.b32.xlu1 %v9304_v21, %s10334_s1 }
0x1200   : > { %3592 = vrot.lane.b32.xlu0 %v9304_v21, %s10336_s3  ;;  %3598 = vrot.lane.b32.xlu1 %v9272_v13, %s10338_s4 }
0x1204   : > { %3568 = vrot.lane.b32.xlu0 %v9304_v21, %s10332_s9  ;;  %3600 = vrot.lane.b32.xlu1 %v9284_v14, %s10338_s4  ;;  %s10341_s9 = sld [smem:[#allocation33_spill]] }
0x1208   : > { %3574 = vrot.lane.b32.xlu0 %v9272_v13, %s10339_s0  ;;  %3602 = vrot.lane.b32.xlu1 %v9296_v18, %s10338_s4 }
0x120c   : > { %3576 = vrot.lane.b32.xlu0 %v9284_v14, %s10339_s0  ;;  %3604 = vrot.lane.b32.xlu1 %v9304_v21, %s10338_s4  ;;  %s10340_s4 = smov 5  }
0x1210   : > { %3578 = vrot.lane.b32.xlu0 %v9296_v18, %s10339_s0  ;;  %3610 = vrot.lane.b32.xlu1 %v9272_v13, %s10330_s15 }
0x1214   : > { %3580 = vrot.lane.b32.xlu0 %v9304_v21, %s10339_s0  ;;  %3614 = vrot.lane.b32.xlu1 %v9296_v18, %s10330_s15 }
0x1218   : > { %3612 = vrot.lane.b32.xlu0 %v9284_v14, %s10330_s15  ;;  %3656 = vperm.xlu1 %8104, %v3646_v24  }
0x121c   : > { %3616 = vrot.lane.b32.xlu0 %v9304_v21, %s10330_s15  ;;  %3666 = vperm.xlu1 %8104, %v3648_v26   ;;  %v8262_v26 = vld [vmem:[%s10335_s26 + $0x78] ss:$20 sps:$4 sm:$0xff]  }
0x1220   : > { %3661 = vperm.xlu0 %8103, %v3647_v27   ;;  %3676 = vperm.xlu1 %8104, %v3650_v28   ;;  %v8266_v28 = vld [vmem:[%s10335_s26 + $0x10] ss:$20 sps:$4 sm:$0xff]  }
0x1224   : > { %3671 = vperm.xlu0 %8103, %v3649_v29   ;;  %3686 = vperm.xlu1 %8104, %v3652_v30   ;;  %v8265_v29 = vld [vmem:[%s10335_s26 + $0x30] ss:$20 sps:$4 sm:$0xff]  }
0x1225   : > { %v8268_v30 = vld [vmem:[%s10335_s26 + $0x5c] ss:$20 sps:$4 sm:$0xff]  }
0x1228   : > { %3681 = vperm.xlu0 %8103, %v3651_v31  }
0x122c   : > { %3691 = vperm.xlu0 %8103, %v3653_v32   ;;  %v8267_v32 = vld [vmem:[%s10335_s26 + $0x38] ss:$20 sps:$4 sm:$0xff]  }
0x124a   : > { %v3587_v33 = vpop.permute.xlu0 %3586  ;;  %v3539_v34 = vpop.permute.xlu1 %3538 }
0x124b   : > { %7514 = vmatprep.subr.bf16.mxu0 %v3539_v34  ;;  %7554 = vmatprep.subr.bf16.mxu1 %v3587_v33  ;;  %v8271_v33 = vld [vmem:[%s10335_s26 + $0x60] ss:$20 sps:$4 sm:$0xff]   ;;  %v8270_v34 = vld [vmem:[%s10335_s26 + $0x58] ss:$20 sps:$4 sm:$0xff]  }
0x124c   : > { %7515 = vmatpush3.bf16.msra.mxu0 %v9272_v13 }
0x124e   : > { %v3563_v37 = vpop.permute.xlu0 %3562  ;;  %v3551_v38 = vpop.permute.xlu1 %3550 }
0x124f   : > { %7555 = vmatpush3.bf16.msra.mxu1 %v3563_v37  ;;  %v8273_v37 = vld [vmem:[%s10335_s26 + $0x84] ss:$20 sps:$4 sm:$0xff]  }
0x1252   : > { %v3541_v41 = vpop.permute.xlu0 %3540  ;;  %v3527_v42 = vpop.permute.xlu1 %3526 }
0x1253   : > { %7516 = vmatprep.subr.bf16.mxu0 %v3541_v41  ;;  %v8275_v41 = vld [vmem:[%s10335_s26 + $0x80] ss:$20 sps:$4 sm:$0xff]  }
0x1254   : > { %7517 = vmatpush3.bf16.msra.mxu0 %v9284_v14 }
0x1256   : > { %v3589_v44 = vpop.permute.xlu0 %3588  ;;  %v3553_v45 = vpop.permute.xlu1 %3552 }
0x1257   : > { %7556 = vmatprep.subr.bf16.mxu1 %v3589_v44 }
0x125a   : > { %v3543_v46 = vpop.permute.xlu1 %3542 }
0x125b   : > { %7518 = vmatprep.subr.bf16.mxu0 %v3543_v46 }
0x125c   : > { %7519 = vmatpush3.bf16.msra.mxu0 %v9296_v18 }
0x125e   : > { %v3529_v47 = vpop.permute.xlu1 %3528 }
0x1262   : > { %v3545_v49 = vpop.permute.xlu0 %3544  ;;  %v3555_v50 = vpop.permute.xlu1 %3554 }
0x1263   : > { %7520 = vmatprep.subr.bf16.mxu0 %v3545_v49 }
0x1264   : > { %7521 = vmatpush3.bf16.msra.mxu0 %v9304_v21 }
0x1265   : > { %7522 = vmatprep.subr.bf16.mxu0 %v3551_v38  ;;  %v8272_v38 = vld [vmem:[%s10335_s26 + $0x88] ss:$20 sps:$4 sm:$0xff]  }
0x1266   : > { %v3565_v53 = vpop.permute.xlu0 %3564  ;;  %v3531_v54 = vpop.permute.xlu1 %3530 }
0x1267   : > { %7557 = vmatpush3.bf16.msra.mxu1 %v3565_v53 }
0x1268   : > { %7523 = vmatpush3.bf16.msra.mxu0 %v3527_v42 }
0x1269   : > { %7524 = vmatprep.subr.bf16.mxu0 %v3553_v45 }
0x126a   : > { %v3591_v55 = vpop.permute.xlu0 %3590  ;;  %v3557_v56 = vpop.permute.xlu1 %3556 }
0x126b   : > { %7558 = vmatprep.subr.bf16.mxu1 %v3591_v55 }
0x126c   : > { %7525 = vmatpush3.bf16.msra.mxu0 %v3529_v47 }
0x126d   : > { %7526 = vmatprep.subr.bf16.mxu0 %v3555_v50 }
0x126e   : > { %v3567_v58 = vpop.permute.xlu0 %3566  ;;  %v3533_v59 = vpop.permute.xlu1 %3532 }
0x126f   : > { %7559 = vmatpush3.bf16.msra.mxu1 %v3567_v58 }
0x1270   : > { %7527 = vmatpush3.bf16.msra.mxu0 %v3531_v54 }
0x1271   : > { %7528 = vmatprep.subr.bf16.mxu0 %v3557_v56 }
0x1272   : > { %v3593_v60 = vpop.permute.xlu0 %3592  ;;  %v3599_v61 = vpop.permute.xlu1 %3598 }
0x1273   : > { %7560 = vmatprep.subr.bf16.mxu1 %v3593_v60 }
0x1274   : > { %7529 = vmatpush3.bf16.msra.mxu0 %v3533_v59 }
0x1276   : > { %v3569_v7 = vpop.permute.xlu0 %3568  ;;  %v3601_v8 = vpop.permute.xlu1 %3600 }
0x1277   : > { %3840 = vmatmul.mubr.bf16.vlgmr.msra.gmra.mrb[40].mxu0 %v8248_v63  ;;  %7561 = vmatpush3.bf16.msra.mxu1 %v3569_v7 }
0x1278   : > { %7562 = vmatprep.subr.bf16.mxu1 %v3599_v61  ;;  %3847 = vmatprep.mubr.bf16.mxu0 %v8251_v3 }
0x127a   : > { %v3575_v9 = vpop.permute.xlu0 %3574  ;;  %v3603_v13 = vpop.permute.xlu1 %3602 }
0x127b   : > { %7563 = vmatpush3.bf16.msra.mxu1 %v3575_v9 }
0x127c   : > { %7564 = vmatprep.subr.bf16.mxu1 %v3601_v8 }
0x127e   : > { %v3577_v14 = vpop.permute.xlu0 %3576  ;;  %v3605_v39 = vpop.permute.xlu1 %3604 }
0x127f   : > { %3848 = vmatmul.mubr.bf16.gmra.mrb[44].mxu0 %v8253_v62  ;;  %7565 = vmatpush3.bf16.msra.mxu1 %v3577_v14 }
0x1280   : > { %7566 = vmatprep.subr.bf16.mxu1 %v3603_v13  ;;  %3855 = vmatprep.mubr.bf16.mxu0 %v8254_v11 }
0x1282   : > { %v3579_v15 = vpop.permute.xlu0 %3578  ;;  %v3611_v18 = vpop.permute.xlu1 %3610 }
0x1283   : > { %7567 = vmatpush3.bf16.msra.mxu1 %v3579_v15  ;;  %7858 = vmatprep.subr.bf16.mxu0 %v3611_v18 }
0x1284   : > { %7568 = vmatprep.subr.bf16.mxu1 %v3605_v39  ;;  %7859 = vmatpush3.bf16.msra.mxu0 %v3611_v18 }
0x1286   : > { %v3581_v21 = vpop.permute.xlu0 %3580  ;;  %v3615_v27 = vpop.permute.xlu1 %3614 }
0x1287   : > { %3856 = vmatmul.mubr.bf16.gmra.mrb[48].mxu0 %v8256_v19  ;;  %7569 = vmatpush3.bf16.msra.mxu1 %v3581_v21 }
0x1288   : > { %3863 = vmatprep.mubr.bf16.mxu0 %v8260_v17 }
0x128a   : > { %v3613_v24 = vpop.permute.xlu0 %3612  ;;  %3905 = vmatmul.mubr.bf16.vlgmr.msra.gmra.mrb[44].mxu1 %v8257_v22 }
0x128b   : > { %7860 = vmatprep.subr.bf16.mxu0 %v3613_v24  ;;  %3912 = vmatprep.mubr.bf16.mxu1 %v8263_v23 }
0x128c   : > { %7861 = vmatpush3.bf16.msra.mxu0 %v3613_v24 }
0x128d   : > { %7862 = vmatprep.subr.bf16.mxu0 %v3615_v27 }
0x128e   : > { %v3617_v31 = vpop.permute.xlu0 %3616 }
0x128f   : > { %3864 = vmatmul.mubr.bf16.gmra.mrb[52].mxu0 %v8262_v26 }
0x1290   : > { %7863 = vmatpush3.bf16.msra.mxu0 %v3615_v27  ;;  %7866 = vmatprep.mubr.msk.bf16.mxu0 %vm3794_vm5, %v8266_v28 }
0x1291   : > { %7864 = vmatprep.subr.bf16.mxu0 %v3617_v31 }
0x1292   : > { %3913 = vmatmul.mubr.bf16.gmra.mrb[48].mxu1 %v8265_v29 }
0x1293   : > { %3920 = vmatprep.mubr.bf16.mxu1 %v8268_v30 }
0x1294   : > { %7865 = vmatpush3.bf16.msra.mxu0 %v3617_v31 }
0x1297   : > { %7867 = vmatmul.mubr.msk.bf16.vlgmr.msra.gmra.mrb[56].mxu0 %vm3794_vm5, %v8267_v32  ;;  %v3657_v8 = vpop.permute.xlu1 %3656 }
0x1298   : > { %7870 = vmatprep.mubr.msk.bf16.mxu0 %vm3794_vm5, %v8271_v33 }
0x129a   : > { %3921 = vmatmul.mubr.bf16.gmra.mrb[52].mxu1 %v8270_v34 }
0x129b   : > { %3928 = vmatprep.mubr.bf16.mxu1 %v8273_v37  ;;  %v3667_v29 = vpop.permute.xlu1 %3666 }
0x129f   : > { %7871 = vmatmul.mubr.msk.bf16.gmra.mrb[60].mxu0 %vm3794_vm5, %v8272_v38  ;;  %v3662_v39 = vpop.permute.xlu0 %3661 }
0x12a2   : > { %3929 = vmatmul.mubr.bf16.gmra.mrb[56].mxu1 %v8275_v41 }
0x12a3   : > { %v3672_v37 = vpop.permute.xlu0 %3671 }
0x134a   : > { %v7530_v42 = vpop.f32.mrb[40].mxu0 }
0x134b   : > { %v7531_v44 = vpop.f32.mrb[41].mxu0 }
0x134c   : > { %v7532_v45 = vadd.f32 %v7531_v44, %v7530_v42  ;;  %v7533_v46 = vpop.f32.mrb[42].mxu0 }
0x134d   : > { %v7534_v47 = vpop.f32.mrb[43].mxu0 }
0x134e   : > { %v7535_v49 = vadd.f32 %v7534_v47, %v7533_v46  ;;  %v3842_v62 = vadd.f32 %v7532_v45, %v3657_v8  ;;  %v3682_v8 = vpop.permute.xlu0 %3681 }
0x1350   : > { %v3845_v18 = vadd.f32 %v7535_v49, %v3662_v39 }
0x1352   : > { %v7536_v50 = vpop.f32.mrb[44].mxu0 }
0x1353   : > { %v7537_v53 = vpop.f32.mrb[45].mxu0 }
0x1354   : > { %v7538_v54 = vadd.f32 %v7537_v53, %v7536_v50  ;;  %v7539_v55 = vpop.f32.mrb[46].mxu0 }
0x1355   : > { %v7540_v56 = vpop.f32.mrb[47].mxu0 }
0x1356   : > { %v7541_v58 = vadd.f32 %v7540_v56, %v7539_v55  ;;  %v3850_v32 = vadd.f32 %v7538_v54, %v3667_v29 }
0x1358   : > { %v3853_v41 = vadd.f32 %v7541_v58, %v3672_v37 }
0x135a   : > { %v7542_v59 = vpop.f32.mrb[48].mxu0 }
0x135b   : > { %v7543_v60 = vpop.f32.mrb[49].mxu0 }
0x135c   : > { %v7544_v61 = vadd.f32 %v7543_v60, %v7542_v59  ;;  %v7545_v63 = vpop.f32.mrb[50].mxu0 }
0x135d   : > { %v7546_v3 = vpop.f32.mrb[51].mxu0  ;;  %v7570_v7 = vpop.f32.mrb[44].mxu1 }
0x135e   : > { %v7547_v9 = vadd.f32 %v7546_v3, %v7545_v63  ;;  %v7571_v13 = vpop.f32.mrb[45].mxu1  ;;  %v3677_v63 = vpop.permute.xlu1 %3676 }
0x135f   : > { %v7572_v11 = vadd.f32 %v7571_v13, %v7570_v7  ;;  %v7573_v14 = vpop.f32.mrb[46].mxu1  ;;  %v3858_v13 = vadd.f32 %v7544_v61, %v3677_v63 }
0x1360   : > { %v7574_v15 = vpop.f32.mrb[47].mxu1 }
0x1361   : > { %v7575_v19 = vadd.f32 %v7574_v15, %v7573_v14  ;;  %v3907_v17 = vadd.f32 %v7572_v11, %v3842_v62  ;;  %v3861_v14 = vadd.f32 %v7547_v9, %v3682_v8 }
0x1362   : > { %v7548_v21 = vpop.f32.mrb[52].mxu0 }
0x1363   : > { %v7549_v22 = vpop.f32.mrb[53].mxu0  ;;  %v3910_v23 = vadd.f32 %v7575_v19, %v3845_v18 }
0x1364   : > { %v7550_v24 = vadd.f32 %v7549_v22, %v7548_v21  ;;  %v7551_v26 = vpop.f32.mrb[54].mxu0 }
0x1365   : > { %v7552_v27 = vpop.f32.mrb[55].mxu0  ;;  %v7576_v28 = vpop.f32.mrb[48].mxu1 }
0x1366   : > { %v7553_v30 = vadd.f32 %v7552_v27, %v7551_v26  ;;  %v7577_v31 = vpop.f32.mrb[49].mxu1 }
0x1367   : > { %v7578_v33 = vadd.f32 %v7577_v31, %v7576_v28  ;;  %v7579_v34 = vpop.f32.mrb[50].mxu1 }
0x1368   : > { %v7580_v38 = vpop.f32.mrb[51].mxu1 }
0x1369   : > { %v7581_v42 = vadd.f32 %v7580_v38, %v7579_v34  ;;  %v3915_v44 = vadd.f32 %v7578_v33, %v3850_v32  ;;  %v3687_v34 = vpop.permute.xlu1 %3686 }
0x136a   : > { %v7868_v45 = vpop.f32.mrb[56].mxu0 }
0x136b   : > { %v3980_v46 = vadd.f32 %v7868_v45, %v3915_v44  ;;  %v3971_v47 = vpop.f32.mrb[57].mxu0  ;;  %v3918_v49 = vadd.f32 %v7581_v42, %v3853_v41  ;;  %v3866_v42 = vadd.f32 %v7550_v24, %v3687_v34 }
0x136c   : > { %v3972_v50 = vadd.f32 %v3971_v47, %v3907_v17  ;;  %v7869_v53 = vpop.f32.mrb[58].mxu0 }
0x136d   : > { %v4004_v55 = vmax.f32 %v3980_v46, 0.0  ;;  %v3983_v56 = vadd.f32 %v7869_v53, %v3918_v49  ;;  %v7582_v59 = vpop.f32.mrb[52].mxu1  ;;  %v3974_v60 = vpop.f32.mrb[59].mxu0 }
0x136e   : > { %v4002_v3 = vmax.f32 %v3972_v50, 0.0  ;;  %v3975_v54 = vadd.f32 %v3974_v60, %v3910_v23  ;;  %v7583_v7 = vpop.f32.mrb[53].mxu1  ;;  %v3692_v46 = vpop.permute.xlu0 %3691  ;;  %v8276_v60 = vld [vmem:[%s10341_s9] sm:$0xff]  }
0x136f   : > { %v4005_v62 = vmax.f32 %v3983_v56, 0.0  ;;  %v7584_v58 = vadd.f32 %v7583_v7, %v7582_v59  ;;  %v7585_v11 = vpop.f32.mrb[54].mxu1  ;;  %v4012_v18 = vmul.f32 %v9256_v48, %v4004_v55  ;;  %v3869_v50 = vadd.f32 %v7553_v30, %v3692_v46  ;;  %7882 = vmatprep.mubr.msk.bf16.mxu1 %vm3794_vm5, %v8276_v60 }
0x1370   : > { %v4003_v39 = vmax.f32 %v3975_v54, 0.0  ;;  %v7586_v15 = vpop.f32.mrb[55].mxu1  ;;  %v4010_v22 = vmul.f32 %v9256_v48, %v4002_v3 }
0x1371   : > { %v4013_v19 = vmul.f32 %v9256_v48, %v4005_v62  ;;  %v7587_v17 = vadd.f32 %v7586_v15, %v7585_v11  ;;  %v3923_v21 = vadd.f32 %v7584_v58, %v3858_v13 }
0x1372   : > { %v4011_v26 = vmul.f32 %v9256_v48, %v4003_v39  ;;  %v7872_v23 = vpop.f32.mrb[60].mxu0 }
0x1373   : > { %v4019_v27 = vpack.c.bf16 %v4013_v19, %v4012_v18  ;;  %v3987_v28 = vpop.f32.mrb[61].mxu0  ;;  %v3926_v61 = vadd.f32 %v7587_v17, %v3861_v14 }
0x1374   : > { %v4018_v29 = vpack.c.bf16 %v4011_v26, %v4010_v22  ;;  %v3988_v31 = vadd.f32 %v3987_v28, %v3923_v21  ;;  %v7873_v32 = vpop.f32.mrb[62].mxu0  ;;  %v8279_v28 = vld [vmem:[%s10341_s9 + $0x18] sm:$0xff]  }
0x1375   : > { %v7588_v9 = vpop.f32.mrb[56].mxu1  ;;  %v3990_v33 = vpop.f32.mrb[63].mxu0  ;;  %4028 = vrot.lane.b32.xlu0 %v4019_v27, %s10340_s4  ;;  %v8278_v27 = vld [vmem:[%s10341_s9 + $0x10] sm:$0xff]  }
0x1376   : > { %v4006_v37 = vmax.f32 %v3988_v31, 0.0  ;;  %v3991_v38 = vadd.f32 %v3990_v33, %v3926_v61  ;;  %v7589_v41 = vpop.f32.mrb[57].mxu1  ;;  %4026 = vrot.lane.b32.xlu1 %v4018_v29, %s10340_s4  ;;  %v8280_v61 = vld [vmem:[%s10341_s9 + $0x20] sm:$0xff]   ;;  %v8281_v29 = vld [vmem:[%s10341_s9 + $0x28] sm:$0xff]   ;;  %v8282_v31 = vld [vmem:[%s10341_s9 + $0x30] sm:$0xff]  }
0x1377   : > { %v7590_v44 = vadd.f32 %v7589_v41, %v7588_v9  ;;  %v7591_v45 = vpop.f32.mrb[58].mxu1 }
0x1378   : > { %v4007_v47 = vmax.f32 %v3991_v38, 0.0  ;;  %v7592_v49 = vpop.f32.mrb[59].mxu1  ;;  %v4014_v56 = vmul.f32 %v9256_v48, %v4006_v37 }
0x1379   : > { %v3931_v53 = vadd.f32 %v7590_v44, %v3866_v42  ;;  %v7593_v55 = vadd.f32 %v7592_v49, %v7591_v45 }
0x137a   : > { %v4015_v59 = vmul.f32 %v9256_v48, %v4007_v47 }
0x137b   : > { %v3996_v63 = vadd.f32 %v7872_v23, %v3931_v53  ;;  %v3934_v3 = vadd.f32 %v7593_v55, %v3869_v50  ;;  %v8277_v23 = vld [vmem:[%s10341_s9 + $0x8] sm:$0xff]  }
0x137c   : > { %v4020_v54 = vpack.c.bf16 %v4015_v59, %v4014_v56 }
0x137d   : > { %v4008_v7 = vmax.f32 %v3996_v63, 0.0  ;;  %v3999_v24 = vadd.f32 %v7873_v32, %v3934_v3  ;;  %v8283_v32 = vld [vmem:[%s10341_s9 + $0x38] sm:$0xff]   ;;  %s10350_s9 = sld [smem:[#allocation10_spill]] }
0x137e   : > { %4030 = vrot.lane.b32.xlu1 %v4020_v54, %s10340_s4 }
0x137f   : > { %v4009_v8 = vmax.f32 %v3999_v24, 0.0  ;;  %v4016_v13 = vmul.f32 %v9256_v48, %v4008_v7 }
0x1381   : > { %v4017_v30 = vmul.f32 %v9256_v48, %v4009_v8 }
0x1383   : > { %v4021_v62 = vpack.c.bf16 %v4017_v30, %v4016_v13  ;;  %v9439_v30 = vld [vmem:[%s10323_s7] ss:$0 sm:$0xff]  ;;  %s10347_s7 = smov 116  }
0x1385   : > { %4032 = vrot.lane.b32.xlu0 %v4021_v62, %s10340_s4  ;;  %s10342_s4 = sld [smem:[#allocation28_spill]]  ;;  %v3019_v62 = vmul.f32 %v9439_v30, %v9202_v52 }
0x138b   : > { %v8284_v38 = vld [vmem:[%s10342_s4] sm:$0xff]   ;;  %v8285_v45 = vld [vmem:[%s10342_s4 + $0x8] sm:$0xff]   ;;  %v8286_v49 = vld [vmem:[%s10342_s4 + $0x10] sm:$0xff]  }
0x138c   : > { %7898 = vmatprep.subr.bf16.mxu0 %v8284_v38  ;;  %v8287_v59 = vld [vmem:[%s10342_s4 + $0x18] sm:$0xff]   ;;  %s10345_s4 = smov 121  }
0x138d   : > { %7899 = vmatpush3.bf16.msra.mxu0 %v8284_v38 }
0x138e   : > { %7900 = vmatprep.subr.bf16.mxu0 %v8285_v45 }
0x1391   : > { %7901 = vmatpush3.bf16.msra.mxu0 %v8285_v45 }
0x1392   : > { %7902 = vmatprep.subr.bf16.mxu0 %v8286_v49 }
0x1395   : > { %7903 = vmatpush3.bf16.msra.mxu0 %v8286_v49 }
0x1396   : > { %7904 = vmatprep.subr.bf16.mxu0 %v8287_v59 }
0x1399   : > { %7905 = vmatpush3.bf16.msra.mxu0 %v8287_v59 }
0x13e7   : > { %v4029_v58 = vpop.permute.xlu0 %4028 }
0x13e8   : > { %v4027_v11 = vpop.permute.xlu1 %4026  ;;  %v4037_v15 = vsel %vm3505_vm8, 0, %v4029_v58  ;;  %v3017_v58 = vmul.f32 %v9439_v30, %v9195_v36 }
0x13e9   : > { %v4035_v14 = vsel %vm3505_vm8, 0, %v4027_v11  ;;  %v4044_v48 = vsel %vm2212_vm2, %v4037_v15, 0 }
0x13ea   : > { %v4042_v39 = vsel %vm2212_vm2, %v4035_v14, 0  ;;  %7982 = vmatprep.subr.msk.bf16.mxu1 %vm2212_vm2, %v4035_v14  ;;  %v3018_v14 = vmul.f32 %v9439_v30, %v9200_v51 }
0x13eb   : > { %7875 = vmatpush3.bf16.msra.mxu1 %v4042_v39  ;;  %v3016_v39 = vmul.f32 %v9439_v30, %v9193_v35 }
0x13ec   : > { %7983 = vmatprep.subr.msk.bf16.mxu1 %vm2212_vm2, %v4037_v15  ;;  %v3021_v15 = vpack.c.bf16 %v3019_v62, %v3018_v14 }
0x13ef   : > { %7877 = vmatpush3.bf16.msra.mxu1 %v4044_v48  ;;  %v3020_v48 = vpack.c.bf16 %v3017_v58, %v3016_v39 }
0x13f0   : > { %v4031_v18 = vpop.permute.xlu1 %4030 }
0x13f1   : > { %v4039_v19 = vsel %vm3505_vm8, 0, %v4031_v18 }
0x13f2   : > { %v4046_v17 = vsel %vm2212_vm2, %v4039_v19, 0  ;;  %7984 = vmatprep.subr.msk.bf16.mxu1 %vm2212_vm2, %v4039_v19 }
0x13f3   : > { %7879 = vmatpush3.bf16.msra.mxu1 %v4046_v17 }
0x13f7   : > { %v4033_v21 = vpop.permute.xlu0 %4032 }
0x13f8   : > { %v4041_v22 = vsel %vm3505_vm8, 0, %v4033_v21  ;;  %vm4283_vm8 = vcmask 392192  }
0x13f9   : > { %v4048_v26 = vsel %vm2212_vm2, %v4041_v22, 0  ;;  %7985 = vmatprep.subr.msk.bf16.mxu1 %vm2212_vm2, %v4041_v22 }
0x13fa   : > { %7881 = vmatpush3.bf16.msra.mxu1 %v4048_v26 }
0x13fd   : > { %7883 = vmatmul.mubr.msk.bf16.vlgmr.msra.gmra.mrb[60].mxu1 %vm3794_vm5, %v8277_v23 }
0x13fe   : > { %7886 = vmatprep.mubr.msk.bf16.mxu1 %vm3794_vm5, %v8278_v27 }
0x1405   : > { %7887 = vmatmul.mubr.msk.bf16.gmra.mrb[64].mxu1 %vm3794_vm5, %v8279_v28 }
0x1406   : > { %7890 = vmatprep.mubr.msk.bf16.mxu1 %vm3794_vm5, %v8280_v61 }
0x140d   : > { %7891 = vmatmul.mubr.msk.bf16.gmra.mrb[68].mxu1 %vm3794_vm5, %v8281_v29 }
0x140e   : > { %7894 = vmatprep.mubr.msk.bf16.mxu1 %vm3794_vm5, %v8282_v31 }
0x1415   : > { %7895 = vmatmul.mubr.msk.bf16.gmra.mrb[72].mxu1 %vm3794_vm5, %v8283_v32 }
0x14d0   : > { %v9426_v9 = vpop.f32.mrb[60].mxu1 }
0x14d1   : > { %v9428_v33 = vpop.f32.mrb[61].mxu1 }
0x14d2   : > { %v9430_v34 = vpop.f32.mrb[62].mxu1 }
0x14d3   : > { %v9432_v37 = vpop.f32.mrb[63].mxu1 }
0x14d8   : > { %v7888_v41 = vpop.f32.mrb[64].mxu1 }
0x14d9   : > { %v4180_v42 = vpop.f32.mrb[65].mxu1 }
0x14da   : > { %v7889_v44 = vpop.f32.mrb[66].mxu1 }
0x14db   : > { %v8145_v46 = vpack.i.bf16 %v7889_v44, %v7888_v41  ;;  %v4183_v47 = vpop.f32.mrb[67].mxu1 }
0x14dc   : > { %v8150_v50 = vpack.i.bf16 %v4183_v47, %v4180_v42 }
0x14dd   : > { %8146 = vrot.lane.b32.xlu0 %v8145_v46, %s8521_s2 }
0x14de   : > { %8151 = vrot.lane.b32.xlu1 %v8150_v50, %s8521_s2  ;;  %s8523_s2 = smov 48  }
0x14e0   : > { %v7892_v53 = vpop.f32.mrb[68].mxu1 }
0x14e1   : > { %v4196_v55 = vpop.f32.mrb[69].mxu1 }
0x14e2   : > { %v7893_v56 = vpop.f32.mrb[70].mxu1 }
0x14e3   : > { %v8155_v60 = vpack.i.bf16 %v7893_v56, %v7892_v53  ;;  %v4199_v63 = vpop.f32.mrb[71].mxu1 }
0x14e4   : > { %v8160_v3 = vpack.i.bf16 %v4199_v63, %v4196_v55 }
0x14e5   : > { %8156 = vrot.lane.b32.xlu0 %v8155_v60, %s8522_s5 }
0x14e6   : > { %8161 = vrot.lane.b32.xlu1 %v8160_v3, %s8522_s5  ;;  %s10343_s5 = smov 7  }
0x14e8   : > { %v7896_v54 = vpop.f32.mrb[72].mxu1 }
0x14e9   : > { %v4212_v7 = vpop.f32.mrb[73].mxu1 }
0x14ea   : > { %v7897_v24 = vpop.f32.mrb[74].mxu1 }
0x14eb   : > { %v8170_v8 = vpack.i.bf16 %v7897_v24, %v7896_v54  ;;  %v4215_v13 = vpop.f32.mrb[75].mxu1 }
0x14ec   : > { %v8165_v11 = vpack.i.bf16 %v4215_v13, %v4212_v7 }
0x14ed   : > { %8171 = vrot.lane.b32.xlu0 %v8170_v8, %s8523_s2 }
0x14ee   : > { %8166 = vrot.lane.b32.xlu1 %v8165_v11, %s8523_s2  ;;  %s10344_s2 = sld [smem:[#allocation32_spill]] }
0x14f1   : > { %3026 = vrot.lane.b32.xlu0 %v3021_v15, %s10343_s5 }
0x14f2   : > { %3024 = vrot.lane.b32.xlu1 %v3020_v48, %s10343_s5 }
0x14f4   : > { %v4300_v8 = vld [vmem:[%s10344_s2 + $0x10] sm:$0xff]  ;;  %v4301_v62 = vld [vmem:[%s10344_s2 + $0x18] sm:$0xff]  ;;  %v4298_v11 = vld [vmem:[%s10344_s2] sm:$0xff] }
0x14f5   : > { %v4299_v14 = vld [vmem:[%s10344_s2 + $0x8] sm:$0xff]  ;;  %s10348_s2 = smov 126  }
0x154f   : > { %v8147_v52 = vpop.permute.xlu0 %8146 }
0x1550   : > { %v8152_v18 = vpop.permute.xlu1 %8151  ;;  %v8149_v36 = vunpack.i.h.bf16 %v8147_v52  ;;  %v8148_v17 = vunpack.i.l.bf16 %v8147_v52 }
0x1551   : > { %v8154_v22 = vunpack.i.h.bf16 %v8152_v18  ;;  %v8153_v26 = vunpack.i.l.bf16 %v8152_v18 }
0x1552   : > { %v4278_v35 = vsel %vm2471_vm14, %v9430_v34, %v8149_v36  ;;  %v4277_v61 = vsel %vm2471_vm14, %v9426_v9, %v8148_v17 }
0x1553   : > { %v4276_v31 = vsel %vm2471_vm14, %v9432_v37, %v8154_v22  ;;  %v4275_v32 = vsel %vm2471_vm14, %v9428_v33, %v8153_v26  ;;  %v8295_v22 = vld [vmem:[%s10346_s6 + $0xc] ss:$20 sps:$4 sm:$0xff]  }
0x1554   : > { %v4496_v26 = vld [vmem:[%s10350_s9 + $0x8] sm:$0xff] }
0x1557   : > { %v8157_v19 = vpop.permute.xlu0 %8156 }
0x1558   : > { %v8162_v21 = vpop.permute.xlu1 %8161  ;;  %v8159_v23 = vunpack.i.h.bf16 %v8157_v19  ;;  %v8158_v51 = vunpack.i.l.bf16 %v8157_v19 }
0x1559   : > { %v8164_v27 = vunpack.i.h.bf16 %v8162_v21  ;;  %v8163_v28 = vunpack.i.l.bf16 %v8162_v21  ;;  %v8290_v21 = vld [vmem:[%s10346_s6 + $0x4] ss:$20 sps:$4 sm:$0xff]  }
0x155a   : > { %v4282_v44 = vsel %vm2907_vm3, %v4278_v35, %v8159_v23  ;;  %v4281_v45 = vsel %vm2907_vm3, %v4277_v61, %v8158_v51  ;;  %4607 = vmatprep.mubr.bf16.mxu1 %v8290_v21  ;;  %v4498_v23 = vld [vmem:[%s10350_s9 + $0x18] sm:$0xff] }
0x155b   : > { %v4280_v47 = vsel %vm2907_vm3, %v4276_v31, %v8164_v27  ;;  %v4279_v9 = vsel %vm2907_vm3, %v4275_v32, %v8163_v28  ;;  %v4495_v27 = vld [vmem:[%s10350_s9] sm:$0xff]  ;;  %v4497_v28 = vld [vmem:[%s10350_s9 + $0x10] sm:$0xff]  ;;  %s10352_s9 = sld [smem:[#allocation11_spill]] }
0x155f   : > { %v8172_v29 = vpop.permute.xlu0 %8171 }
0x1560   : > { %v8174_v38 = vunpack.i.h.bf16 %v8172_v29  ;;  %v8173_v41 = vunpack.i.l.bf16 %v8172_v29  ;;  %v8167_v42 = vpop.permute.xlu1 %8166 }
0x1561   : > { %v8169_v46 = vunpack.i.h.bf16 %v8167_v42  ;;  %v8168_v34 = vunpack.i.l.bf16 %v8167_v42 }
0x1562   : > { %v4287_v49 = vsel %vm4283_vm8, %v4282_v44, %v8174_v38  ;;  %v4286_v37 = vsel %vm4283_vm8, %v4281_v45, %v8173_v41 }
0x1563   : > { %v4289_v50 = vpack.c.bf16 %v4287_v49, %v4286_v37  ;;  %v4285_v33 = vsel %vm4283_vm8, %v4280_v47, %v8169_v46  ;;  %v4284_v53 = vsel %vm4283_vm8, %v4279_v9, %v8168_v34  ;;  %v3027_v55 = vpop.permute.xlu0 %3026 }
0x1564   : > { %v3031_v56 = vsel %vm2785_vm13, 0, %v3027_v55  ;;  %v3025_v59 = vpop.permute.xlu1 %3024  ;;  %v4288_v60 = vpack.c.bf16 %v4285_v33, %v4284_v53 }
0x1565   : > { %v9469_v63 = vsel %vm2790_vm6, %v3031_v56, 0  ;;  %v3029_v3 = vsel %vm2785_vm13, 0, %v3025_v59 }
0x1566   : > { %v9473_v54 = vsel %vm2790_vm6, %v3029_v3, 0  ;;  %4437 = vrot.lane.b32.xlu0 %v9469_v63, %s10334_s1  ;;  %7906 = vmatprep.mubr.msk.bf16.mxu0 %vm3794_vm5, %v4288_v60 }
0x1567   : > { %4435 = vrot.lane.b32.xlu1 %v9473_v54, %s10334_s1  ;;  %7907 = vmatmul.mubr.msk.bf16.vlgmr.msra.gmra.mrb[64].mxu0 %vm3794_vm5, %v4289_v50 }
0x1568   : > { %4656 = vmatprep.mubr.bf16.mxu0 %v8295_v22 }
0x156a   : > { %4447 = vrot.lane.b32.xlu0 %v9473_v54, %s10339_s0 }
0x156b   : > { %4455 = vrot.lane.b32.xlu1 %v9469_v63, %s10345_s4 }
0x156e   : > { %4449 = vrot.lane.b32.xlu0 %v9469_v63, %s10339_s0 }
0x1572   : > { %4453 = vrot.lane.b32.xlu0 %v9473_v54, %s10345_s4 }
0x15d8   : > { %v9489_v7 = vpop.permute.xlu0 %4437 }
0x15d9   : > { %v4436_v51 = vpop.permute.xlu1 %4435 }
0x15dc   : > { %v4448_v24 = vpop.permute.xlu0 %4447 }
0x15dd   : > { %7648 = vmatprep.subr.bf16.mxu0 %v4448_v24  ;;  %v4456_v61 = vpop.permute.xlu1 %4455 }
0x15e0   : > { %v4450_v35 = vpop.permute.xlu0 %4449 }
0x15e4   : > { %v4454_v29 = vpop.permute.xlu0 %4453 }
0x163a   : > { %v7908_v13 = vpop.f32.mrb[64].mxu0 }
0x163b   : > { %v4366_v58 = vpop.f32.mrb[65].mxu0  ;;  %v4375_v15 = vadd.f32 %v7908_v13, %v4300_v8  ;;  %v8293_v13 = vld [vmem:[%s10346_s6 + $0x8] ss:$20 sps:$4 sm:$0xff]  }
0x163c   : > { %v7909_v39 = vpop.f32.mrb[66].mxu0  ;;  %v4367_v18 = vadd.f32 %v4366_v58, %v4298_v11  ;;  %v8297_v58 = vld [vmem:[%s10346_s6 + $0x34] ss:$20 sps:$4 sm:$0xff]   ;;  %v8300_v11 = vld [vmem:[%s10346_s6 + $0x10] ss:$20 sps:$4 sm:$0xff]  }
0x163d   : > { %v4378_v48 = vadd.f32 %v7909_v39, %v4301_v62  ;;  %v4369_v52 = vpop.f32.mrb[67].mxu0  ;;  %v8296_v62 = vld [vmem:[%s10346_s6 + $0x28] ss:$20 sps:$4 sm:$0xff]  }
0x163e   : > { %v4370_v19 = vadd.f32 %v4369_v52, %v4299_v14 }
0x163f   : > { %v4382_v36 = vpack.c.bf16 %v4378_v48, %v4375_v15  ;;  %v8299_v15 = vld [vmem:[%s10346_s6 + $0x30] ss:$20 sps:$4 sm:$0xff]   ;;  %v8301_v48 = vld [vmem:[%s10346_s6 + $0x38] ss:$20 sps:$4 sm:$0xff]  }
0x1640   : > { %v4381_v17 = vpack.c.bf16 %v4370_v19, %v4367_v18 }
0x1641   : > { %4411 = vrot.lane.b32.xlu1 %v4382_v36, %s10336_s3  ;;  %4405 = vrot.lane.b32.xlu0 %v4382_v36, %s10345_s4 }
0x1645   : > { %4387 = vrot.lane.b32.xlu1 %v4382_v36, %s10334_s1  ;;  %4429 = vrot.lane.b32.xlu0 %v4382_v36, %s10326_s18 }
0x1649   : > { %4417 = vrot.lane.b32.xlu0 %v4382_v36, %s10347_s7  ;;  %4403 = vrot.lane.b32.xlu1 %v4381_v17, %s10345_s4 }
0x164d   : > { %4427 = vrot.lane.b32.xlu0 %v4381_v17, %s10326_s18  ;;  %4409 = vrot.lane.b32.xlu1 %v4381_v17, %s10336_s3 }
0x1651   : > { %4393 = vrot.lane.b32.xlu0 %v4382_v36, %s10348_s2  ;;  %4385 = vrot.lane.b32.xlu1 %v4381_v17, %s10334_s1 }
0x1655   : > { %4459 = vrot.lane.b32.xlu0 %v9473_v54, %s10336_s3  ;;  %4461 = vrot.lane.b32.xlu1 %v9469_v63, %s10336_s3 }
0x1659   : > { %4423 = vrot.lane.b32.xlu0 %v4382_v36, %s10349_s8  ;;  %4415 = vrot.lane.b32.xlu1 %v4381_v17, %s10347_s7 }
0x165d   : > { %4399 = vrot.lane.b32.xlu0 %v4382_v36, %s10339_s0  ;;  %4391 = vrot.lane.b32.xlu1 %v4381_v17, %s10348_s2 }
0x1661   : > { %4471 = vrot.lane.b32.xlu0 %v9473_v54, %s10349_s8  ;;  %4421 = vrot.lane.b32.xlu1 %v4381_v17, %s10349_s8 }
0x1665   : > { %4467 = vrot.lane.b32.xlu0 %v9469_v63, %s10347_s7  ;;  %4397 = vrot.lane.b32.xlu1 %v4381_v17, %s10339_s0 }
0x1669   : > { %4443 = vrot.lane.b32.xlu0 %v9469_v63, %s10348_s2  ;;  %4465 = vrot.lane.b32.xlu1 %v9473_v54, %s10347_s7 }
0x166d   : > { %4477 = vrot.lane.b32.xlu0 %v9489_v7, %s10349_s8  ;;  %4441 = vrot.lane.b32.xlu1 %v9473_v54, %s10348_s2 }
0x1671   : > { %4506 = vperm.xlu0 %8103, %v4496_v26   ;;  %4473 = vrot.lane.b32.xlu1 %v9469_v63, %s10349_s8 }
0x1675   : > { %4516 = vperm.xlu0 %8103, %v4498_v23   ;;  %4475 = vrot.lane.b32.xlu1 %v4436_v51, %s10349_s8 }
0x1679   : > { %4501 = vperm.xlu1 %8104, %v4495_v27  }
0x167d   : > { %4511 = vperm.xlu1 %8104, %v4497_v28  }
0x16b3   : > { %v4412_v31 = vpop.permute.xlu1 %4411  ;;  %v4406_v32 = vpop.permute.xlu0 %4405 }
0x16b7   : > { %v4388_v38 = vpop.permute.xlu1 %4387  ;;  %v4430_v41 = vpop.permute.xlu0 %4429 }
0x16bb   : > { %v4418_v42 = vpop.permute.xlu0 %4417  ;;  %v4404_v44 = vpop.permute.xlu1 %4403 }
0x16bc   : > { %7620 = vmatprep.subr.bf16.mxu1 %v4404_v44 }
0x16bd   : > { %7621 = vmatpush3.bf16.msra.mxu1 %v4381_v17 }
0x16be   : > { %7622 = vmatprep.subr.bf16.mxu1 %v4406_v32 }
0x16bf   : > { %v4428_v45 = vpop.permute.xlu0 %4427  ;;  %v4410_v46 = vpop.permute.xlu1 %4409 }
0x16c0   : > { %7649 = vmatpush3.bf16.msra.mxu0 %v4428_v45 }
0x16c1   : > { %7623 = vmatpush3.bf16.msra.mxu1 %v4382_v36  ;;  %7650 = vmatprep.subr.bf16.mxu0 %v4450_v35 }
0x16c2   : > { %7624 = vmatprep.subr.bf16.mxu1 %v4410_v46 }
0x16c3   : > { %v4394_v34 = vpop.permute.xlu0 %4393  ;;  %v4386_v47 = vpop.permute.xlu1 %4385 }
0x16c4   : > { %7651 = vmatpush3.bf16.msra.mxu0 %v4430_v41 }
0x16c5   : > { %7625 = vmatpush3.bf16.msra.mxu1 %v4386_v47  ;;  %7652 = vmatprep.subr.bf16.mxu0 %v4454_v29 }
0x16c6   : > { %7626 = vmatprep.subr.bf16.mxu1 %v4412_v31 }
0x16c7   : > { %v4460_v9 = vpop.permute.xlu0 %4459  ;;  %v4462_v49 = vpop.permute.xlu1 %4461 }
0x16c8   : > { %7653 = vmatpush3.bf16.msra.mxu0 %v9473_v54  ;;  %v8291_v54 = vld [vmem:[%s10346_s6 + $0x2c] ss:$20 sps:$4 sm:$0xff]  }
0x16c9   : > { %7627 = vmatpush3.bf16.msra.mxu1 %v4388_v38  ;;  %7654 = vmatprep.subr.bf16.mxu0 %v4456_v61 }
0x16cb   : > { %v4424_v37 = vpop.permute.xlu0 %4423  ;;  %v4416_v50 = vpop.permute.xlu1 %4415 }
0x16cc   : > { %7628 = vmatprep.subr.bf16.mxu1 %v4416_v50  ;;  %7655 = vmatpush3.bf16.msra.mxu0 %v9469_v63  ;;  %v8288_v63 = vld [vmem:[%s10346_s6] ss:$20 sps:$4 sm:$0xff]   ;;  %s10351_s6 = sld [smem:[#allocation13_spill]] }
0x16cd   : > { %7656 = vmatprep.subr.bf16.mxu0 %v4460_v9 }
0x16cf   : > { %v4392_v33 = vpop.permute.xlu1 %4391  ;;  %v4400_v53 = vpop.permute.xlu0 %4399 }
0x16d0   : > { %7629 = vmatpush3.bf16.msra.mxu1 %v4392_v33  ;;  %7657 = vmatpush3.bf16.msra.mxu0 %v4436_v51 }
0x16d1   : > { %7630 = vmatprep.subr.bf16.mxu1 %v4418_v42  ;;  %7658 = vmatprep.subr.bf16.mxu0 %v4462_v49 }
0x16d3   : > { %v4422_v55 = vpop.permute.xlu1 %4421  ;;  %v4472_v56 = vpop.permute.xlu0 %4471 }
0x16d4   : > { %7631 = vmatpush3.bf16.msra.mxu1 %v4394_v34  ;;  %7659 = vmatpush3.bf16.msra.mxu0 %v9489_v7 }
0x16d5   : > { %7632 = vmatprep.subr.bf16.mxu1 %v4422_v55 }
0x16d7   : > { %v4398_v59 = vpop.permute.xlu1 %4397  ;;  %v4468_v3 = vpop.permute.xlu0 %4467 }
0x16d8   : > { %7633 = vmatpush3.bf16.msra.mxu1 %v4398_v59 }
0x16d9   : > { %7634 = vmatprep.subr.bf16.mxu1 %v4424_v37 }
0x16db   : > { %v4466_v60 = vpop.permute.xlu1 %4465  ;;  %v4444_v7 = vpop.permute.xlu0 %4443 }
0x16dc   : > { %7635 = vmatpush3.bf16.msra.mxu1 %v4400_v53  ;;  %7660 = vmatprep.subr.bf16.mxu0 %v4466_v60 }
0x16dd   : > { %7910 = vmatprep.subr.bf16.mxu1 %v4472_v56 }
0x16df   : > { %4608 = vmatmul.mubr.bf16.vlgmr.msra.gmra.mrb[76].mxu1 %v8288_v63  ;;  %v4442_v24 = vpop.permute.xlu1 %4441  ;;  %v4478_v39 = vpop.permute.xlu0 %4477 }
0x16e0   : > { %7661 = vmatpush3.bf16.msra.mxu0 %v4442_v24  ;;  %7911 = vmatpush3.bf16.msra.mxu1 %v4472_v56 }
0x16e1   : > { %7662 = vmatprep.subr.bf16.mxu0 %v4468_v3  ;;  %4615 = vmatprep.mubr.bf16.mxu1 %v8291_v54 }
0x16e3   : > { %v4474_v8 = vpop.permute.xlu1 %4473 }
0x16e4   : > { %7663 = vmatpush3.bf16.msra.mxu0 %v4444_v7  ;;  %7912 = vmatprep.subr.bf16.mxu1 %v4474_v8 }
0x16e5   : > { %7913 = vmatpush3.bf16.msra.mxu1 %v4474_v8 }
0x16e7   : > { %4616 = vmatmul.mubr.bf16.gmra.mrb[80].mxu1 %v8296_v62  ;;  %4657 = vmatmul.mubr.bf16.vlgmr.msra.gmra.mrb[68].mxu0 %v8293_v13  ;;  %v4476_v14 = vpop.permute.xlu1 %4475 }
0x16e8   : > { %7914 = vmatprep.subr.bf16.mxu1 %v4476_v14  ;;  %4664 = vmatprep.mubr.bf16.mxu0 %v8297_v58 }
0x16e9   : > { %7915 = vmatpush3.bf16.msra.mxu1 %v4476_v14  ;;  %7918 = vmatprep.mubr.msk.bf16.mxu1 %vm3794_vm5, %v8300_v11 }
0x16ea   : > { %7916 = vmatprep.subr.bf16.mxu1 %v4478_v39 }
0x16ed   : > { %7917 = vmatpush3.bf16.msra.mxu1 %v4478_v39 }
0x16ef   : > { %4665 = vmatmul.mubr.bf16.gmra.mrb[72].mxu0 %v8299_v15 }
0x16f0   : > { %7919 = vmatmul.mubr.msk.bf16.vlgmr.msra.gmra.mrb[84].mxu1 %vm3794_vm5, %v8301_v48  ;;  %v4507_v22 = vpop.permute.xlu0 %4506  ;;  %vm10377_vm5 = vcmask 744448  }
0x16f4   : > { %v4517_v47 = vpop.permute.xlu0 %4516 }
0x16f8   : > { %v4502_v26 = vpop.permute.xlu1 %4501 }
0x16fc   : > { %v4512_v9 = vpop.permute.xlu1 %4511 }
0x17b2   : > { %v7636_v52 = vpop.f32.mrb[76].mxu1 }
0x17b3   : > { %v7637_v18 = vpop.f32.mrb[77].mxu1 }
0x17b4   : > { %v7638_v19 = vadd.f32 %v7637_v18, %v7636_v52  ;;  %v7639_v36 = vpop.f32.mrb[78].mxu1 }
0x17b5   : > { %v7640_v17 = vpop.f32.mrb[79].mxu1 }
0x17b6   : > { %v7641_v21 = vadd.f32 %v7640_v17, %v7639_v36  ;;  %v4610_v35 = vadd.f32 %v7638_v19, %v4502_v26 }
0x17b8   : > { %v4613_v42 = vadd.f32 %v7641_v21, %v4507_v22 }
0x17ba   : > { %v7642_v23 = vpop.f32.mrb[80].mxu1  ;;  %v7664_v51 = vpop.f32.mrb[68].mxu0 }
0x17bb   : > { %v7643_v27 = vpop.f32.mrb[81].mxu1  ;;  %v7665_v28 = vpop.f32.mrb[69].mxu0 }
0x17bc   : > { %v7644_v61 = vadd.f32 %v7643_v27, %v7642_v23  ;;  %v7666_v29 = vadd.f32 %v7665_v28, %v7664_v51  ;;  %v7645_v31 = vpop.f32.mrb[82].mxu1  ;;  %v7667_v32 = vpop.f32.mrb[70].mxu0  ;;  %v8304_v28 = vld [vmem:[%s10351_s6 + $0x4] ss:$12 sps:$4 sm:$0xff]  }
0x17bd   : > { %v7646_v38 = vpop.f32.mrb[83].mxu1  ;;  %v7668_v41 = vpop.f32.mrb[71].mxu0  ;;  %4896 = vmatprep.mubr.bf16.mxu0 %v8304_v28 }
0x17be   : > { %v7647_v44 = vadd.f32 %v7646_v38, %v7645_v31  ;;  %v7669_v45 = vadd.f32 %v7668_v41, %v7667_v32  ;;  %v4659_v46 = vadd.f32 %v7666_v29, %v4610_v35  ;;  %v4618_v33 = vadd.f32 %v7644_v61, %v4512_v9  ;;  %v8305_v35 = vld [vmem:[%s10351_s6 + $0x8] ss:$12 sps:$4 sm:$0xff]   ;;  %v4804_v61 = vld [vmem:[%s10352_s9] sm:$0xff]  ;;  %v4807_v32 = vld [vmem:[%s10352_s9 + $0x18] sm:$0xff] }
0x17bf   : > { %7926 = vmatprep.mubr.msk.bf16.mxu1 %vm2907_vm3, %v8305_v35  ;;  %v4805_v29 = vld [vmem:[%s10352_s9 + $0x8] sm:$0xff]  ;;  %v4806_v31 = vld [vmem:[%s10352_s9 + $0x10] sm:$0xff] }
0x17c0   : > { %v4662_v34 = vadd.f32 %v7669_v45, %v4613_v42  ;;  %v4621_v3 = vadd.f32 %v7647_v44, %v4517_v47 }
0x17c2   : > { %v7670_v49 = vpop.f32.mrb[72].mxu0 }
0x17c3   : > { %v7671_v37 = vpop.f32.mrb[73].mxu0  ;;  %v7920_v50 = vpop.f32.mrb[84].mxu1 }
0x17c4   : > { %v7672_v53 = vadd.f32 %v7671_v37, %v7670_v49  ;;  %v7673_v55 = vpop.f32.mrb[74].mxu0  ;;  %v4707_v56 = vpop.f32.mrb[85].mxu1 }
0x17c5   : > { %v4708_v59 = vadd.f32 %v4707_v56, %v4659_v46  ;;  %v7674_v60 = vpop.f32.mrb[75].mxu0  ;;  %v7921_v63 = vpop.f32.mrb[86].mxu1  ;;  %v8302_v56 = vld [vmem:[%s10351_s6] ss:$12 sps:$4 sm:$0xff]  }
0x17c6   : > { %v4667_v54 = vadd.f32 %v7672_v53, %v4618_v33  ;;  %v7675_v24 = vadd.f32 %v7674_v60, %v7673_v55  ;;  %v4710_v7 = vpop.f32.mrb[87].mxu1 }
0x17c7   : > { %v4722_v8 = vmax.f32 %v4708_v59, 0.0  ;;  %v4711_v13 = vadd.f32 %v4710_v7, %v4662_v34  ;;  %v8307_v59 = vld [vmem:[%s10351_s6 + $0x1c] ss:$12 sps:$4 sm:$0xff]  }
0x17c8   : > { %v4716_v62 = vadd.f32 %v7920_v50, %v4667_v54  ;;  %v4670_v58 = vadd.f32 %v7675_v24, %v4621_v3  ;;  %v8309_v3 = vld [vmem:[%s10351_s6 + $0x18] ss:$12 sps:$4 sm:$0xff]  }
0x17c9   : > { %v4723_v11 = vmax.f32 %v4711_v13, 0.0  ;;  %v4726_v15 = vmul.f32 %v9439_v30, %v4722_v8 }
0x17ca   : > { %v4724_v14 = vmax.f32 %v4716_v62, 0.0  ;;  %v4719_v39 = vadd.f32 %v7921_v63, %v4670_v58  ;;  %v8306_v63 = vld [vmem:[%s10351_s6 + $0x20] ss:$12 sps:$4 sm:$0xff]   ;;  %s10361_s6 = smov 107  }
0x17cb   : > { %v4727_v48 = vmul.f32 %v9439_v30, %v4723_v11 }
0x17cc   : > { %v4725_v52 = vmax.f32 %v4719_v39, 0.0  ;;  %v4728_v19 = vmul.f32 %v9439_v30, %v4724_v14 }
0x17cd   : > { %v4730_v18 = vpack.c.bf16 %v4727_v48, %v4726_v15 }
0x17ce   : > { %v4729_v36 = vmul.f32 %v9439_v30, %v4725_v52 }
0x17cf   : > { %4734 = vrot.lane.b32.xlu1 %v4730_v18, %s10343_s5 }
0x17d0   : > { %v4731_v17 = vpack.c.bf16 %v4729_v36, %v4728_v19 }
0x17d2   : > { %4736 = vrot.lane.b32.xlu0 %v4731_v17, %s10343_s5 }
0x1841   : > { %v4735_v21 = vpop.permute.xlu1 %4734 }
0x1842   : > { %v4739_v22 = vsel %vm2785_vm13, 0, %v4735_v21 }
0x1843   : > { %v4742_v26 = vsel %vm2790_vm6, %v4739_v22, 0 }
0x1844   : > { %v4737_v23 = vpop.permute.xlu0 %4736  ;;  %4766 = vrot.lane.b32.xlu1 %v4742_v26, %s10345_s4 }
0x1845   : > { %v4741_v51 = vsel %vm2785_vm13, 0, %v4737_v23 }
0x1846   : > { %v4744_v27 = vsel %vm2790_vm6, %v4741_v51, 0 }
0x1847   : > { %4768 = vrot.lane.b32.xlu0 %v4744_v27, %s10345_s4  ;;  %s10355_s4 = smov 11  }
0x1848   : > { %4772 = vrot.lane.b32.xlu1 %v4742_v26, %s10336_s3 }
0x184b   : > { %4748 = vrot.lane.b32.xlu0 %v4742_v26, %s10334_s1 }
0x184c   : > { %4774 = vrot.lane.b32.xlu1 %v4744_v27, %s10336_s3  ;;  %s10353_s3 = sld [smem:[#allocation29_spill]] }
0x184f   : > { %4750 = vrot.lane.b32.xlu0 %v4744_v27, %s10334_s1 }
0x1850   : > { %4778 = vrot.lane.b32.xlu1 %v4742_v26, %s10347_s7 }
0x1853   : > { %4754 = vrot.lane.b32.xlu0 %v4742_v26, %s10348_s2 }
0x1854   : > { %4780 = vrot.lane.b32.xlu1 %v4744_v27, %s10347_s7 }
0x1857   : > { %4756 = vrot.lane.b32.xlu0 %v4744_v27, %s10348_s2 }
0x1858   : > { %4784 = vrot.lane.b32.xlu1 %v4742_v26, %s10349_s8 }
0x185b   : > { %4760 = vrot.lane.b32.xlu0 %v4742_v26, %s10339_s0 }
0x185c   : > { %4786 = vrot.lane.b32.xlu1 %v4744_v27, %s10349_s8  ;;  %s8524_s8 = smov 36  }
0x185f   : > { %4762 = vrot.lane.b32.xlu0 %v4744_v27, %s10339_s0  ;;  %s10269_s0 = smov 72  }
0x1860   : > { %4790 = vrot.lane.b32.xlu1 %v4742_v26, %s10326_s18 }
0x1863   : > { %4792 = vrot.lane.b32.xlu0 %v4744_v27, %s10326_s18  ;;  %s10354_s18 = smov 108  }
0x1864   : > { %4810 = vperm.xlu1 %8104, %v4804_v61  }
0x1867   : > { %4815 = vperm.xlu0 %8103, %v4805_v29  }
0x1868   : > { %4820 = vperm.xlu1 %8104, %v4806_v31  }
0x186b   : > { %4825 = vperm.xlu0 %8103, %v4807_v32  }
0x18b6   : > { %v4767_v38 = vpop.permute.xlu1 %4766 }
0x18b7   : > { %7682 = vmatprep.subr.bf16.mxu0 %v4767_v38  ;;  %v8310_v38 = vld [vmem:[%s8754_s21] sm:$0xff]  }
0x18b8   : > { %7683 = vmatpush3.bf16.msra.mxu0 %v4742_v26 }
0x18b9   : > { %v4769_v41 = vpop.permute.xlu0 %4768 }
0x18ba   : > { %7684 = vmatprep.subr.bf16.mxu0 %v4769_v41  ;;  %v4773_v42 = vpop.permute.xlu1 %4772 }
0x18bc   : > { %7685 = vmatpush3.bf16.msra.mxu0 %v4744_v27 }
0x18bd   : > { %v4749_v44 = vpop.permute.xlu0 %4748  ;;  %7686 = vmatprep.subr.bf16.mxu0 %v4773_v42 }
0x18be   : > { %v4775_v45 = vpop.permute.xlu1 %4774 }
0x18c0   : > { %7687 = vmatpush3.bf16.msra.mxu0 %v4749_v44 }
0x18c1   : > { %v4751_v46 = vpop.permute.xlu0 %4750  ;;  %7688 = vmatprep.subr.bf16.mxu0 %v4775_v45 }
0x18c2   : > { %v4779_v34 = vpop.permute.xlu1 %4778 }
0x18c4   : > { %7689 = vmatpush3.bf16.msra.mxu0 %v4751_v46 }
0x18c5   : > { %v4755_v47 = vpop.permute.xlu0 %4754  ;;  %7690 = vmatprep.subr.bf16.mxu0 %v4779_v34 }
0x18c6   : > { %v4781_v9 = vpop.permute.xlu1 %4780 }
0x18c8   : > { %7691 = vmatpush3.bf16.msra.mxu0 %v4755_v47 }
0x18c9   : > { %v4757_v49 = vpop.permute.xlu0 %4756  ;;  %7692 = vmatprep.subr.bf16.mxu0 %v4781_v9 }
0x18ca   : > { %v4785_v37 = vpop.permute.xlu1 %4784 }
0x18cc   : > { %7693 = vmatpush3.bf16.msra.mxu0 %v4757_v49 }
0x18cd   : > { %v4761_v50 = vpop.permute.xlu0 %4760  ;;  %7694 = vmatprep.subr.bf16.mxu0 %v4785_v37 }
0x18ce   : > { %v4787_v33 = vpop.permute.xlu1 %4786 }
0x18d0   : > { %7695 = vmatpush3.bf16.msra.mxu0 %v4761_v50 }
0x18d1   : > { %v4763_v53 = vpop.permute.xlu0 %4762  ;;  %7696 = vmatprep.subr.bf16.mxu0 %v4787_v33 }
0x18d2   : > { %v4791_v55 = vpop.permute.xlu1 %4790 }
0x18d3   : > { %7922 = vmatprep.subr.bf16.mxu1 %v4791_v55 }
0x18d4   : > { %7697 = vmatpush3.bf16.msra.mxu0 %v4763_v53  ;;  %7923 = vmatpush3.bf16.msra.mxu1 %v4791_v55 }
0x18d5   : > { %v4793_v60 = vpop.permute.xlu0 %4792 }
0x18d6   : > { %7924 = vmatprep.subr.bf16.mxu1 %v4793_v60 }
0x18d7   : > { %4897 = vmatmul.mubr.bf16.vlgmr.msra.gmra.mrb[76].mxu0 %v8302_v56  ;;  %v8311_v56 = vld [vmem:[%s8754_s21 + $0x8] sm:$0xff]  }
0x18d8   : > { %7925 = vmatpush3.bf16.msra.mxu1 %v4793_v60  ;;  %4904 = vmatprep.mubr.bf16.mxu0 %v8307_v59  ;;  %v8312_v59 = vld [vmem:[%s8754_s21 + $0x10] sm:$0xff]   ;;  %v8313_v60 = vld [vmem:[%s8754_s21 + $0x18] sm:$0xff]  }
0x18db   : > { %7927 = vmatmul.mubr.msk.bf16.vlgmr.msra.gmra.mrb[88].mxu1 %vm2907_vm3, %v8306_v63  ;;  %v8314_v63 = vld [vmem:[%s10353_s3] sm:$0xff]  }
0x18dc   : > { %7934 = vmatprep.mubr.msk.bf16.mxu1 %vm2907_vm3, %v8310_v38 }
0x18df   : > { %4905 = vmatmul.mubr.bf16.gmra.mrb[80].mxu0 %v8309_v3  ;;  %v8315_v3 = vld [vmem:[%s10353_s3 + $0x8] sm:$0xff]  }
0x18e3   : > { %v4811_v13 = vpop.permute.xlu1 %4810 }
0x18e6   : > { %v4816_v39 = vpop.permute.xlu0 %4815 }
0x18e7   : > { %v4821_v27 = vpop.permute.xlu1 %4820 }
0x18ea   : > { %v4826_v32 = vpop.permute.xlu0 %4825 }
0x19aa   : > { %v7698_v54 = vpop.f32.mrb[76].mxu0 }
0x19ab   : > { %v7699_v24 = vpop.f32.mrb[77].mxu0 }
0x19ac   : > { %v7700_v7 = vadd.f32 %v7699_v24, %v7698_v54  ;;  %v7701_v8 = vpop.f32.mrb[78].mxu0  ;;  %v8316_v54 = vld [vmem:[%s10353_s3 + $0x10] sm:$0xff]   ;;  %v8317_v24 = vld [vmem:[%s10353_s3 + $0x18] sm:$0xff]  }
0x19ad   : > { %v7702_v62 = vpop.f32.mrb[79].mxu0 }
0x19ae   : > { %v7703_v58 = vadd.f32 %v7702_v62, %v7701_v8  ;;  %v7928_v11 = vpop.f32.mrb[88].mxu1  ;;  %v4899_v14 = vadd.f32 %v7700_v7, %v4811_v13  ;;  %v8318_v7 = vld [vmem:[%s10353_s3 + $0x20] sm:$0xff]   ;;  %v8319_v8 = vld [vmem:[%s10353_s3 + $0x28] sm:$0xff]   ;;  %v8320_v13 = vld [vmem:[%s10353_s3 + $0x30] sm:$0xff]  }
0x19af   : > { %v4947_v15 = vpop.f32.mrb[89].mxu1  ;;  %v8321_v62 = vld [vmem:[%s10353_s3 + $0x38] sm:$0xff]  }
0x19b0   : > { %v4948_v48 = vadd.f32 %v4947_v15, %v4899_v14  ;;  %v7929_v52 = vpop.f32.mrb[90].mxu1  ;;  %v4902_v18 = vadd.f32 %v7703_v58, %v4816_v39 }
0x19b1   : > { %v4950_v19 = vpop.f32.mrb[91].mxu1 }
0x19b2   : > { %v4962_v36 = vmax.f32 %v4948_v48, 0.0  ;;  %v4951_v17 = vadd.f32 %v4950_v19, %v4902_v18  ;;  %v7704_v21 = vpop.f32.mrb[80].mxu0  ;;  %v8322_v48 = vld [vmem:[%s10353_s3 + $0x40] sm:$0xff]   ;;  %s10359_s3 = sld [smem:[#allocation14_spill]] }
0x19b3   : > { %v7705_v22 = vpop.f32.mrb[81].mxu0 }
0x19b4   : > { %v4963_v26 = vmax.f32 %v4951_v17, 0.0  ;;  %v7706_v23 = vadd.f32 %v7705_v22, %v7704_v21  ;;  %v7707_v51 = vpop.f32.mrb[82].mxu0  ;;  %v4966_v35 = vmul.f32 %v9439_v30, %v4962_v36  ;;  %v9627_v21 = vld [vmem:[%s8566_s29] ss:$0 sm:$0xff] }
0x19b5   : > { %v7708_v28 = vpop.f32.mrb[83].mxu0  ;;  %v2519_v22 = vmul.f32 %v9627_v21, %v9113_v10 }
0x19b6   : > { %v4967_v61 = vmul.f32 %v9439_v30, %v4963_v26  ;;  %v4907_v29 = vadd.f32 %v7706_v23, %v4821_v27  ;;  %v7709_v31 = vadd.f32 %v7708_v28, %v7707_v51  ;;  %v2518_v23 = vmul.f32 %v9627_v21, %v9111_v12 }
0x19b8   : > { %v4970_v41 = vpack.c.bf16 %v4967_v61, %v4966_v35  ;;  %v4956_v42 = vadd.f32 %v7928_v11, %v4907_v29  ;;  %v4910_v44 = vadd.f32 %v7709_v31, %v4826_v32  ;;  %v2520_v51 = vpack.c.bf16 %v2519_v22, %v2518_v23 }
0x19ba   : > { %v4964_v45 = vmax.f32 %v4956_v42, 0.0  ;;  %v4959_v46 = vadd.f32 %v7929_v52, %v4910_v44  ;;  %4974 = vrot.lane.b32.xlu1 %v4970_v41, %s10343_s5 }
0x19bc   : > { %v4965_v34 = vmax.f32 %v4959_v46, 0.0  ;;  %v4968_v47 = vmul.f32 %v9439_v30, %v4964_v45 }
0x19be   : > { %v4969_v9 = vmul.f32 %v9439_v30, %v4965_v34 }
0x19c0   : > { %v4971_v49 = vpack.c.bf16 %v4969_v9, %v4968_v47 }
0x19c2   : > { %4976 = vrot.lane.b32.xlu0 %v4971_v49, %s10343_s5  ;;  %s10356_s5 = sld [smem:[#allocation34_spill]] }
0x1a2c   : > { %v4975_v37 = vpop.permute.xlu1 %4974 }
0x1a2d   : > { %v4979_v50 = vsel %vm2785_vm13, 0, %v4975_v37 }
0x1a2e   : > { %v4982_v33 = vsel %vm2790_vm6, %v4979_v50, 0  ;;  %7986 = vmatprep.subr.msk.bf16.mxu1 %vm2790_vm6, %v4979_v50  ;;  %v5143_v50 = vld [vmem:[%s10356_s5] sm:$0xff] }
0x1a2f   : > { %7931 = vmatpush3.bf16.msra.mxu1 %v4982_v33 }
0x1a34   : > { %v4977_v53 = vpop.permute.xlu0 %4976 }
0x1a35   : > { %v4981_v55 = vsel %vm2785_vm13, 0, %v4977_v53  ;;  %vm5115_vm13 = vcmask 293888   ;;  %v5144_v53 = vld [vmem:[%s10356_s5 + $0x8] sm:$0xff]  ;;  %s10360_s5 = smov 117  }
0x1a36   : > { %v4984_v30 = vsel %vm2790_vm6, %v4981_v55, 0  ;;  %7987 = vmatprep.subr.msk.bf16.mxu1 %vm2790_vm6, %v4981_v55  ;;  %vm10376_vm6 = vcmask 891904  }
0x1a37   : > { %7933 = vmatpush3.bf16.msra.mxu1 %v4984_v30  ;;  %vm10378_vm8 = vmmov %vm10376_vm6 }
0x1a38   : > { %5202 = vmatprep.subr.bf16.mxu1 %v8500_v43 }
0x1a3a   : > { %7935 = vmatmul.mubr.msk.bf16.vlgmr.msra.gmra.mrb[92].mxu1 %vm2907_vm3, %v8311_v56 }
0x1a3b   : > { %7938 = vmatprep.mubr.msk.bf16.mxu1 %vm2907_vm3, %v8312_v59  ;;  %5203 = vmatpush1.bf16.msra.mxu1 %v8314_v63 }
0x1a3c   : > { %5204 = vmatprep.subr.bf16.mxu1 %v8500_v43 }
0x1a3f   : > { %5205 = vmatpush1.bf16.msra.mxu1 %v8315_v3 }
0x1a40   : > { %5206 = vmatprep.subr.bf16.mxu1 %v8500_v43 }
0x1a42   : > { %7939 = vmatmul.mubr.msk.bf16.gmra.mrb[96].mxu1 %vm2907_vm3, %v8313_v60 }
0x1a43   : > { %5207 = vmatpush1.bf16.msra.mxu1 %v8316_v54  ;;  %v5298_v54 = vld [vmem:[%s10359_s3] sm:$0xff] }
0x1a44   : > { %5208 = vmatprep.subr.bf16.mxu1 %v8500_v43 }
0x1a47   : > { %5209 = vmatpush1.bf16.msra.mxu1 %v8317_v24 }
0x1a48   : > { %5210 = vmatprep.subr.bf16.mxu1 %v8500_v43 }
0x1a4b   : > { %5211 = vmatpush1.bf16.msra.mxu1 %v8318_v7  ;;  %v5299_v7 = vld [vmem:[%s10359_s3 + $0x8] sm:$0xff]  ;;  %s10362_s3 = sld [smem:[#allocation15_spill]] }
0x1a4c   : > { %5212 = vmatprep.subr.bf16.mxu1 %v8500_v43 }
0x1a4f   : > { %5213 = vmatpush1.bf16.msra.mxu1 %v8319_v8 }
0x1a50   : > { %5214 = vmatprep.subr.bf16.mxu1 %v8500_v43 }
0x1a53   : > { %5215 = vmatpush1.bf16.msra.mxu1 %v8320_v13 }
0x1a54   : > { %5216 = vmatprep.subr.bf16.mxu1 %v8500_v43 }
0x1a57   : > { %5217 = vmatpush1.bf16.msra.mxu1 %v8321_v62 }
0x1a58   : > { %5218 = vmatprep.subr.bf16.mxu1 %v8500_v43 }
0x1a5b   : > { %5219 = vmatpush1.bf16.msra.mxu1 %v8322_v48 }
0x1a5c   : > { %7942 = vmatprep.subr.bf16.mxu1 %v8498_v40 }
0x1b0d   : > { %v7936_v58 = vpop.f32.mrb[92].mxu1 }
0x1b0e   : > { %v5060_v11 = vpop.f32.mrb[93].mxu1 }
0x1b0f   : > { %v7937_v14 = vpop.f32.mrb[94].mxu1 }
0x1b10   : > { %v8175_v39 = vpack.i.bf16 %v7937_v14, %v7936_v58  ;;  %v5063_v15 = vpop.f32.mrb[95].mxu1 }
0x1b12   : > { %8176 = vrot.lane.b32.xlu1 %v8175_v39, %s8524_s8  ;;  %s10357_s8 = sld [smem:[#allocation16_spill]] }
0x1b15   : > { %v7940_v52 = vpop.f32.mrb[96].mxu1 }
0x1b16   : > { %v5076_v18 = vpop.f32.mrb[97].mxu1 }
0x1b17   : > { %v7941_v19 = vpop.f32.mrb[98].mxu1 }
0x1b18   : > { %v8185_v36 = vpack.i.bf16 %v7941_v19, %v7940_v52  ;;  %v5079_v17 = vpop.f32.mrb[99].mxu1  ;;  %v8325_v3 = vld [vmem:[%s10357_s8 + $0x4] ss:$12 sps:$4 sm:$0xff]   ;;  %v8323_v23 = vld [vmem:[%s10357_s8] ss:$12 sps:$4 sm:$0xff]  }
0x1b19   : > { %v8180_v26 = vpack.i.bf16 %v5079_v17, %v5076_v18  ;;  %5360 = vmatprep.mubr.bf16.mxu0 %v8325_v3 }
0x1b1a   : > { %8186 = vrot.lane.b32.xlu1 %v8185_v36, %s10354_s18 }
0x1b1b   : > { %8181 = vrot.lane.b32.xlu0 %v8180_v26, %s10269_s0  ;;  %s10358_s0 = smov 106   ;;  %v8326_v26 = vld [vmem:[%s10357_s8 + $0x8] ss:$12 sps:$4 sm:$0xff]   ;;  %s10363_s8 = sld [smem:[#allocation17_spill]] }
0x1b1f   : > { %2522 = vrot.lane.b32.xlu0 %v2520_v51, %s10355_s4 }
0x1b84   : > { %v8177_v27 = vpop.permute.xlu1 %8176 }
0x1b85   : > { %v8179_v28 = vunpack.i.h.bf16 %v8177_v27  ;;  %v8178_v35 = vunpack.i.l.bf16 %v8177_v27 }
0x1b87   : > { %v5116_v41 = vsel %vm5115_vm13, %v5060_v11, %v8178_v35  ;;  %v5117_v42 = vsel %vm5115_vm13, %v5063_v15, %v8179_v28  ;;  %vm10379_vm13 = vcmask 752640  }
0x1b8c   : > { %v8187_v61 = vpop.permute.xlu1 %8186 }
0x1b8d   : > { %v8182_v29 = vpop.permute.xlu0 %8181  ;;  %v8189_v31 = vunpack.i.h.bf16 %v8187_v61  ;;  %v8188_v10 = vunpack.i.l.bf16 %v8187_v61 }
0x1b8e   : > { %v8184_v32 = vunpack.i.h.bf16 %v8182_v29  ;;  %v8183_v38 = vunpack.i.l.bf16 %v8182_v29 }
0x1b8f   : > { %v5124_v12 = vpack.c.bf16 %v8189_v31, %v8188_v10 }
0x1b90   : > { %v5119_v44 = vsel %vm1920_vm12, %v5117_v42, %v8184_v32  ;;  %v5118_v45 = vsel %vm1920_vm12, %v5116_v41, %v8183_v38 }
0x1b91   : > { %v5121_v46 = vsel %vm1530_vm10, %v5118_v45, %v8188_v10  ;;  %v5122_v34 = vsel %vm1530_vm10, %v5119_v44, %v8189_v31  ;;  %v2523_v47 = vpop.permute.xlu0 %2522  ;;  %7288 = vmatprep.mubr.msk.bf16.mxu1 %vm2471_vm14, %v5124_v12 }
0x1b92   : > { %v5123_v9 = vpack.c.bf16 %v5122_v34, %v5121_v46  ;;  %v2525_v49 = vsel %vm2212_vm2, 0, %v2523_v47 }
0x1b93   : > { %v2526_v37 = vsel %vm2420_vm4, %v2525_v49, 0 }
0x1b94   : > { %5235 = vmatmul.mubr.bf16.vlgmr.msra.gmra.mrb[100].mxu1 %v5123_v9  ;;  %5270 = vrot.lane.b32.xlu1 %v2526_v37, %s10334_s1 }
0x1b95   : > { %7946 = vmatprep.mubr.msk.bf16.mxu1 %vm8501_vm0, %v8498_v40 }
0x1c06   : > { %v5271_v24 = vpop.permute.xlu1 %5270 }
0x1c67   : > { %v5236_v33 = vpop.f32.mrb[100].mxu1 }
0x1c68   : > { %v5238_v55 = vpop.f32.mrb[101].mxu1  ;;  %v5237_v56 = vadd.f32 %v5236_v33, %v5143_v50 }
0x1c69   : > { %v5239_v30 = vpop.f32.mrb[102].mxu1  ;;  %v5450_v55 = vld [vmem:[%s10362_s3 + $0x8] sm:$0xff] }
0x1c6a   : > { %v5240_v59 = vadd.f32 %v5239_v30, %v5144_v53  ;;  %v5241_v60 = vpop.f32.mrb[103].mxu1  ;;  %v5449_v30 = vld [vmem:[%s10362_s3] sm:$0xff]  ;;  %s10371_s3 = smov 91  }
0x1c6c   : > { %v5243_v63 = vpack.c.bf16 %v5240_v59, %v5237_v56  ;;  %v8327_v56 = vld [vmem:[%s10363_s8 + $0x4] ss:$8 sps:$4 sm:$0xff]  }
0x1c6e   : > { %5266 = vrot.lane.b32.xlu0 %v5243_v63, %s10358_s0  ;;  %5245 = vrot.lane.b32.xlu1 %v5243_v63, %s10334_s1 }
0x1c72   : > { %5248 = vrot.lane.b32.xlu0 %v5243_v63, %s10348_s2  ;;  %5273 = vrot.lane.b32.xlu1 %v2526_v37, %s10348_s2 }
0x1c76   : > { %5251 = vrot.lane.b32.xlu0 %v5243_v63, %s10330_s15  ;;  %5276 = vrot.lane.b32.xlu1 %v2526_v37, %s10330_s15 }
0x1c7a   : > { %5254 = vrot.lane.b32.xlu0 %v5243_v63, %s10360_s5  ;;  %5279 = vrot.lane.b32.xlu1 %v2526_v37, %s10360_s5 }
0x1c7e   : > { %5257 = vrot.lane.b32.xlu0 %v5243_v63, %s10347_s7  ;;  %5282 = vrot.lane.b32.xlu1 %v2526_v37, %s10347_s7 }
0x1c82   : > { %5260 = vrot.lane.b32.xlu0 %v5243_v63, %s10354_s18  ;;  %5285 = vrot.lane.b32.xlu1 %v2526_v37, %s10354_s18 }
0x1c86   : > { %5263 = vrot.lane.b32.xlu0 %v5243_v63, %s10361_s6  ;;  %5288 = vrot.lane.b32.xlu1 %v2526_v37, %s10361_s6 }
0x1c8a   : > { %5302 = vperm.xlu1 %8104, %v5298_v54   ;;  %5290 = vrot.lane.b32.xlu0 %v5271_v24, %s10361_s6 }
0x1c8e   : > { %5307 = vperm.xlu0 %8103, %v5299_v7  }
0x1ce0   : > { %v5246_v8 = vpop.permute.xlu1 %5245  ;;  %v5267_v13 = vpop.permute.xlu0 %5266 }
0x1ce1   : > { %7720 = vmatprep.subr.bf16.mxu0 %v5267_v13  ;;  %v8329_v13 = vld [vmem:[%s10363_s8] ss:$8 sps:$4 sm:$0xff]   ;;  %s10373_s8 = sld [smem:[#allocation18_spill]] }
0x1ce2   : > { %7721 = vmatpush3.bf16.msra.mxu0 %v5243_v63 }
0x1ce3   : > { %7988 = vmatprep.subr.msk.bf16.mxu0 %vm2420_vm4, %v2525_v49 }
0x1ce4   : > { %v5274_v62 = vpop.permute.xlu1 %5273  ;;  %v5249_v58 = vpop.permute.xlu0 %5248 }
0x1ce6   : > { %7723 = vmatpush3.bf16.msra.mxu0 %v5246_v8 }
0x1ce7   : > { %7724 = vmatprep.subr.bf16.mxu0 %v5271_v24 }
0x1ce8   : > { %v5277_v11 = vpop.permute.xlu1 %5276  ;;  %v5252_v14 = vpop.permute.xlu0 %5251 }
0x1cea   : > { %7725 = vmatpush3.bf16.msra.mxu0 %v5249_v58 }
0x1ceb   : > { %7726 = vmatprep.subr.bf16.mxu0 %v5274_v62 }
0x1cec   : > { %v5280_v39 = vpop.permute.xlu1 %5279  ;;  %v5255_v15 = vpop.permute.xlu0 %5254 }
0x1cee   : > { %7727 = vmatpush3.bf16.msra.mxu0 %v5252_v14 }
0x1cef   : > { %7728 = vmatprep.subr.bf16.mxu0 %v5277_v11  ;;  %v8330_v11 = vld [vmem:[%s8764_s16] sm:$0xff]  }
0x1cf0   : > { %v5283_v48 = vpop.permute.xlu1 %5282  ;;  %v5258_v52 = vpop.permute.xlu0 %5257 }
0x1cf2   : > { %7729 = vmatpush3.bf16.msra.mxu0 %v5255_v15 }
0x1cf3   : > { %7730 = vmatprep.subr.bf16.mxu0 %v5280_v39 }
0x1cf4   : > { %v5286_v18 = vpop.permute.xlu1 %5285  ;;  %v5261_v19 = vpop.permute.xlu0 %5260 }
0x1cf6   : > { %7731 = vmatpush3.bf16.msra.mxu0 %v5258_v52 }
0x1cf7   : > { %7732 = vmatprep.subr.bf16.mxu0 %v5283_v48 }
0x1cf8   : > { %v5289_v36 = vpop.permute.xlu1 %5288  ;;  %v5264_v17 = vpop.permute.xlu0 %5263 }
0x1cf9   : > { %7943 = vmatpush3.bf16.msra.mxu1 %v5289_v36 }
0x1cfa   : > { %7733 = vmatpush3.bf16.msra.mxu0 %v5261_v19  ;;  %7944 = vmatprep.subr.bf16.mxu1 %v8498_v40 }
0x1cfb   : > { %7734 = vmatprep.subr.bf16.mxu0 %v5286_v18 }
0x1cfc   : > { %v5291_v22 = vpop.permute.xlu0 %5290 }
0x1cfd   : > { %7945 = vmatpush3.bf16.msra.mxu1 %v5291_v22 }
0x1cfe   : > { %7735 = vmatpush3.bf16.msra.mxu0 %v5264_v17 }
0x1cff   : > { %5473 = vmatprep.subr.bf16.mxu0 %v8500_v43 }
0x1d00   : > { %7947 = vmatmul.mubr.msk.bf16.vlgmr.msra.gmra.mrb[104].mxu1 %vm2907_vm3, %v8326_v26  ;;  %vm5607_vm3 = vcmask 818176  }
0x1d01   : > { %5361 = vmatmul.mubr.bf16.vlgmr.msra.gmra.mrb[84].mxu0 %v8323_v23  ;;  %7952 = vmatprep.mubr.msk.bf16.mxu1 %vm2471_vm14, %v8330_v11 }
0x1d02   : > { %7295 = vmatprep.mubr.msk.bf16.mxu0 %vm2471_vm14, %v8327_v56 }
0x1d09   : > { %v5303_v32 = vpop.permute.xlu1 %5302 }
0x1d0d   : > { %v5308_v12 = vpop.permute.xlu0 %5307 }
0x1dd3   : > { %v5403_v51 = vpop.f32.mrb[104].mxu1 }
0x1dd4   : > { %v7736_v27 = vpop.f32.mrb[84].mxu0  ;;  %v7948_v28 = vpop.f32.mrb[105].mxu1 }
0x1dd5   : > { %v7737_v35 = vpop.f32.mrb[85].mxu0  ;;  %v5406_v61 = vpop.f32.mrb[106].mxu1  ;;  %v8331_v28 = vld [vmem:[%s8764_s16 + $0x8] sm:$0xff]  }
0x1dd6   : > { %v7738_v29 = vadd.f32 %v7737_v35, %v7736_v27  ;;  %v7739_v31 = vpop.f32.mrb[86].mxu0  ;;  %v7949_v10 = vpop.f32.mrb[107].mxu1 }
0x1dd7   : > { %v7740_v38 = vpop.f32.mrb[87].mxu0 }
0x1dd8   : > { %v7741_v41 = vadd.f32 %v7740_v38, %v7739_v31  ;;  %v5363_v42 = vadd.f32 %v7738_v29, %v5303_v32 }
0x1dda   : > { %v5404_v44 = vadd.f32 %v5403_v51, %v5363_v42  ;;  %v5366_v45 = vadd.f32 %v7741_v41, %v5308_v12 }
0x1ddc   : > { %v5410_v46 = vmax.f32 %v5404_v44, 0.0  ;;  %v5407_v34 = vadd.f32 %v5406_v61, %v5366_v45 }
0x1dde   : > { %v5411_v47 = vmax.f32 %v5407_v34, 0.0  ;;  %v5412_v9 = vmul.f32 %v9627_v21, %v5410_v46 }
0x1de0   : > { %v5413_v49 = vmul.f32 %v9627_v21, %v5411_v47 }
0x1de2   : > { %v5414_v37 = vpack.c.bf16 %v5413_v49, %v5412_v9 }
0x1de4   : > { %5416 = vrot.lane.b32.xlu1 %v5414_v37, %s10355_s4 }
0x1e56   : > { %v5417_v50 = vpop.permute.xlu1 %5416 }
0x1e57   : > { %v5419_v33 = vsel %vm2212_vm2, 0, %v5417_v50 }
0x1e58   : > { %v5420_v53 = vsel %vm2420_vm4, %v5419_v33, 0 }
0x1e59   : > { %5426 = vrot.lane.b32.xlu1 %v5420_v53, %s10348_s2  ;;  %5423 = vrot.lane.b32.xlu0 %v5420_v53, %s10334_s1 }
0x1e5a   : > { %5474 = vmatpush1.bf16.msra.mxu0 %v5420_v53 }
0x1e5b   : > { %5475 = vmatprep.subr.bf16.mxu0 %v8500_v43 }
0x1e5d   : > { %5432 = vrot.lane.b32.xlu1 %v5420_v53, %s10360_s5  ;;  %5429 = vrot.lane.b32.xlu0 %v5420_v53, %s10330_s15  ;;  %s8526_s15 = smov 100   ;;  %s10367_s5 = smov 109  }
0x1e61   : > { %5438 = vrot.lane.b32.xlu1 %v5420_v53, %s10354_s18  ;;  %5435 = vrot.lane.b32.xlu0 %v5420_v53, %s10347_s7  ;;  %s10365_s7 = smov 72  }
0x1e65   : > { %5444 = vrot.lane.b32.xlu1 %v5420_v53, %s10358_s0  ;;  %5441 = vrot.lane.b32.xlu0 %v5420_v53, %s10361_s6  ;;  %s10364_s6 = sld [smem:[#allocation30_spill]]  ;;  %s10366_s0 = smov 19  }
0x1e69   : > { %5458 = vperm.xlu1 %8104, %v5450_v55   ;;  %5453 = vperm.xlu0 %8103, %v5449_v30  }
0x1e6b   : > { %v8334_v35 = vld [vmem:[%s10364_s6 + $0x4] ss:$12 sps:$4 sm:$0xff]   ;;  %v8337_v61 = vld [vmem:[%s10364_s6 + $0x1c] ss:$12 sps:$4 sm:$0xff]   ;;  %v8340_v31 = vld [vmem:[%s10364_s6 + $0x34] ss:$12 sps:$4 sm:$0xff]  }
0x1e6c   : > { %v8335_v29 = vld [vmem:[%s10364_s6 + $0x18] ss:$12 sps:$4 sm:$0xff]   ;;  %v8359_v10 = vld [vmem:[%s10364_s6 + $0xc8] ss:$12 sps:$4 sm:$0xff]   ;;  %v8338_v38 = vld [vmem:[%s10364_s6 + $0x30] ss:$12 sps:$4 sm:$0xff]  }
0x1e6d   : > { %v8360_v32 = vld [vmem:[%s10364_s6 + $0x8] ss:$12 sps:$4 sm:$0xff]   ;;  %v8364_v41 = vld [vmem:[%s10364_s6 + $0xe0] ss:$12 sps:$4 sm:$0xff]   ;;  %v8369_v44 = vld [vmem:[%s10364_s6 + $0xf8] ss:$12 sps:$4 sm:$0xff]  }
0x1e6e   : > { %v8343_v42 = vld [vmem:[%s10364_s6 + $0x4c] ss:$12 sps:$4 sm:$0xff]   ;;  %v8341_v45 = vld [vmem:[%s10364_s6 + $0x48] ss:$12 sps:$4 sm:$0xff]   ;;  %v8346_v46 = vld [vmem:[%s10364_s6 + $0x64] ss:$12 sps:$4 sm:$0xff]  }
0x1e6f   : > { %v8365_v12 = vld [vmem:[%s10364_s6 + $0x20] ss:$12 sps:$4 sm:$0xff]   ;;  %v8370_v34 = vld [vmem:[%s10364_s6 + $0x38] ss:$12 sps:$4 sm:$0xff]   ;;  %v8374_v47 = vld [vmem:[%s10364_s6 + $0x110] ss:$12 sps:$4 sm:$0xff]  }
0x1e70   : > { %v8344_v9 = vld [vmem:[%s10364_s6 + $0x60] ss:$12 sps:$4 sm:$0xff]   ;;  %v8349_v49 = vld [vmem:[%s10364_s6 + $0x7c] ss:$12 sps:$4 sm:$0xff]   ;;  %v8347_v33 = vld [vmem:[%s10364_s6 + $0x78] ss:$12 sps:$4 sm:$0xff]  }
0x1e71   : > { %v8375_v37 = vld [vmem:[%s10364_s6 + $0x50] ss:$12 sps:$4 sm:$0xff]   ;;  %v8379_v50 = vld [vmem:[%s10364_s6 + $0x128] ss:$12 sps:$4 sm:$0xff]   ;;  %v8384_v30 = vld [vmem:[%s10364_s6 + $0x140] ss:$12 sps:$4 sm:$0xff]  }
0x1e72   : > { %v8352_v53 = vld [vmem:[%s10364_s6 + $0x94] ss:$12 sps:$4 sm:$0xff]   ;;  %v8350_v56 = vld [vmem:[%s10364_s6 + $0x90] ss:$12 sps:$4 sm:$0xff]   ;;  %v8373_v11 = vld [vmem:[%s10364_s6 + $0x10c] ss:$12 sps:$4 sm:$0xff]  }
0x1e73   : > { %v8380_v55 = vld [vmem:[%s10364_s6 + $0x68] ss:$12 sps:$4 sm:$0xff]  }
0x1ecb   : > { %v5424_v59 = vpop.permute.xlu0 %5423  ;;  %v5427_v60 = vpop.permute.xlu1 %5426 }
0x1ecc   : > { %5476 = vmatpush1.bf16.msra.mxu0 %v5424_v59  ;;  %v8355_v59 = vld [vmem:[%s10364_s6 + $0xac] ss:$12 sps:$4 sm:$0xff]  }
0x1ecd   : > { %5477 = vmatprep.subr.bf16.mxu0 %v8500_v43 }
0x1ecf   : > { %v5430_v63 = vpop.permute.xlu0 %5429  ;;  %v5433_v3 = vpop.permute.xlu1 %5432 }
0x1ed0   : > { %5478 = vmatpush1.bf16.msra.mxu0 %v5427_v60  ;;  %v8385_v60 = vld [vmem:[%s10364_s6 + $0x80] ss:$12 sps:$4 sm:$0xff]  }
0x1ed1   : > { %5479 = vmatprep.subr.bf16.mxu0 %v8500_v43 }
0x1ed3   : > { %v5436_v54 = vpop.permute.xlu0 %5435  ;;  %v5439_v24 = vpop.permute.xlu1 %5438 }
0x1ed4   : > { %5480 = vmatpush1.bf16.msra.mxu0 %v5430_v63  ;;  %v8389_v63 = vld [vmem:[%s10364_s6 + $0x158] ss:$12 sps:$4 sm:$0xff]  }
0x1ed5   : > { %5481 = vmatprep.subr.bf16.mxu0 %v8500_v43 }
0x1ed7   : > { %v5442_v7 = vpop.permute.xlu0 %5441  ;;  %v5445_v8 = vpop.permute.xlu1 %5444 }
0x1ed8   : > { %5482 = vmatpush1.bf16.msra.mxu0 %v5433_v3  ;;  %v8353_v3 = vld [vmem:[%s10364_s6 + $0xa8] ss:$12 sps:$4 sm:$0xff]  }
0x1ed9   : > { %5483 = vmatprep.subr.bf16.mxu0 %v8500_v43 }
0x1edc   : > { %5484 = vmatpush1.bf16.msra.mxu0 %v5436_v54  ;;  %v8358_v54 = vld [vmem:[%s10364_s6 + $0xc4] ss:$12 sps:$4 sm:$0xff]  }
0x1edd   : > { %5485 = vmatprep.subr.bf16.mxu0 %v8500_v43 }
0x1ee0   : > { %5486 = vmatpush1.bf16.msra.mxu0 %v5439_v24  ;;  %v8390_v24 = vld [vmem:[%s10364_s6 + $0x98] ss:$12 sps:$4 sm:$0xff]  }
0x1ee1   : > { %5487 = vmatprep.subr.bf16.mxu0 %v8500_v43 }
0x1ee4   : > { %5488 = vmatpush1.bf16.msra.mxu0 %v5442_v7  ;;  %v8356_v7 = vld [vmem:[%s10364_s6 + $0xc0] ss:$12 sps:$4 sm:$0xff]  }
0x1ee5   : > { %5489 = vmatprep.subr.bf16.mxu0 %v8500_v43 }
0x1ee8   : > { %5490 = vmatpush1.bf16.msra.mxu0 %v5445_v8  ;;  %v5454_v62 = vpop.permute.xlu0 %5453  ;;  %v5459_v15 = vpop.permute.xlu1 %5458  ;;  %v8363_v8 = vld [vmem:[%s10364_s6 + $0xdc] ss:$12 sps:$4 sm:$0xff]  }
0x1ee9   : > { %7748 = vmatprep.subr.bf16.mxu0 %v8359_v10 }
0x1eeb   : > { %5506 = vmatmul.mubr.bf16.vlgmr.msra.gmra.mrb[88].mxu0 %v8329_v13  ;;  %v8361_v13 = vld [vmem:[%s10364_s6 + $0xd8] ss:$12 sps:$4 sm:$0xff]  }
0x1eec   : > { %7749 = vmatpush3.bf16.msra.mxu0 %v8360_v32 }
0x1eed   : > { %7750 = vmatprep.subr.bf16.mxu0 %v8364_v41 }
0x1ef0   : > { %7751 = vmatpush3.bf16.msra.mxu0 %v8365_v12 }
0x1ef1   : > { %7752 = vmatprep.subr.bf16.mxu0 %v8369_v44  ;;  %v8396_v44 = vld [vmem:[%s10364_s6 + $0x180] ss:$12 sps:$4 sm:$0xff]  }
0x1ef4   : > { %7753 = vmatpush3.bf16.msra.mxu0 %v8370_v34 }
0x1ef5   : > { %7754 = vmatprep.subr.bf16.mxu0 %v8374_v47 }
0x1ef8   : > { %7755 = vmatpush3.bf16.msra.mxu0 %v8375_v37  ;;  %v8400_v37 = vld [vmem:[%s10364_s6 + $0x198] ss:$12 sps:$4 sm:$0xff]  }
0x1ef9   : > { %7756 = vmatprep.subr.bf16.mxu0 %v8379_v50  ;;  %v8403_v50 = vld [vmem:[%s10364_s6 + $0x1a0] ss:$12 sps:$4 sm:$0xff]  }
0x1efc   : > { %7757 = vmatpush3.bf16.msra.mxu0 %v8380_v55 }
0x1efd   : > { %7758 = vmatprep.subr.bf16.mxu0 %v8384_v30 }
0x1f00   : > { %7759 = vmatpush3.bf16.msra.mxu0 %v8385_v60  ;;  %v8404_v60 = vld [vmem:[%s10364_s6 + $0x1b0] ss:$12 sps:$4 sm:$0xff]  }
0x1f01   : > { %7760 = vmatprep.subr.bf16.mxu0 %v8389_v63  ;;  %v8407_v63 = vld [vmem:[%s10364_s6 + $0x1b8] ss:$12 sps:$4 sm:$0xff]  }
0x1f04   : > { %7761 = vmatpush3.bf16.msra.mxu0 %v8390_v24  ;;  %v8410_v24 = vld [vmem:[%s10364_s6 + $0x1cc] ss:$12 sps:$4 sm:$0xff]  }
0x1fbe   : > { %v5507_v58 = vpop.f32.mrb[88].mxu0 }
0x1fbf   : > { %v5508_v14 = vadd.f32 %v5507_v58, %v5454_v62  ;;  %v5509_v39 = vpop.f32.mrb[89].mxu0  ;;  %v8368_v62 = vld [vmem:[%s10364_s6 + $0xf4] ss:$12 sps:$4 sm:$0xff]   ;;  %v8366_v58 = vld [vmem:[%s10364_s6 + $0xf0] ss:$12 sps:$4 sm:$0xff]  }
0x1fc0   : > { %v5510_v48 = vpop.f32.mrb[90].mxu0  ;;  %v8378_v39 = vld [vmem:[%s10364_s6 + $0x124] ss:$12 sps:$4 sm:$0xff]  }
0x1fc1   : > { %v5514_v52 = vmax.f32 %v5508_v14, 0.0  ;;  %v5511_v18 = vadd.f32 %v5510_v48, %v5459_v15  ;;  %v5512_v19 = vpop.f32.mrb[91].mxu0  ;;  %v8371_v14 = vld [vmem:[%s10364_s6 + $0x108] ss:$12 sps:$4 sm:$0xff]   ;;  %v8376_v15 = vld [vmem:[%s10364_s6 + $0x120] ss:$12 sps:$4 sm:$0xff]  }
0x1fc2   : > { %v8383_v48 = vld [vmem:[%s10364_s6 + $0x13c] ss:$12 sps:$4 sm:$0xff]  }
0x1fc3   : > { %v5515_v36 = vmax.f32 %v5511_v18, 0.0  ;;  %v5516_v17 = vmul.f32 %v9627_v21, %v5514_v52  ;;  %v8381_v52 = vld [vmem:[%s10364_s6 + $0x138] ss:$12 sps:$4 sm:$0xff]   ;;  %v8388_v18 = vld [vmem:[%s10364_s6 + $0x154] ss:$12 sps:$4 sm:$0xff]  }
0x1fc4   : > { %v8386_v19 = vld [vmem:[%s10364_s6 + $0x150] ss:$12 sps:$4 sm:$0xff]  }
0x1fc5   : > { %v5517_v22 = vmul.f32 %v9627_v21, %v5515_v36  ;;  %v8332_v21 = vld [vmem:[%s10364_s6] ss:$12 sps:$4 sm:$0xff]   ;;  %v8391_v36 = vld [vmem:[%s10364_s6 + $0x168] ss:$12 sps:$4 sm:$0xff]  }
0x1fc7   : > { %v5518_v26 = vpack.c.bf16 %v5517_v22, %v5516_v17  ;;  %v8393_v17 = vld [vmem:[%s10364_s6 + $0x16c] ss:$12 sps:$4 sm:$0xff]   ;;  %v8394_v22 = vld [vmem:[%s10364_s6 + $0x170] ss:$12 sps:$4 sm:$0xff]  }
0x1fc8   : > { %7762 = vmatprep.subr.bf16.mxu0 %v8394_v22  ;;  %v8428_v22 = vld [vmem:[%s10364_s6 + $0x240] ss:$12 sps:$4 sm:$0xff]  }
0x1fc9   : > { %5520 = vrot.lane.b32.xlu0 %v5518_v26, %s10355_s4  ;;  %v8395_v26 = vld [vmem:[%s10364_s6 + $0xb0] ss:$12 sps:$4 sm:$0xff]   ;;  %s8527_s4 = smov 44  }
0x1fca   : > { %7763 = vmatpush3.bf16.msra.mxu0 %v8395_v26  ;;  %v8431_v26 = vld [vmem:[%s10364_s6 + $0x248] ss:$12 sps:$4 sm:$0xff]  }
0x1fcb   : > { %6244 = vmatprep.subr.bf16.mxu0 %v8500_v43 }
0x203b   : > { %v5521_v23 = vpop.permute.xlu0 %5520 }
0x203c   : > { %v5523_v51 = vsel %vm2212_vm2, 0, %v5521_v23  ;;  %v8398_v23 = vld [vmem:[%s10364_s6 + $0x184] ss:$12 sps:$4 sm:$0xff]   ;;  %vm5610_vm2 = vcmask 359424  }
0x203d   : > { %v5524_v27 = vsel %vm2420_vm4, %v5523_v51, 0  ;;  %7989 = vmatprep.subr.msk.bf16.mxu1 %vm2420_vm4, %v5523_v51  ;;  %v2018_v51 = vmul.f32 %v9023_v2, %v8936_v20 }
0x203e   : > { %7951 = vmatpush3.bf16.msra.mxu1 %v5524_v27 }
0x203f   : > { %6122 = vmatprep.subr.bf16.mxu1 %v8334_v35  ;;  %v2021_v35 = vpack.c.bf16 %v2018_v51, %v2018_v51 }
0x2041   : > { %7953 = vmatmul.mubr.msk.bf16.vlgmr.msra.gmra.mrb[108].mxu1 %vm2471_vm14, %v8331_v28 }
0x2042   : > { %6123 = vmatpush1.bf16.msra.mxu1 %v8332_v21 }
0x2043   : > { %6124 = vmatprep.subr.bf16.mxu1 %v8337_v61 }
0x2046   : > { %6125 = vmatpush1.bf16.msra.mxu1 %v8335_v29  ;;  %v2017_v29 = vmul.f32 %v9021_v0, %v8934_v16 }
0x2047   : > { %6126 = vmatprep.subr.bf16.mxu1 %v8340_v31  ;;  %v2019_v31 = vmul.f32 %v9016_v57, %v8938_v25 }
0x2048   : > { %v2020_v2 = vpack.c.bf16 %v2017_v29, %v2017_v29 }
0x2049   : > { %v2022_v10 = vpack.c.bf16 %v2019_v31, %v2019_v31 }
0x204a   : > { %6127 = vmatpush1.bf16.msra.mxu1 %v8338_v38 }
0x204b   : > { %6128 = vmatprep.subr.bf16.mxu1 %v8343_v42 }
0x204e   : > { %6129 = vmatpush1.bf16.msra.mxu1 %v8341_v45  ;;  %v8399_v45 = vld [vmem:[%s10364_s6 + $0x188] ss:$12 sps:$4 sm:$0xff]  }
0x204f   : > { %6130 = vmatprep.subr.bf16.mxu1 %v8346_v46  ;;  %v8402_v46 = vld [vmem:[%s10364_s6 + $0x19c] ss:$12 sps:$4 sm:$0xff]  }
0x2052   : > { %6131 = vmatpush1.bf16.msra.mxu1 %v8344_v9 }
0x2053   : > { %6132 = vmatprep.subr.bf16.mxu1 %v8349_v49 }
0x2056   : > { %6133 = vmatpush1.bf16.msra.mxu1 %v8347_v33 }
0x2057   : > { %6134 = vmatprep.subr.bf16.mxu1 %v8352_v53  ;;  %v8406_v53 = vld [vmem:[%s10364_s6 + $0x1b4] ss:$12 sps:$4 sm:$0xff]  }
0x205a   : > { %6135 = vmatpush1.bf16.msra.mxu1 %v8350_v56 }
0x205b   : > { %6136 = vmatprep.subr.bf16.mxu1 %v8355_v59 }
0x205e   : > { %6137 = vmatpush1.bf16.msra.mxu1 %v8353_v3 }
0x205f   : > { %6138 = vmatprep.subr.bf16.mxu1 %v8358_v54 }
0x2062   : > { %6139 = vmatpush1.bf16.msra.mxu1 %v8356_v7  ;;  %v8408_v7 = vld [vmem:[%s10364_s6 + $0x1c8] ss:$12 sps:$4 sm:$0xff]  }
0x2063   : > { %6140 = vmatprep.subr.bf16.mxu1 %v8363_v8  ;;  %v8411_v8 = vld [vmem:[%s10364_s6 + $0x1d0] ss:$12 sps:$4 sm:$0xff]  }
0x2066   : > { %6141 = vmatpush1.bf16.msra.mxu1 %v8361_v13  ;;  %v8414_v13 = vld [vmem:[%s10364_s6 + $0x1e4] ss:$12 sps:$4 sm:$0xff]  }
0x2067   : > { %6142 = vmatprep.subr.bf16.mxu1 %v8368_v62  ;;  %v8412_v62 = vld [vmem:[%s10364_s6 + $0x1e0] ss:$12 sps:$4 sm:$0xff]  }
0x206a   : > { %6143 = vmatpush1.bf16.msra.mxu1 %v8366_v58  ;;  %v8415_v58 = vld [vmem:[%s10364_s6 + $0x1e8] ss:$12 sps:$4 sm:$0xff]  }
0x206b   : > { %6144 = vmatprep.subr.bf16.mxu1 %v8373_v11  ;;  %v8418_v11 = vld [vmem:[%s10364_s6 + $0x1fc] ss:$12 sps:$4 sm:$0xff]  }
0x206e   : > { %6145 = vmatpush1.bf16.msra.mxu1 %v8371_v14  ;;  %v8416_v14 = vld [vmem:[%s10364_s6 + $0x1f8] ss:$12 sps:$4 sm:$0xff]  }
0x206f   : > { %6146 = vmatprep.subr.bf16.mxu1 %v8378_v39  ;;  %v8419_v39 = vld [vmem:[%s10364_s6 + $0x200] ss:$12 sps:$4 sm:$0xff]  }
0x2072   : > { %6147 = vmatpush1.bf16.msra.mxu1 %v8376_v15  ;;  %v8422_v15 = vld [vmem:[%s10364_s6 + $0x214] ss:$12 sps:$4 sm:$0xff]  }
0x2073   : > { %6148 = vmatprep.subr.bf16.mxu1 %v8383_v48  ;;  %v8420_v48 = vld [vmem:[%s10364_s6 + $0x210] ss:$12 sps:$4 sm:$0xff]  }
0x2076   : > { %6149 = vmatpush1.bf16.msra.mxu1 %v8381_v52  ;;  %v8423_v52 = vld [vmem:[%s10364_s6 + $0x218] ss:$12 sps:$4 sm:$0xff]  }
0x2077   : > { %6150 = vmatprep.subr.bf16.mxu1 %v8388_v18  ;;  %v8426_v18 = vld [vmem:[%s10364_s6 + $0x22c] ss:$12 sps:$4 sm:$0xff]  }
0x207a   : > { %6151 = vmatpush1.bf16.msra.mxu1 %v8386_v19  ;;  %v8424_v19 = vld [vmem:[%s10364_s6 + $0x228] ss:$12 sps:$4 sm:$0xff]  }
0x207b   : > { %6152 = vmatprep.subr.bf16.mxu1 %v8393_v17  ;;  %v8430_v17 = vld [vmem:[%s10364_s6 + $0x244] ss:$12 sps:$4 sm:$0xff]  }
0x207e   : > { %6153 = vmatpush1.bf16.msra.mxu1 %v8391_v36  ;;  %v8427_v36 = vld [vmem:[%s10364_s6 + $0x230] ss:$12 sps:$4 sm:$0xff]   ;;  %s10372_s6 = sld [smem:[#allocation20_spill]] }
0x207f   : > { %6163 = vmatprep.subr.bf16.mxu1 %v8398_v23 }
0x2114   : > { %v7954_v27 = vpop.f32.mrb[108].mxu1 }
0x2115   : > { %5600 = vrot.lane.b32.xlu0 %v7954_v27, %s10365_s7  ;;  %v5580_v28 = vpop.f32.mrb[109].mxu1  ;;  %s10368_s7 = smov 92  }
0x2116   : > { %v7955_v21 = vpop.f32.mrb[110].mxu1 }
0x2117   : > { %v5583_v61 = vpop.f32.mrb[111].mxu1 }
0x2118   : > { %5596 = vrot.lane.b32.xlu1 %v5583_v61, %s8526_s15  ;;  %s10369_s15 = smov 90  }
0x2119   : > { %2028 = vrot.lane.b32.xlu0 %v2021_v35, %s10366_s0 }
0x211c   : > { %5604 = vrot.lane.b32.xlu1 %v7955_v21, %s8527_s4  ;;  %s10370_s4 = smov 110  }
0x211d   : > { %2026 = vrot.lane.b32.xlu0 %v2020_v2, %s10366_s0 }
0x2120   : > { %2030 = vrot.lane.b32.xlu1 %v2022_v10, %s10366_s0 }
0x2187   : > { %v9768_v32 = vpop.permute.xlu0 %5600 }
0x218a   : > { %v5597_v0 = vpop.permute.xlu1 %5596 }
0x218b   : > { %v5608_v38 = vsel %vm5607_vm3, %v5580_v28, %v5597_v0  ;;  %v5609_v41 = vsel %vm1920_vm12, %v5597_v0, %v9768_v32  ;;  %v2029_v42 = vpop.permute.xlu0 %2028  ;;  %vm10380_vm3 = vmmov %vm10377_vm5 }
0x218c   : > { %v5612_v57 = vpack.c.bf16 %v5608_v38, %v5608_v38  ;;  %v5613_v12 = vpack.c.bf16 %v5609_v41, %v5609_v41 }
0x218e   : > { %6154 = vmatprep.mubr.bf16.mxu1 %v5613_v12  ;;  %6236 = vmatprep.mubr.bf16.mxu0 %v5613_v12  ;;  %v9775_v34 = vpop.permute.xlu1 %5604  ;;  %v5718_v12 = vld [vmem:[%s8759_s10 + $0x10] sm:$0xff] }
0x218f   : > { %v5615_v47 = vpack.c.bf16 %v9775_v34, %v9775_v34  ;;  %6155 = vmatmul.mubr.bf16.vlgmr.msra.gmra.mrb[112].mxu1 %v5612_v57  ;;  %6237 = vmatmul.mubr.bf16.vlgmr.msra.gmra.mrb[92].mxu0 %v5612_v57  ;;  %v2027_v9 = vpop.permute.xlu0 %2026  ;;  %v5611_v23 = vsel %vm5610_vm2, %v9768_v32, %v9775_v34  ;;  %vm10381_vm2 = vcmask 736256  }
0x2190   : > { %6164 = vmatpush1.bf16.msra.mxu1 %v8396_v44  ;;  %6245 = vmatpush1.bf16.msra.mxu0 %v8399_v45  ;;  %v9780_v49 = vsel %vm1788_vm11, %v2027_v9, %v2029_v42  ;;  %v9790_v55 = vsel %vm1788_vm11, 0, %v2027_v9  ;;  %v5614_v51 = vpack.c.bf16 %v5611_v23, %v5611_v23  ;;  %v5716_v44 = vld [vmem:[%s8759_s10] sm:$0xff] }
0x2191   : > { %v9785_v33 = vrot.slane %v9780_v49, 4  ;;  %6165 = vmatprep.subr.bf16.mxu1 %v8402_v46  ;;  %6246 = vmatprep.subr.bf16.mxu0 %v8500_v43  ;;  %v9803_v3 = vrot.slane %v9790_v55, 4 }
0x2192   : > { %v2031_v30 = vpop.permute.xlu1 %2030  ;;  %7375 = vmatprep.mubr.msk.bf16.mxu1 %vm2471_vm14, %v5615_v47  ;;  %7376 = vmatprep.mubr.msk.bf16.mxu0 %vm2471_vm14, %v5615_v47 }
0x2193   : > { %v2033_v56 = vsel %vm1788_vm11, %v2029_v42, %v2031_v30  ;;  %6508 = vrot.lane.b32.xlu1 %v9785_v33, %s10334_s1 }
0x2194   : > { %v9798_v59 = vsel %vm1795_vm7, %v2033_v56, 0  ;;  %6166 = vmatpush1.bf16.msra.mxu1 %v8400_v37  ;;  %6247 = vmatpush1.bf16.msra.mxu0 %v8403_v50 }
0x2195   : > { %v9806_v54 = vrot.slane %v9798_v59, 4  ;;  %6167 = vmatprep.subr.bf16.mxu1 %v8406_v53  ;;  %6248 = vmatprep.subr.bf16.mxu0 %v8500_v43 }
0x2197   : > { %6510 = vrot.lane.b32.xlu0 %v9806_v54, %s10334_s1  ;;  %6506 = vrot.lane.b32.xlu1 %v9803_v3, %s10334_s1 }
0x2198   : > { %6168 = vmatpush1.bf16.msra.mxu1 %v8404_v60  ;;  %6249 = vmatpush1.bf16.msra.mxu0 %v8407_v63 }
0x2199   : > { %6169 = vmatprep.subr.bf16.mxu1 %v8410_v24  ;;  %6250 = vmatprep.subr.bf16.mxu0 %v8500_v43 }
0x219b   : > { %6364 = vrot.lane.b32.xlu0 %v9780_v49, %s10334_s1  ;;  %6366 = vrot.lane.b32.xlu1 %v9798_v59, %s10334_s1 }
0x219c   : > { %6170 = vmatpush1.bf16.msra.mxu1 %v8408_v7  ;;  %6251 = vmatpush1.bf16.msra.mxu0 %v8411_v8  ;;  %v5717_v7 = vld [vmem:[%s8759_s10 + $0x8] sm:$0xff] }
0x219d   : > { %6171 = vmatprep.subr.bf16.mxu1 %v8414_v13  ;;  %6252 = vmatprep.subr.bf16.mxu0 %v8500_v43 }
0x219f   : > { %6372 = vrot.lane.b32.xlu0 %v9785_v33, %s10348_s2  ;;  %6374 = vrot.lane.b32.xlu1 %v9806_v54, %s10348_s2 }
0x21a0   : > { %6172 = vmatpush1.bf16.msra.mxu1 %v8412_v62  ;;  %6253 = vmatpush1.bf16.msra.mxu0 %v8415_v58 }
0x21a1   : > { %6173 = vmatprep.subr.bf16.mxu1 %v8418_v11  ;;  %6254 = vmatprep.subr.bf16.mxu0 %v8500_v43 }
0x21a4   : > { %6174 = vmatpush1.bf16.msra.mxu1 %v8416_v14  ;;  %6255 = vmatpush1.bf16.msra.mxu0 %v8419_v39  ;;  %v9936_v14 = vld [vmem:[%s10372_s6] sm:$0xff] }
0x21a5   : > { %6175 = vmatprep.subr.bf16.mxu1 %v8422_v15  ;;  %6256 = vmatprep.subr.bf16.mxu0 %v8500_v43  ;;  %v7378_v39 = vcombine.high %v9936_v14, %v9936_v14 }
0x21a8   : > { %6176 = vmatpush1.bf16.msra.mxu1 %v8420_v48  ;;  %6257 = vmatpush1.bf16.msra.mxu0 %v8423_v52 }
0x21a9   : > { %6177 = vmatprep.subr.bf16.mxu1 %v8426_v18  ;;  %6258 = vmatprep.subr.bf16.mxu0 %v8500_v43 }
0x21ac   : > { %6178 = vmatpush1.bf16.msra.mxu1 %v8424_v19  ;;  %6259 = vmatpush1.bf16.msra.mxu0 %v8427_v36  ;;  %v6536_v19 = vld [vmem:[%s10373_s8] sm:$0xff]  ;;  %s10391_s8 = sld [smem:[#allocation19_spill]] }
0x21ad   : > { %6179 = vmatprep.subr.bf16.mxu1 %v8430_v17  ;;  %6260 = vmatprep.subr.bf16.mxu0 %v8500_v43 }
0x21b0   : > { %6180 = vmatpush1.bf16.msra.mxu1 %v8428_v22  ;;  %6261 = vmatpush1.bf16.msra.mxu0 %v8431_v26 }
0x21b1   : > { %6592 = vmatprep.subr.bf16.mxu1 %v8500_v43 }
0x21b3   : > { %6196 = vmatmul.mubr.bf16.vlgmr.msra.gmra.mrb[112].mxu1 %v5614_v51  ;;  %6277 = vmatmul.mubr.bf16.vlgmr.msra.gmra.mrb[96].mxu0 %v5614_v51 }
0x21b4   : > { %7380 = vmatprep.mubr.msk.bf16.mxu1 %vm2471_vm14, %v7378_v39  ;;  %7379 = vmatprep.mubr.msk.bf16.mxu0 %vm2471_vm14, %v7378_v39  ;;  %vm10374_vm14 = vcmask 900096  }
0x21b5   : > { %vm10375_vm4 = vmmov %vm10374_vm14 }
0x2205   : > { %v9848_v27 = vpop.permute.xlu1 %6508 }
0x2209   : > { %v9850_v28 = vpop.permute.xlu1 %6506  ;;  %v9852_v21 = vpop.permute.xlu0 %6510 }
0x220a   : > { %v6513_v15 = vsel %vm1449_vm1, %v9848_v27, %v9852_v21  ;;  %v6520_v48 = vsel %vm1637_vm15, %v9798_v59, %v9852_v21  ;;  %v6512_v18 = vsel %vm1449_vm1, %v9850_v28, %v9848_v27 }
0x220b   : > { %v6518_v52 = vsel %vm1637_vm15, %v9780_v49, %v6513_v15  ;;  %v6515_v36 = vsel %vm1637_vm15, %v9790_v55, %v6512_v18 }
0x220d   : > { %v9854_v35 = vpop.permute.xlu1 %6366  ;;  %v9856_v61 = vpop.permute.xlu0 %6364 }
0x220e   : > { %v6369_v2 = vsel %vm1449_vm1, %v9856_v61, %v9854_v35 }
0x2211   : > { %v9858_v29 = vpop.permute.xlu1 %6374  ;;  %v9860_v31 = vpop.permute.xlu0 %6372 }
0x2212   : > { %v6377_v10 = vsel %vm1485_vm9, %v9860_v31, %v9858_v29 }
0x2213   : > { %v9869_v32 = vsel %vm1637_vm15, %v6369_v2, %v6377_v10 }
0x2262   : > { %v7764_v0 = vpop.f32.mrb[92].mxu0 }
0x2263   : > { %v7765_v38 = vpop.f32.mrb[93].mxu0 }
0x2264   : > { %v7766_v41 = vadd.f32 %v7765_v38, %v7764_v0  ;;  %v7767_v42 = vpop.f32.mrb[94].mxu0 }
0x2265   : > { %v7768_v57 = vpop.f32.mrb[95].mxu0 }
0x2266   : > { %v6239_v45 = vadd.f32 %v7766_v41, %v5718_v12 }
0x2286   : > { %v6197_v46 = vpop.f32.mrb[112].mxu1  ;;  %v6278_v34 = vpop.f32.mrb[96].mxu0 }
0x2287   : > { %v7976_v47 = vadd.f32 %v6197_v46, %v5716_v44  ;;  %v6279_v9 = vadd.f32 %v6278_v34, %v6239_v45  ;;  %v6199_v37 = vpop.f32.mrb[113].mxu1  ;;  %v6280_v50 = vpop.f32.mrb[97].mxu0 }
0x2288   : > { %v6201_v53 = vpop.f32.mrb[114].mxu1  ;;  %v6281_v30 = vpop.f32.mrb[98].mxu0  ;;  %v7977_v8 = vadd.f32 %v6199_v37, %v5717_v7 }
0x2289   : > { %v9873_v56 = vpack.c.bf16 %v7976_v47, %v7976_v47  ;;  %v9875_v60 = vpack.c.bf16 %v6279_v9, %v6279_v9  ;;  %v6202_v63 = vpop.f32.mrb[115].mxu1  ;;  %v6282_v24 = vpop.f32.mrb[99].mxu0 }
0x228a   : > { %v9894_v13 = vpack.c.bf16 %v7977_v8, %v7977_v8 }
0x228b   : > { %6305 = vrot.lane.b32.xlu0 %v9875_v60, %s10348_s2  ;;  %6301 = vrot.lane.b32.xlu1 %v9873_v56, %s10348_s2  ;;  %v6290_v62 = vrot.slane %v9873_v56, 4  ;;  %v6292_v58 = vrot.slane %v9875_v60, 4 }
0x228c   : > { %v6291_v11 = vrot.slane %v9894_v13, 4 }
0x228f   : > { %6321 = vrot.lane.b32.xlu0 %v9875_v60, %s10367_s5  ;;  %6317 = vrot.lane.b32.xlu1 %v9873_v56, %s10367_s5 }
0x2293   : > { %6337 = vrot.lane.b32.xlu0 %v9875_v60, %s10368_s7  ;;  %6333 = vrot.lane.b32.xlu1 %v9873_v56, %s10368_s7 }
0x2297   : > { %6353 = vrot.lane.b32.xlu0 %v9875_v60, %s10369_s15  ;;  %6349 = vrot.lane.b32.xlu1 %v9873_v56, %s10369_s15 }
0x229b   : > { %6293 = vrot.lane.b32.xlu0 %v6290_v62, %s10334_s1  ;;  %6303 = vrot.lane.b32.xlu1 %v9894_v13, %s10348_s2 }
0x229f   : > { %6313 = vrot.lane.b32.xlu0 %v6292_v58, %s10370_s4  ;;  %6319 = vrot.lane.b32.xlu1 %v9894_v13, %s10367_s5 }
0x22a3   : > { %6309 = vrot.lane.b32.xlu0 %v6290_v62, %s10370_s4  ;;  %6335 = vrot.lane.b32.xlu1 %v9894_v13, %s10368_s7 }
0x22a7   : > { %6329 = vrot.lane.b32.xlu0 %v6292_v58, %s10354_s18  ;;  %6351 = vrot.lane.b32.xlu1 %v9894_v13, %s10369_s15 }
0x22ab   : > { %6325 = vrot.lane.b32.xlu0 %v6290_v62, %s10354_s18  ;;  %6297 = vrot.lane.b32.xlu1 %v6292_v58, %s10334_s1 }
0x22af   : > { %6345 = vrot.lane.b32.xlu0 %v6292_v58, %s10371_s3  ;;  %6370 = vrot.lane.b32.xlu1 %v9803_v3, %s10348_s2 }
0x22b3   : > { %6341 = vrot.lane.b32.xlu0 %v6290_v62, %s10371_s3  ;;  %6382 = vrot.lane.b32.xlu1 %v9798_v59, %s10370_s4 }
0x22b7   : > { %6295 = vrot.lane.b32.xlu0 %v6291_v11, %s10334_s1  ;;  %6311 = vrot.lane.b32.xlu1 %v6291_v11, %s10370_s4 }
0x22bb   : > { %6362 = vrot.lane.b32.xlu0 %v9790_v55, %s10334_s1  ;;  %6327 = vrot.lane.b32.xlu1 %v6291_v11, %s10354_s18 }
0x22bf   : > { %6380 = vrot.lane.b32.xlu0 %v9780_v49, %s10370_s4  ;;  %6343 = vrot.lane.b32.xlu1 %v6291_v11, %s10371_s3 }
0x22c3   : > { %6388 = vrot.lane.b32.xlu0 %v9785_v33, %s10367_s5  ;;  %6390 = vrot.lane.b32.xlu1 %v9806_v54, %s10367_s5 }
0x22c7   : > { %6378 = vrot.lane.b32.xlu0 %v9790_v55, %s10370_s4  ;;  %6386 = vrot.lane.b32.xlu1 %v9803_v3, %s10367_s5 }
0x22cb   : > { %6396 = vrot.lane.b32.xlu0 %v9780_v49, %s10354_s18  ;;  %6398 = vrot.lane.b32.xlu1 %v9798_v59, %s10354_s18 }
0x22cf   : > { %6404 = vrot.lane.b32.xlu0 %v9785_v33, %s10368_s7  ;;  %6406 = vrot.lane.b32.xlu1 %v9806_v54, %s10368_s7 }
0x22d3   : > { %6394 = vrot.lane.b32.xlu0 %v9790_v55, %s10354_s18  ;;  %6402 = vrot.lane.b32.xlu1 %v9803_v3, %s10368_s7 }
0x22d7   : > { %6528 = vrot.lane.b32.xlu1 %v6520_v48, %s10371_s3  ;;  %6526 = vrot.lane.b32.xlu0 %v6518_v52, %s10371_s3 }
0x22db   : > { %6539 = vperm.xlu1 %8104, %v6536_v19   ;;  %6524 = vrot.lane.b32.xlu0 %v6515_v36, %s10371_s3 }
0x22fd   : > { %v6302_v17 = vpop.permute.xlu1 %6301  ;;  %v6306_v59 = vpop.permute.xlu0 %6305 }
0x2301   : > { %v9971_v22 = vpop.permute.xlu1 %6317  ;;  %v6322_v49 = vpop.permute.xlu0 %6321 }
0x2305   : > { %v9973_v26 = vpop.permute.xlu1 %6333  ;;  %v6338_v23 = vpop.permute.xlu0 %6337 }
0x2309   : > { %v9975_v51 = vpop.permute.xlu1 %6349  ;;  %v9977_v27 = vpop.permute.xlu0 %6353 }
0x230a   : > { %v6468_v15 = vsel %vm1637_vm15, %v9977_v27, %v9806_v54  ;;  %v6480_v54 = vsel %vm1637_vm15, %v9854_v35, %v9858_v29 }
0x230d   : > { %v6304_v28 = vpop.permute.xlu1 %6303  ;;  %v6294_v21 = vpop.permute.xlu0 %6293 }
0x230e   : > { %v6308_v8 = vsel %vm1485_vm9, %v6304_v28, %v6306_v59 }
0x2311   : > { %v6320_v2 = vpop.permute.xlu1 %6319  ;;  %v6314_v10 = vpop.permute.xlu0 %6313 }
0x2312   : > { %v6432_v46 = vsel %vm1637_vm15, %v6306_v59, %v6314_v10  ;;  %v6324_v48 = vsel %vm10376_vm6, %v6320_v2, %v6322_v49 }
0x2315   : > { %v9979_v55 = vpop.permute.xlu1 %6335  ;;  %v6310_v0 = vpop.permute.xlu0 %6309 }
0x2319   : > { %v9981_v38 = vpop.permute.xlu1 %6351  ;;  %v6330_v41 = vpop.permute.xlu0 %6329 }
0x231a   : > { %v6444_v9 = vsel %vm1637_vm15, %v6322_v49, %v6330_v41  ;;  %v6323_v49 = vsel %vm10378_vm8, %v9971_v22, %v6320_v2  ;;  %v6356_v29 = vsel %vm10381_vm2, %v9981_v38, %v9977_v27  ;;  %vm10385_vm8 = vmmov %vm10376_vm6 }
0x231d   : > { %v6298_v42 = vpop.permute.xlu1 %6297  ;;  %v6326_v57 = vpop.permute.xlu0 %6325 }
0x231e   : > { %v6420_v12 = vsel %vm1637_vm15, %v9875_v60, %v6298_v42 }
0x231f   : > { %6593 = vmatpush1.bf16.msra.mxu1 %v6420_v12  ;;  %v6464_v12 = vsel %vm1637_vm15, %v6356_v29, %v9785_v33 }
0x2320   : > { %6594 = vmatprep.subr.bf16.mxu1 %v8500_v43 }
0x2321   : > { %v9986_v44 = vpop.permute.xlu1 %6370  ;;  %v6346_v45 = vpop.permute.xlu0 %6345 }
0x2322   : > { %v6456_v53 = vsel %vm1637_vm15, %v6338_v23, %v6346_v45 }
0x2323   : > { %6595 = vmatpush1.bf16.msra.mxu1 %v6432_v46 }
0x2324   : > { %6596 = vmatprep.subr.bf16.mxu1 %v8500_v43 }
0x2325   : > { %v9990_v34 = vpop.permute.xlu1 %6382  ;;  %v6342_v47 = vpop.permute.xlu0 %6341 }
0x2327   : > { %6597 = vmatpush1.bf16.msra.mxu1 %v6444_v9 }
0x2328   : > { %6598 = vmatprep.subr.bf16.mxu1 %v8500_v43 }
0x2329   : > { %v6312_v37 = vpop.permute.xlu1 %6311  ;;  %v6296_v50 = vpop.permute.xlu0 %6295 }
0x232a   : > { %v6316_v30 = vsel %vm10374_vm14, %v6312_v37, %v6314_v10  ;;  %v6299_v60 = vsel %vm1449_vm1, %v6294_v21, %v6296_v50  ;;  %v6300_v63 = vsel %vm1449_vm1, %v6296_v50, %v6298_v42  ;;  %v6315_v62 = vsel %vm10375_vm4, %v6310_v0, %v6312_v37  ;;  %vm10382_vm14 = vmmov %vm10379_vm13 }
0x232b   : > { %6599 = vmatpush1.bf16.msra.mxu1 %v6456_v53  ;;  %v6416_v24 = vsel %vm1637_vm15, %v9894_v13, %v6300_v63  ;;  %v6412_v7 = vsel %vm1637_vm15, %v9873_v56, %v6299_v60  ;;  %v6428_v39 = vsel %vm1637_vm15, %v6308_v8, %v6316_v30  ;;  %v6307_v56 = vsel %vm1485_vm9, %v6302_v17, %v6304_v28  ;;  %vm10383_vm4 = vmmov %vm10381_vm2 }
0x232c   : > { %6551 = vmatprep.subr.bf16.mxu0 %v6416_v24  ;;  %6600 = vmatprep.subr.bf16.mxu1 %v8500_v43  ;;  %v6424_v52 = vsel %vm1637_vm15, %v6307_v56, %v6315_v62  ;;  %v6340_v28 = vsel %vm10379_vm13, %v9979_v55, %v6338_v23  ;;  %v6339_v23 = vsel %vm10382_vm14, %v9973_v26, %v9979_v55 }
0x232d   : > { %v6328_v58 = vpop.permute.xlu1 %6327  ;;  %6552 = vmatpush1.bf16.msra.mxu0 %v6412_v7  ;;  %v6363_v11 = vpop.permute.xlu0 %6362  ;;  %v6355_v42 = vsel %vm10383_vm4, %v9975_v51, %v9981_v38  ;;  %v6376_v51 = vsel %vm1485_vm9, %v9986_v44, %v9860_v31 }
0x232e   : > { %v6332_v13 = vsel %vm1530_vm10, %v6328_v58, %v6330_v41  ;;  %6553 = vmatprep.subr.bf16.mxu0 %v6428_v39  ;;  %v6331_v18 = vsel %vm1530_vm10, %v6326_v57, %v6328_v58  ;;  %v6368_v26 = vsel %vm1449_vm1, %v6363_v11, %v9856_v61  ;;  %v7377_v58 = vcombine.low %v9936_v14, %v9936_v14 }
0x232f   : > { %6601 = vmatpush1.bf16.msra.mxu1 %v6468_v15  ;;  %v6440_v59 = vsel %vm1637_vm15, %v6324_v48, %v6332_v13  ;;  %v6436_v21 = vsel %vm1637_vm15, %v6323_v49, %v6331_v18  ;;  %v6472_v38 = vsel %vm1637_vm15, %v6368_v26, %v6376_v51  ;;  %v6772_v51 = vld [vmem:[%s10391_s8] sm:$0xff] }
0x2330   : > { %6602 = vmatprep.subr.bf16.mxu1 %v8500_v43 }
0x2331   : > { %v6344_v19 = vpop.permute.xlu1 %6343  ;;  %6554 = vmatpush1.bf16.msra.mxu0 %v6424_v52  ;;  %v6381_v36 = vpop.permute.xlu0 %6380 }
0x2332   : > { %v6348_v17 = vsel %vm10377_vm5, %v6344_v19, %v6346_v45  ;;  %6555 = vmatprep.subr.bf16.mxu0 %v6440_v59  ;;  %v6347_v10 = vsel %vm10380_vm3, %v6342_v47, %v6344_v19  ;;  %v6460_v45 = vsel %vm1637_vm15, %v6355_v42, %v9803_v3  ;;  %vm10384_vm5 = vcmask 900096   ;;  %vm10387_vm3 = vmmov %vm10382_vm14 }
0x2333   : > { %6603 = vmatpush1.bf16.msra.mxu1 %v6480_v54  ;;  %v6452_v35 = vsel %vm1637_vm15, %v6340_v28, %v6348_v17  ;;  %v6448_v2 = vsel %vm1637_vm15, %v6339_v23, %v6347_v10  ;;  %v6385_v33 = vsel %vm10384_vm5, %v6381_v36, %v9990_v34  ;;  %vm10386_vm13 = vmmov %vm10384_vm5  ;;  %vm10389_vm14 = vcmask 744448  }
0x2334   : > { %6604 = vmatprep.subr.bf16.mxu1 %v8500_v43  ;;  %vm10388_vm2 = vmmov %vm10387_vm3 }
0x2335   : > { %v6391_v0 = vpop.permute.xlu1 %6390  ;;  %6556 = vmatpush1.bf16.msra.mxu0 %v6436_v21  ;;  %v6389_v41 = vpop.permute.xlu0 %6388  ;;  %vm10390_vm4 = vmmov %vm10389_vm14 }
0x2336   : > { %v6492_v22 = vsel %vm1637_vm15, %v9990_v34, %v6391_v0  ;;  %6557 = vmatprep.subr.bf16.mxu0 %v6452_v35  ;;  %v6393_v47 = vsel %vm10376_vm6, %v6389_v41, %v6391_v0  ;;  %vm10392_vm6 = vmmov %vm10384_vm5 }
0x2337   : > { %6605 = vmatpush1.bf16.msra.mxu1 %v6492_v22  ;;  %v6488_v50 = vsel %vm1637_vm15, %v6385_v33, %v6393_v47 }
0x2338   : > { %6606 = vmatprep.subr.bf16.mxu1 %v8500_v43 }
0x2339   : > { %v6387_v57 = vpop.permute.xlu1 %6386  ;;  %6558 = vmatpush1.bf16.msra.mxu0 %v6448_v2  ;;  %v6379_v27 = vpop.permute.xlu0 %6378 }
0x233a   : > { %6559 = vmatprep.subr.bf16.mxu0 %v6464_v12  ;;  %v6392_v3 = vsel %vm10385_vm8, %v6387_v57, %v6389_v41  ;;  %v6384_v61 = vsel %vm10386_vm13, %v6379_v27, %v6381_v36  ;;  %vm10396_vm13 = vmmov %vm10390_vm4 }
0x233b   : > { %v6484_v44 = vsel %vm1637_vm15, %v6384_v61, %v6392_v3 }
0x233d   : > { %v6399_v55 = vpop.permute.xlu1 %6398  ;;  %6560 = vmatpush1.bf16.msra.mxu0 %v6460_v45  ;;  %v6397_v46 = vpop.permute.xlu0 %6396 }
0x233e   : > { %6561 = vmatprep.subr.bf16.mxu0 %v9869_v32  ;;  %v6401_v31 = vsel %vm1530_vm10, %v6397_v46, %v6399_v55 }
0x2341   : > { %v6407_v9 = vpop.permute.xlu1 %6406  ;;  %6562 = vmatpush1.bf16.msra.mxu0 %v6472_v38  ;;  %v6405_v37 = vpop.permute.xlu0 %6404 }
0x2342   : > { %v6504_v32 = vsel %vm1637_vm15, %v6399_v55, %v6407_v9  ;;  %v6409_v53 = vsel %vm10387_vm3, %v6405_v37, %v6407_v9  ;;  %6563 = vmatprep.subr.bf16.mxu0 %v6488_v50  ;;  %vm10399_vm3 = vmmov %vm10390_vm4 }
0x2343   : > { %6607 = vmatpush1.bf16.msra.mxu1 %v6504_v32  ;;  %v6500_v60 = vsel %vm1637_vm15, %v6401_v31, %v6409_v53 }
0x2344   : > { %6608 = vmatprep.subr.bf16.mxu1 %v8500_v43 }
0x2345   : > { %v6403_v34 = vpop.permute.xlu1 %6402  ;;  %6564 = vmatpush1.bf16.msra.mxu0 %v6484_v44  ;;  %v6395_v30 = vpop.permute.xlu0 %6394 }
0x2346   : > { %v6408_v63 = vsel %vm10388_vm2, %v6403_v34, %v6405_v37  ;;  %v6400_v24 = vsel %vm1530_vm10, %v6395_v30, %v6397_v46  ;;  %6565 = vmatprep.subr.bf16.mxu0 %v6500_v60 }
0x2347   : > { %v6496_v7 = vsel %vm1637_vm15, %v6400_v24, %v6408_v63 }
0x2349   : > { %v6529_v8 = vpop.permute.xlu1 %6528  ;;  %6566 = vmatpush1.bf16.msra.mxu0 %v6496_v7  ;;  %v6527_v62 = vpop.permute.xlu0 %6526 }
0x234a   : > { %6609 = vmatpush1.bf16.msra.mxu1 %v6529_v8  ;;  %v6531_v11 = vsel %vm10389_vm14, %v6527_v62, %v6529_v8 }
0x234b   : > { %6567 = vmatprep.subr.bf16.mxu0 %v6531_v11  ;;  %7956 = vmatprep.subr.bf16.mxu1 %v8498_v40 }
0x234d   : > { %6625 = vmatmul.mubr.bf16.vlgmr.msra.gmra.mrb[116].mxu1 %v7377_v58  ;;  %v6525_v39 = vpop.permute.xlu0 %6524 }
0x234e   : > { %v6530_v15 = vsel %vm10390_vm4, %v6525_v39, %v6527_v62  ;;  %7966 = vmatprep.mubr.msk.bf16.mxu1 %vm8501_vm0, %v8498_v40 }
0x234f   : > { %6568 = vmatpush1.bf16.msra.mxu0 %v6530_v15 }
0x2352   : > { %6584 = vmatmul.mubr.bf16.vlgmr.msra.gmra.mrb[100].mxu0 %v7377_v58 }
0x2353   : > { %6822 = vmatprep.mubr.bf16.mxu0 %v8500_v43 }
0x235a   : > { %v6540_v13 = vpop.permute.xlu1 %6539 }
0x2420   : > { %v6626_v56 = vpop.f32.mrb[116].mxu1 }
0x2421   : > { %v6627_v14 = vadd.f32 %v6626_v56, %v6540_v13  ;;  %v6628_v48 = vpop.f32.mrb[117].mxu1 }
0x2422   : > { %v6629_v52 = vpop.f32.mrb[118].mxu1 }
0x2423   : > { %v6634_v18 = vmax.f32 %v6627_v14, 0.0  ;;  %v6630_v19 = vpop.f32.mrb[119].mxu1 }
0x2425   : > { %v6637_v36 = vmul.f32 %v6634_v18, %v8938_v25  ;;  %v6585_v59 = vpop.f32.mrb[100].mxu0 }
0x2426   : > { %v6586_v54 = vadd.f32 %v6585_v59, %v6540_v13  ;;  %v6587_v17 = vpop.f32.mrb[101].mxu0 }
0x2427   : > { %v6640_v49 = vpack.c.bf16 %v6637_v36, %v6637_v36  ;;  %v6588_v28 = vadd.f32 %v6587_v17, %v6540_v13  ;;  %v6589_v21 = vpop.f32.mrb[102].mxu0 }
0x2428   : > { %v6590_v10 = vpop.f32.mrb[103].mxu0  ;;  %v6632_v0 = vmax.f32 %v6586_v54, 0.0 }
0x2429   : > { %v6633_v41 = vmax.f32 %v6588_v28, 0.0  ;;  %6648 = vrot.lane.b32.xlu1 %v6640_v49, %s10366_s0 }
0x242a   : > { %v6635_v29 = vmul.f32 %v6632_v0, %v8934_v16 }
0x242b   : > { %v6636_v35 = vmul.f32 %v6633_v41, %v8936_v20 }
0x242c   : > { %v6638_v23 = vpack.c.bf16 %v6635_v29, %v6635_v29 }
0x242d   : > { %v6639_v22 = vpack.c.bf16 %v6636_v35, %v6636_v35 }
0x242f   : > { %6646 = vrot.lane.b32.xlu0 %v6639_v22, %s10366_s0 }
0x2433   : > { %6644 = vrot.lane.b32.xlu0 %v6638_v23, %s10366_s0 }
0x249b   : > { %v6649_v12 = vpop.permute.xlu1 %6648 }
0x24a1   : > { %v6647_v2 = vpop.permute.xlu0 %6646 }
0x24a2   : > { %v6651_v45 = vsel %vm1788_vm11, %v6647_v2, %v6649_v12 }
0x24a3   : > { %v6655_v26 = vsel %vm1795_vm7, %v6651_v45, 0 }
0x24a4   : > { %v6660_v47 = vrot.slane %v6655_v26, 4 }
0x24a5   : > { %v6645_v42 = vpop.permute.xlu0 %6644 }
0x24a6   : > { %v6653_v57 = vsel %vm1788_vm11, 0, %v6645_v42  ;;  %v6650_v55 = vsel %vm1788_vm11, %v6645_v42, %v6647_v2 }
0x24a7   : > { %6669 = vrot.lane.b32.xlu0 %v6653_v57, %s10348_s2  ;;  %v6658_v27 = vrot.slane %v6653_v57, 4  ;;  %v6659_v46 = vrot.slane %v6650_v55, 4 }
0x24a9   : > { %6661 = vrot.lane.b32.xlu1 %v6658_v27, %s10334_s1 }
0x24ab   : > { %6685 = vrot.lane.b32.xlu0 %v6653_v57, %s10367_s5 }
0x24ad   : > { %6673 = vrot.lane.b32.xlu1 %v6655_v26, %s10348_s2 }
0x24af   : > { %6671 = vrot.lane.b32.xlu0 %v6650_v55, %s10348_s2  ;;  %s10402_s2 = sld [smem:[#allocation27_spill]] }
0x24b1   : > { %6677 = vrot.lane.b32.xlu1 %v6658_v27, %s10370_s4 }
0x24b3   : > { %6687 = vrot.lane.b32.xlu0 %v6650_v55, %s10367_s5 }
0x24b5   : > { %6689 = vrot.lane.b32.xlu1 %v6655_v26, %s10367_s5 }
0x24b7   : > { %6679 = vrot.lane.b32.xlu0 %v6659_v46, %s10370_s4 }
0x24b9   : > { %6693 = vrot.lane.b32.xlu1 %v6658_v27, %s10354_s18 }
0x24bb   : > { %6695 = vrot.lane.b32.xlu0 %v6659_v46, %s10354_s18 }
0x24bd   : > { %6663 = vrot.lane.b32.xlu1 %v6659_v46, %s10334_s1 }
0x24bf   : > { %6665 = vrot.lane.b32.xlu0 %v6660_v47, %s10334_s1  ;;  %s10397_s1 = sld [smem:[#allocation21_spill]] }
0x24c1   : > { %6705 = vrot.lane.b32.xlu1 %v6655_v26, %s10368_s7 }
0x24c3   : > { %6703 = vrot.lane.b32.xlu0 %v6650_v55, %s10368_s7 }
0x24c5   : > { %6681 = vrot.lane.b32.xlu1 %v6660_v47, %s10370_s4 }
0x24c7   : > { %6711 = vrot.lane.b32.xlu0 %v6659_v46, %s10371_s3 }
0x24c9   : > { %6697 = vrot.lane.b32.xlu1 %v6660_v47, %s10354_s18 }
0x24cb   : > { %6701 = vrot.lane.b32.xlu0 %v6653_v57, %s10368_s7 }
0x24cd   : > { %6713 = vrot.lane.b32.xlu1 %v6660_v47, %s10371_s3 }
0x24cf   : > { %6717 = vrot.lane.b32.xlu0 %v6653_v57, %s10369_s15 }
0x24d1   : > { %6709 = vrot.lane.b32.xlu1 %v6658_v27, %s10371_s3  ;;  %s10403_s3 = smul.u32 3, %s10405_s23 }
0x24d3   : > { %6721 = vrot.lane.b32.xlu0 %v6655_v26, %s10369_s15  ;;  %s1403_s18 = scalar_lea.vmem %s8769_s22, %s10403_s3 }
0x24d5   : > { %6719 = vrot.lane.b32.xlu1 %v6650_v55, %s10369_s15 }
0x24d9   : > { %6775 = vperm.xlu1 %8104, %v6772_v51  }
0x2519   : > { %v6670_v33 = vpop.permute.xlu0 %6669 }
0x251b   : > { %v6662_v38 = vpop.permute.xlu1 %6661 }
0x251d   : > { %v6686_v3 = vpop.permute.xlu0 %6685 }
0x251f   : > { %v6674_v61 = vpop.permute.xlu1 %6673 }
0x2521   : > { %v6672_v9 = vpop.permute.xlu0 %6671 }
0x2522   : > { %v6676_v15 = vsel %vm1485_vm9, %v6672_v9, %v6674_v61  ;;  %v6675_v14 = vsel %vm1485_vm9, %v6670_v33, %v6672_v9 }
0x2523   : > { %v6678_v37 = vpop.permute.xlu1 %6677 }
0x2525   : > { %v6688_v50 = vpop.permute.xlu0 %6687 }
0x2527   : > { %v6690_v32 = vpop.permute.xlu1 %6689 }
0x2529   : > { %v6680_v53 = vpop.permute.xlu0 %6679 }
0x252a   : > { %v6683_v11 = vsel %vm10392_vm6, %v6678_v37, %v6680_v53 }
0x252b   : > { %v6694_v31 = vpop.permute.xlu1 %6693  ;;  %v6737_v18 = vsel %vm1637_vm15, %v6675_v14, %v6683_v11  ;;  %v6896_v11 = vld [vmem:[#allocation2] sm:$0x1] }
0x252d   : > { %v6696_v44 = vpop.permute.xlu0 %6695 }
0x252e   : > { %v6699_v19 = vsel %vm1530_vm10, %v6694_v31, %v6696_v44 }
0x252f   : > { %v6664_v34 = vpop.permute.xlu1 %6663 }
0x2530   : > { %v6667_v30 = vsel %vm1449_vm1, %v6662_v38, %v6664_v34 }
0x2531   : > { %v6666_v60 = vpop.permute.xlu0 %6665  ;;  %v6726_v62 = vsel %vm1637_vm15, %v6653_v57, %v6667_v30 }
0x2532   : > { %v6668_v63 = vsel %vm1449_vm1, %v6664_v34, %v6666_v60  ;;  %v6733_v24 = vsel %vm1637_vm15, %v6655_v26, %v6666_v60  ;;  %vm10393_vm1 = vmmov %vm10385_vm8 }
0x2533   : > { %7957 = vmatpush3.bf16.msra.mxu1 %v6733_v24  ;;  %v6706_v7 = vpop.permute.xlu1 %6705  ;;  %v6730_v8 = vsel %vm1637_vm15, %v6650_v55, %v6668_v63  ;;  %v6692_v59 = vsel %vm10393_vm1, %v6688_v50, %v6690_v32  ;;  %vm10394_vm9 = vmmov %vm10393_vm1  ;;  %v6771_v55 = vld [vmem:[%s10397_s1] sm:$0xf] }
0x2534   : > { %6790 = vmatprep.subr.bf16.mxu0 %v6730_v8  ;;  %7958 = vmatprep.subr.bf16.mxu1 %v8498_v40  ;;  %v6691_v49 = vsel %vm10394_vm9, %v6686_v3, %v6688_v50  ;;  %vm10395_vm8 = vmmov %vm10388_vm2 }
0x2535   : > { %v6704_v58 = vpop.permute.xlu0 %6703  ;;  %6791 = vmatpush1.bf16.msra.mxu0 %v6726_v62  ;;  %v6749_v10 = vsel %vm1637_vm15, %v6691_v49, %v6699_v19 }
0x2536   : > { %v6708_v41 = vsel %vm10395_vm8, %v6704_v58, %v6706_v7 }
0x2537   : > { %v6682_v39 = vpop.permute.xlu1 %6681 }
0x2538   : > { %v6684_v13 = vsel %vm10384_vm5, %v6680_v53, %v6682_v39  ;;  %v6745_v56 = vsel %vm1637_vm15, %v6674_v61, %v6682_v39 }
0x2539   : > { %v6712_v48 = vpop.permute.xlu0 %6711  ;;  %7959 = vmatpush3.bf16.msra.mxu1 %v6745_v56  ;;  %v6741_v52 = vsel %vm1637_vm15, %v6676_v15, %v6684_v13  ;;  %v6895_v56 = vld [vmem:[%s10402_s2] sm:$0x1] }
0x253a   : > { %6792 = vmatprep.subr.bf16.mxu0 %v6741_v52  ;;  %7960 = vmatprep.subr.bf16.mxu1 %v8498_v40 }
0x253b   : > { %6793 = vmatpush1.bf16.msra.mxu0 %v6737_v18  ;;  %v6698_v36 = vpop.permute.xlu1 %6697 }
0x253c   : > { %v6700_v54 = vsel %vm1530_vm10, %v6696_v44, %v6698_v36  ;;  %v6757_v17 = vsel %vm1637_vm15, %v6690_v32, %v6698_v36  ;;  %vm10398_vm10 = vmmov %vm10388_vm2  ;;  %vm10400_vm2 = vcmask 736256  }
0x253d   : > { %v6702_v28 = vpop.permute.xlu0 %6701  ;;  %7961 = vmatpush3.bf16.msra.mxu1 %v6757_v17  ;;  %v6753_v21 = vsel %vm1637_vm15, %v6692_v59, %v6700_v54  ;;  %vm10401_vm14 = vmmov %vm10400_vm2 }
0x253e   : > { %6794 = vmatprep.subr.bf16.mxu0 %v6753_v21  ;;  %7962 = vmatprep.subr.bf16.mxu1 %v8498_v40  ;;  %v6707_v42 = vsel %vm10398_vm10, %v6702_v28, %v6704_v58 }
0x253f   : > { %6795 = vmatpush1.bf16.msra.mxu0 %v6749_v10  ;;  %v6714_v0 = vpop.permute.xlu1 %6713 }
0x2540   : > { %v6716_v35 = vsel %vm10396_vm13, %v6712_v48, %v6714_v0  ;;  %v6769_v29 = vsel %vm1637_vm15, %v6706_v7, %v6714_v0 }
0x2541   : > { %v6718_v22 = vpop.permute.xlu0 %6717  ;;  %7963 = vmatpush3.bf16.msra.mxu1 %v6769_v29  ;;  %v6765_v23 = vsel %vm1637_vm15, %v6708_v41, %v6716_v35 }
0x2542   : > { %6796 = vmatprep.subr.bf16.mxu0 %v6765_v23  ;;  %7964 = vmatprep.subr.bf16.mxu1 %v8498_v40 }
0x2543   : > { %v6710_v2 = vpop.permute.xlu1 %6709 }
0x2544   : > { %v6715_v57 = vsel %vm10399_vm3, %v6710_v2, %v6712_v48 }
0x2545   : > { %v6722_v27 = vpop.permute.xlu0 %6721  ;;  %v6761_v12 = vsel %vm1637_vm15, %v6707_v42, %v6715_v57 }
0x2546   : > { %v6788_v45 = vsel %vm1637_vm15, %v6722_v27, 0  ;;  %6797 = vmatpush1.bf16.msra.mxu0 %v6761_v12 }
0x2547   : > { %7965 = vmatpush3.bf16.msra.mxu1 %v6788_v45  ;;  %v6720_v26 = vpop.permute.xlu1 %6719 }
0x2548   : > { %v6723_v46 = vsel %vm10400_vm2, %v6718_v22, %v6720_v26  ;;  %v6724_v47 = vsel %vm10401_vm14, %v6720_v26, %v6722_v27 }
0x2549   : > { %v6782_v51 = vsel %vm1637_vm15, %v6723_v46, 0  ;;  %7381 = vmatprep.subr.msk.bf16.mxu0 %vm1637_vm15, %v6724_v47 }
0x254a   : > { %6799 = vmatpush1.bf16.msra.mxu0 %v6782_v51  ;;  %7967 = vmatmul.mubr.msk.bf16.vlgmr.msra.gmra.mrb[120].mxu1 %vm1920_vm12, %v6771_v55 }
0x254d   : > { %7382 = vmatmul.mubr.msk.bf16.vlgmr.msra.gmra.mrb[104].mxu0 %vm1920_vm12, %v6771_v55  ;;  %vm6906_vm12 = vcmask 64512  }
0x254e   : > { %6949 = vmatprep.mubr.bf16.mxu0 %v8500_v43 }
0x2558   : > { %v6776_v38 = vpop.permute.xlu1 %6775 }
0x261d   : > { %v6865_v33 = vpop.f32.mrb[120].mxu1 }
0x261e   : > { %v7968_v3 = vpop.f32.mrb[121].mxu1  ;;  %v6866_v61 = vadd.f32 %v6865_v33, %v6776_v38 }
0x261f   : > { %v6868_v9 = vpop.f32.mrb[122].mxu1 }
0x2620   : > { %v6824_v37 = vpop.f32.mrb[104].mxu0  ;;  %v7969_v50 = vpop.f32.mrb[123].mxu1  ;;  %v6873_v34 = vmax.f32 %v6866_v61, 0.0 }
0x2621   : > { %v6825_v32 = vadd.f32 %v6824_v37, %v6776_v38  ;;  %v6826_v53 = vpop.f32.mrb[105].mxu0 }
0x2622   : > { %v6827_v31 = vadd.f32 %v6826_v53, %v6776_v38  ;;  %v6828_v44 = vpop.f32.mrb[106].mxu0  ;;  %v6876_v43 = vmul.f32 %v6873_v34, %v8938_v25 }
0x2623   : > { %v6871_v30 = vmax.f32 %v6825_v32, 0.0  ;;  %v6829_v60 = vpop.f32.mrb[107].mxu0 }
0x2624   : > { %v6872_v63 = vmax.f32 %v6827_v31, 0.0  ;;  %v6879_v58 = vpack.c.bf16 %v6876_v43, %v6876_v43 }
0x2625   : > { %v6874_v24 = vmul.f32 %v6871_v30, %v8934_v16 }
0x2626   : > { %v6875_v7 = vmul.f32 %v6872_v63, %v8936_v20 }
0x2627   : > { %v6877_v8 = vpack.c.bf16 %v6874_v24, %v6874_v24 }
0x2628   : > { %v6878_v62 = vpack.c.bf16 %v6875_v7, %v6875_v7 }
0x2629   : > { %6883 = vrot.lane.b32.xlu0 %v6877_v8, %s10366_s0 }
0x262a   : > { %6885 = vrot.lane.b32.xlu1 %v6878_v62, %s10366_s0 }
0x262d   : > { %6887 = vrot.lane.b32.xlu0 %v6879_v58, %s10366_s0 }
0x262e   : > { %6899 = vperm.xlu1 %8104, %v6896_v11  }
0x269b   : > { %v6884_v39 = vpop.permute.xlu0 %6883 }
0x269c   : > { %v6892_v15 = vsel %vm1788_vm11, 0, %v6884_v39  ;;  %v6886_v16 = vpop.permute.xlu1 %6885 }
0x269d   : > { %v6910_v20 = vsel %vm1637_vm15, %v6892_v15, 0  ;;  %v6889_v25 = vsel %vm1788_vm11, %v6884_v39, %v6886_v16 }
0x269e   : > { %7384 = vmatprep.subr.msk.bf16.mxu0 %vm1637_vm15, %v6889_v25 }
0x269f   : > { %6918 = vmatpush1.bf16.msra.mxu0 %v6910_v20  ;;  %v6888_v13 = vpop.permute.xlu0 %6887 }
0x26a0   : > { %v6890_v14 = vsel %vm1788_vm11, %v6886_v16, %v6888_v13  ;;  %7970 = vmatprep.subr.bf16.mxu0 %v8498_v40 }
0x26a1   : > { %v6894_v48 = vsel %vm1795_vm7, %v6890_v14, 0 }
0x26a2   : > { %7385 = vmatmul.mubr.msk.bf16.vlgmr.msra.gmra.mrb[108].mxu0 %vm6906_vm12, %v6895_v56  ;;  %v6915_v52 = vsel %vm1637_vm15, %v6894_v48, 0 }
0x26a3   : > { %7971 = vmatpush3.bf16.msra.mxu0 %v6915_v52  ;;  %7972 = vmatprep.mubr.msk.bf16.mxu0 %vm8501_vm0, %v8498_v40  ;;  %vm7027_vm0 = vcmp.lt.s32.totalorder %v1411_v1, 324 }
0x26aa   : > { %7973 = vmatmul.mubr.msk.bf16.vlgmr.msra.gmra.mrb[112].mxu0 %vm6906_vm12, %v6895_v56 }
0x26ad   : > { %v6900_v18 = vpop.permute.xlu1 %6899 }
0x26ae   : > { %v6905_v19 = vrot.slane %v6900_v18, %v1760_v5 }
0x2775   : > { %v6951_v36 = vpop.f32.mrb[108].mxu0 }
0x2776   : > { %v6952_v59 = vadd.f32 %v6951_v36, %v6905_v19  ;;  %v6953_v54 = vpop.f32.mrb[109].mxu0 }
0x2777   : > { %v6954_v17 = vadd.f32 %v6953_v54, %v6905_v19  ;;  %v6955_v49 = vpop.f32.mrb[110].mxu0 }
0x2778   : > { %v6956_v28 = vpop.f32.mrb[111].mxu0 }
0x2779   : > { %v7001_v21 = vcombine.low %v6952_v59, %v6954_v17 }
0x277b   : > { %v7008_v40 = vrot.slane %v7001_v21, %v8786_v6 }
0x277d   : > { %v6992_v10 = vpop.f32.mrb[112].mxu0 }
0x277e   : > { %v6993_v0 = vadd.f32 %v6992_v10, %v6905_v19  ;;  %v7974_v41 = vpop.f32.mrb[113].mxu0 }
0x277f   : > { %v6995_v35 = vpop.f32.mrb[114].mxu0 }
0x2780   : > { %v7015_v29 = vrot.slane %v6993_v0, %v8786_v6  ;;  %v7975_v22 = vpop.f32.mrb[115].mxu0 }
0x2782   : > { %v7016_v4 = vcombine.low %v7008_v40, %v7015_v29 }
0x2784   : > { %v7023_v5 = vrot.slane %v7016_v4, %v8786_v6 }
0x2786   : > { %7029 = vst.msk [vmem:[%s1403_s18] sm:$0x7] %vm7027_vm0, %v7023_v5 }
0x2787 PF: > { %s107_s28 = sadd.s32 1, %s8442_s28  }
0x2788   : > { %p104_p4 = scmp.ge.s32.totalorder %s107_s28, 4  }
0x278a   :  { %106 = sbr.rel (!%p104_p4) target bundleno = 82 (0x52), region = 285 }

</bundles_post_ra>
